<compile_context>
chip_gen: v7x
topology: tpu7x:2x2x1
jax: 0.10.0
libtpu: 0.0.40
codegen_flags: <defaults>
</compile_context>

<pallas_src>
import functools

import jax
import jax.numpy as jnp
from jax.experimental import pallas as pl
from jax.experimental.pallas import tpu as pltpu

SOS_token = 0
EOS_token = 1


def cvae_forward_kernel(use_teacher_forcing,
                        tok_col_ref, dec_in_col_ref, h0_ref, c0_ref,
                        cond_ref, eps_ref,
                        enc_emb_ref, enc_w_ih_ref, enc_w_hh_ref, enc_b_ref,
                        w_ml_ref, b_ml_ref,
                        w_lc_lat_ref, w_lc_cond_ref, b_lc_ref,
                        dec_emb_ref, dec_w_ih_ref, dec_w_hh_ref, dec_b_ref,
                        w_out_ref, b_out_ref,
                        pred_ref, dist_ref, mean_ref, logvar_ref,
                        xg_enc_ref, xg_dec_ref, h_rows_ref):
    H = h0_ref.shape[1]
    VP = dist_ref.shape[1]          # lane-padded vocab (multiple of 128)
    L = dist_ref.shape[0]
    Z = eps_ref.shape[1]
    PL = xg_enc_ref.shape[0]        # sublane-padded sequence length

    lane_v = jax.lax.broadcasted_iota(jnp.int32, (1, VP), 1)
    tok_iota = jax.lax.broadcasted_iota(jnp.int32, (PL, VP), 1)

    def gate_math(gates, c):
        # PyTorch nn.LSTM gate order (i, f, g, o); H=128 -> lane-aligned slices.
        i = jax.nn.sigmoid(gates[:, 0:H])
        f = jax.nn.sigmoid(gates[:, H:2 * H])
        g = jnp.tanh(gates[:, 2 * H:3 * H])
        o = jax.nn.sigmoid(gates[:, 3 * H:4 * H])
        c_new = f * c + i * g
        h_new = o * jnp.tanh(c_new)
        return h_new, c_new

    # ------------- encoder: input-side precompute (off the serial chain) ----
    # one-hot(all tokens) @ emb  and  X @ W_ih + b  as two batched matmuls.
    oh_enc = (tok_iota == tok_col_ref[...]).astype(jnp.float32)          # (PL,VP)
    x_enc = jnp.dot(oh_enc, enc_emb_ref[...],
                    preferred_element_type=jnp.float32)                  # (PL,H)
    xg_enc_ref[...] = (jnp.dot(x_enc, enc_w_ih_ref[...],
                               preferred_element_type=jnp.float32)
                       + enc_b_ref[...])                                 # (PL,4H)

    # ------------- encoder serial loop: only h @ W_hh on the chain ----------
    h, c = h0_ref[...], c0_ref[...]
    for ei in range(L):
        gates = (xg_enc_ref[pl.ds(ei, 1), :]
                 + jnp.dot(h, enc_w_hh_ref[...],
                           preferred_element_type=jnp.float32))
        h, c = gate_math(gates, c)

    # ------------- middle sample: reparameterization ------------------------
    ml = (jnp.dot(h, w_ml_ref[...], preferred_element_type=jnp.float32)
          + b_ml_ref[...])                                               # (1,2Z)
    mean = ml[:, 0:Z]
    logvar = ml[:, Z:2 * Z]
    mean_ref[...] = mean
    logvar_ref[...] = logvar
    std = jnp.exp(0.5 * logvar)
    latent = mean + eps_ref[...] * std

    # latentcondition2hidden(cat((latent, condition), -1)) as a split matmul.
    dec_h = (jnp.dot(latent, w_lc_lat_ref[...],
                     preferred_element_type=jnp.float32)
             + jnp.dot(cond_ref[...], w_lc_cond_ref[...],
                       preferred_element_type=jnp.float32)
             + b_lc_ref[...])
    dec_c = jnp.zeros_like(dec_h)                                        # init_c0

    # ------------- decoder ---------------------------------------------------
    if L != PL:
        h_rows_ref[...] = jnp.zeros_like(h_rows_ref)   # keep padded rows clean

    h, c = dec_h, dec_c
    if use_teacher_forcing:
        # Decoder inputs ([SOS] + tokens[:-1]) are known: precompute relu(emb)
        # and the input-side gate contribution batched, off the serial chain.
        oh_dec = (tok_iota == dec_in_col_ref[...]).astype(jnp.float32)
        x_dec = jnp.maximum(
            jnp.dot(oh_dec, dec_emb_ref[...],
                    preferred_element_type=jnp.float32), 0.0)
        xg_dec_ref[...] = (jnp.dot(x_dec, dec_w_ih_ref[...],
                                   preferred_element_type=jnp.float32)
                           + dec_b_ref[...])
        for di in range(L):
            gates = (xg_dec_ref[pl.ds(di, 1), :]
                     + jnp.dot(h, dec_w_hh_ref[...],
                               preferred_element_type=jnp.float32))
            h, c = gate_math(gates, c)
            h_rows_ref[pl.ds(di, 1), :] = h
    else:
        # Greedy feedback: the next input depends on this step's argmax, so the
        # embedding / input matmul / output projection stay on the serial path.
        tok = SOS_token
        for di in range(L):
            oh = (lane_v == tok).astype(jnp.float32)                     # (1,VP)
            x = jnp.maximum(
                jnp.dot(oh, dec_emb_ref[...],
                        preferred_element_type=jnp.float32), 0.0)
            gates = (jnp.dot(x, dec_w_ih_ref[...],
                             preferred_element_type=jnp.float32)
                     + dec_b_ref[...]
                     + jnp.dot(h, dec_w_hh_ref[...],
                               preferred_element_type=jnp.float32))
            h, c = gate_math(gates, c)
            h_rows_ref[pl.ds(di, 1), :] = h
            logits = (jnp.dot(h, w_out_ref[...],
                              preferred_element_type=jnp.float32)
                      + b_out_ref[...])
            m = jnp.max(logits)
            tok = jnp.min(jnp.where(logits == m, lane_v, VP)).astype(jnp.int32)
            # TODO(synk): the data-dependent early break on EOS_token has no
            # static-shape Pallas equivalent; the greedy loop runs full length.

    # ------------- batched epilogue: projection + log-softmax + argmax ------
    logits_all = (jnp.dot(h_rows_ref[...], w_out_ref[...],
                          preferred_element_type=jnp.float32)
                  + b_out_ref[...])                                      # (PL,VP)
    if L != PL:
        logits_all = logits_all[0:L, :]                                  # (L,VP)
    m_all = jnp.max(logits_all, axis=1, keepdims=True)
    shifted = logits_all - m_all
    lse = jnp.log(jnp.sum(jnp.exp(shifted), axis=1, keepdims=True))
    dist_ref[...] = shifted - lse                                        # LogSoftmax

    ids_all = jax.lax.broadcasted_iota(jnp.int32, (L, VP), 1)
    # topk(1)[1]: first index attaining the max (matches torch tie-break).
    pred_ref[...] = jnp.min(jnp.where(logits_all == m_all, ids_all, VP),
                            axis=1, keepdims=True).astype(jnp.int32)


def cvae_forward(tokens, enc_h0, enc_c0, condition, eps, params,
                 use_teacher_forcing=True):
    L = int(tokens.shape[0])
    V = params["enc_emb"].shape[0]
    H = enc_h0.shape[1]
    Z = eps.shape[1]
    VP = max(128, ((V + 127) // 128) * 128)   # lane-pad the vocab dimension
    PL = ((L + 7) // 8) * 8                   # sublane-pad the sequence length

    # --- lane-pad vocab-sized tensors (padded logits forced to ~ -inf) ------
    def pad_rows(a, n):
        return jnp.zeros((n, a.shape[1]), a.dtype).at[:a.shape[0]].set(a)

    enc_emb = pad_rows(params["enc_emb"], VP)
    dec_emb = pad_rows(params["dec_emb"], VP)
    w_out = jnp.zeros((H, VP), jnp.float32).at[:, :V].set(params["w_out"])
    b_out = jnp.full((1, VP), -1e30, jnp.float32).at[:, :V].set(params["b_out"])

    # --- token columns (encoder inputs; teacher-forced decoder inputs) ------
    tokens_i32 = tokens.astype(jnp.int32)
    tok_col = jnp.zeros((PL, 1), jnp.int32).at[:L, 0].set(tokens_i32)
    dec_in = jnp.concatenate(
        [jnp.full((1,), SOS_token, jnp.int32), tokens_i32[:L - 1]])
    dec_in_col = jnp.zeros((PL, 1), jnp.int32).at[:L, 0].set(dec_in)

    vmem = pl.BlockSpec(memory_space=pltpu.MemorySpace.VMEM)
    kernel = functools.partial(cvae_forward_kernel, use_teacher_forcing)

    pred, dist_p, mean, logvar = pl.pallas_call(
        kernel,
        out_shape=(
            jax.ShapeDtypeStruct((L, 1), jnp.int32),       # predict_output
            jax.ShapeDtypeStruct((L, VP), jnp.float32),    # predict_distribution
            jax.ShapeDtypeStruct((1, Z), jnp.float32),     # mean
            jax.ShapeDtypeStruct((1, Z), jnp.float32),     # logvar
        ),
        in_specs=[vmem] * 21,
        out_specs=(vmem, vmem, vmem, vmem),
        scratch_shapes=[
            pltpu.VMEM((PL, 4 * H), jnp.float32),   # encoder input-side gates
            pltpu.VMEM((PL, 4 * H), jnp.float32),   # decoder input-side gates (TF)
            pltpu.VMEM((PL, H), jnp.float32),       # decoder hidden rows
        ],
    )(tok_col, dec_in_col, enc_h0, enc_c0, condition, eps,
      enc_emb, params["enc_w_ih"], params["enc_w_hh"], params["enc_b"],
      params["w_ml"], params["b_ml"],
      params["w_lc_lat"], params["w_lc_cond"], params["b_lc"],
      dec_emb, params["dec_w_ih"], params["dec_w_hh"], params["dec_b"],
      w_out, b_out)

    # Match PyTorch output shapes: predict_output (L,1), distribution (L,V),
    # mean / logvar (1,1,Z) (computed from the (1,1,H) LSTM hidden state).
    dist = dist_p[:, :V]
    return pred, dist, mean.reshape(1, 1, Z), logvar.reshape(1, 1, Z)


def init_params(key, V, H, Z, C):
    scale = 0.1
    ks = jax.random.split(key, 18)

    def nrm(k, shape):
        return scale * jax.random.normal(k, shape, jnp.float32)

    return {
        # encoder: nn.Embedding(V, H); LSTM weights split (W_ih^T, W_hh^T)
        "enc_emb":  nrm(ks[0], (V, H)),
        "enc_w_ih": nrm(ks[1], (H, 4 * H)),
        "enc_w_hh": nrm(ks[2], (H, 4 * H)),
        "enc_b":    nrm(ks[3], (1, 4 * H)),      # b_ih + b_hh fused
        # middle: hidden2mean / hidden2logvar fused -> (H, 2Z)
        "w_ml":     nrm(ks[4], (H, 2 * Z)),
        "b_ml":     nrm(ks[5], (1, 2 * Z)),
        "w_lc_lat":  nrm(ks[6], (Z, H)),         # latentcondition2hidden (latent)
        "w_lc_cond": nrm(ks[7], (C, H)),         # latentcondition2hidden (cond)
        "b_lc":      nrm(ks[8], (1, H)),
        # decoder
        "dec_emb":  nrm(ks[9], (V, H)),
        "dec_w_ih": nrm(ks[10], (H, 4 * H)),
        "dec_w_hh": nrm(ks[11], (H, 4 * H)),
        "dec_b":    nrm(ks[12], (1, 4 * H)),
        "w_out":    nrm(ks[13], (H, V)),         # hidden2input
        "b_out":    nrm(ks[14], (1, V)),
        # conditional embedding (nn.Embedding(4, C)); lookup is plain-JAX glue
        "tense_emb": nrm(ks[15], (4, C)),
    }


if __name__ == "__main__":
    # Small shapes: vocab=32 (lane-padded to 128 internally), hidden=128,
    # latent=16, cond=8, seq=6.
    V, H, Z, C, L = 32, 128, 16, 8, 6
    key = jax.random.PRNGKey(0)
    k_param, k_tok, k_eps = jax.random.split(key, 3)

    params = init_params(k_param, V, H, Z, C)
    tokens = jax.random.randint(k_tok, (L,), 2, V, dtype=jnp.int32)
    enc_h0 = jnp.zeros((1, H), jnp.float32)      # encoder.init_h0
    enc_c0 = jnp.zeros((1, H), jnp.float32)      # encoder.init_c0
    tense = 1
    condition = params["tense_emb"][tense].reshape(1, C)   # tense_embedding glue
    eps = jax.random.normal(k_eps, (1, Z), jnp.float32)    # reparameterization noise

    outs_tf = cvae_forward(tokens, enc_h0, enc_c0, condition, eps, params,
                           use_teacher_forcing=True)
    jax.block_until_ready(outs_tf)

    outs_greedy = cvae_forward(tokens, enc_h0, enc_c0, condition, eps, params,
                               use_teacher_forcing=False)
    jax.block_until_ready(outs_greedy)

    print("KERNEL_OK")
</pallas_src>

<mosaic_0001>
module attributes {stable_mosaic.version = 11 : i64} {
  func.func @cvae_forward_kernel(%arg0: memref<8x1xi32, #tpu.memory_space<vmem>>, %arg1: memref<8x1xi32, #tpu.memory_space<vmem>>, %arg2: memref<1x128xf32, #tpu.memory_space<vmem>>, %arg3: memref<1x128xf32, #tpu.memory_space<vmem>>, %arg4: memref<1x8xf32, #tpu.memory_space<vmem>>, %arg5: memref<1x16xf32, #tpu.memory_space<vmem>>, %arg6: memref<128x128xf32, #tpu.memory_space<vmem>>, %arg7: memref<128x512xf32, #tpu.memory_space<vmem>>, %arg8: memref<128x512xf32, #tpu.memory_space<vmem>>, %arg9: memref<1x512xf32, #tpu.memory_space<vmem>>, %arg10: memref<128x32xf32, #tpu.memory_space<vmem>>, %arg11: memref<1x32xf32, #tpu.memory_space<vmem>>, %arg12: memref<16x128xf32, #tpu.memory_space<vmem>>, %arg13: memref<8x128xf32, #tpu.memory_space<vmem>>, %arg14: memref<1x128xf32, #tpu.memory_space<vmem>>, %arg15: memref<128x128xf32, #tpu.memory_space<vmem>>, %arg16: memref<128x512xf32, #tpu.memory_space<vmem>>, %arg17: memref<128x512xf32, #tpu.memory_space<vmem>>, %arg18: memref<1x512xf32, #tpu.memory_space<vmem>>, %arg19: memref<128x128xf32, #tpu.memory_space<vmem>>, %arg20: memref<1x128xf32, #tpu.memory_space<vmem>>, %arg21: memref<6x1xi32, #tpu.memory_space<vmem>>, %arg22: memref<6x128xf32, #tpu.memory_space<vmem>>, %arg23: memref<1x16xf32, #tpu.memory_space<vmem>>, %arg24: memref<1x16xf32, #tpu.memory_space<vmem>>, %arg25: memref<8x512xf32, #tpu.memory_space<vmem>>, %arg26: memref<8x512xf32, #tpu.memory_space<vmem>>, %arg27: memref<8x128xf32, #tpu.memory_space<vmem>>) attributes {dimension_semantics = [], scalar_prefetch = 0 : i64, scratch_operands = 3 : i64, tpu.core_type = #tpu.core_type<tc>} {
    %0 = tpu.iota {dimensions = array<i32: 1>} : vector<8x128xi32>
    %c0 = arith.constant 0 : index
    %c0_0 = arith.constant 0 : index
    %1 = vector.load %arg0[%c0, %c0_0] : memref<8x1xi32, #tpu.memory_space<vmem>>, vector<8x1xi32>
    %2 = vector.broadcast %1 : vector<8x1xi32> to vector<8x128xi32>
    %3 = arith.cmpi eq, %0, %2 : vector<8x128xi32>
    %4 = arith.extui %3 : vector<8x128xi1> to vector<8x128xi32>
    %5 = arith.sitofp %4 : vector<8x128xi32> to vector<8x128xf32>
    %c0_1 = arith.constant 0 : index
    %c0_2 = arith.constant 0 : index
    %6 = vector.load %arg6[%c0_1, %c0_2] : memref<128x128xf32, #tpu.memory_space<vmem>>, vector<128x128xf32>
    %cst = arith.constant dense<0.000000e+00> : vector<8x128xf32>
    %7 = tpu.matmul %5, %6, %cst {dimension_numbers = #tpu.dot_dimension_numbers<[1], [0], [0], [1], [0, 0, 1, 1], [], []>} : vector<8x128xf32>, vector<128x128xf32>, vector<8x128xf32> -> vector<8x128xf32>
    %c0_3 = arith.constant 0 : index
    %c0_4 = arith.constant 0 : index
    %8 = vector.load %arg7[%c0_3, %c0_4] : memref<128x512xf32, #tpu.memory_space<vmem>>, vector<128x512xf32>
    %cst_5 = arith.constant dense<0.000000e+00> : vector<8x512xf32>
    %9 = tpu.matmul %7, %8, %cst_5 {dimension_numbers = #tpu.dot_dimension_numbers<[1], [0], [0], [1], [0, 0, 1, 1], [], []>} : vector<8x128xf32>, vector<128x512xf32>, vector<8x512xf32> -> vector<8x512xf32>
    %c0_6 = arith.constant 0 : index
    %c0_7 = arith.constant 0 : index
    %10 = vector.load %arg9[%c0_6, %c0_7] : memref<1x512xf32, #tpu.memory_space<vmem>>, vector<1x512xf32>
    %11 = vector.broadcast %10 : vector<1x512xf32> to vector<8x512xf32>
    %12 = arith.addf %9, %11 : vector<8x512xf32>
    %c0_8 = arith.constant 0 : index
    %c0_9 = arith.constant 0 : index
    %13 = vector.load %arg25[%c0_8, %c0_9] : memref<8x512xf32, #tpu.memory_space<vmem>>, vector<8x512xf32>
    tpu.vector_store %arg25[%c0_8, %c0_9], %12 {strides = array<i32>} : memref<8x512xf32, #tpu.memory_space<vmem>>, vector<8x512xf32>,
    %c0_10 = arith.constant 0 : index
    %c0_11 = arith.constant 0 : index
    %14 = vector.load %arg2[%c0_10, %c0_11] : memref<1x128xf32, #tpu.memory_space<vmem>>, vector<1x128xf32>
    %c0_12 = arith.constant 0 : index
    %c0_13 = arith.constant 0 : index
    %15 = vector.load %arg3[%c0_12, %c0_13] : memref<1x128xf32, #tpu.memory_space<vmem>>, vector<1x128xf32>
    %c0_14 = arith.constant 0 : index
    %c0_15 = arith.constant 0 : index
    %16 = vector.load %arg25[%c0_14, %c0_15] : memref<8x512xf32, #tpu.memory_space<vmem>>, vector<1x512xf32>
    %c0_16 = arith.constant 0 : index
    %c0_17 = arith.constant 0 : index
    %17 = vector.load %arg8[%c0_16, %c0_17] : memref<128x512xf32, #tpu.memory_space<vmem>>, vector<128x512xf32>
    %cst_18 = arith.constant dense<0.000000e+00> : vector<1x512xf32>
    %18 = tpu.matmul %14, %17, %cst_18 {dimension_numbers = #tpu.dot_dimension_numbers<[1], [0], [0], [1], [0, 0, 1, 1], [], []>} : vector<1x128xf32>, vector<128x512xf32>, vector<1x512xf32> -> vector<1x512xf32>
    %19 = arith.addf %16, %18 : vector<1x512xf32>
    %20 = vector.extract_strided_slice %19 {offsets = [0, 0], sizes = [1, 128], strides = [1, 1]} : vector<1x512xf32> to vector<1x128xf32>
    %21 = arith.negf %20 : vector<1x128xf32>
    %22 = math.exp %21 : vector<1x128xf32>
    %cst_19 = arith.constant 1.000000e+00 : f32
    %23 = vector.broadcast %cst_19 : f32 to vector<1x128xf32>
    %24 = arith.addf %23, %22 : vector<1x128xf32>
    %25 = arith.divf %23, %24 : vector<1x128xf32>
    %26 = vector.extract_strided_slice %19 {offsets = [0, 128], sizes = [1, 128], strides = [1, 1]} : vector<1x512xf32> to vector<1x128xf32>
    %27 = arith.negf %26 : vector<1x128xf32>
    %28 = math.exp %27 : vector<1x128xf32>
    %cst_20 = arith.constant 1.000000e+00 : f32
    %29 = vector.broadcast %cst_20 : f32 to vector<1x128xf32>
    %30 = arith.addf %29, %28 : vector<1x128xf32>
    %31 = arith.divf %29, %30 : vector<1x128xf32>
    %32 = vector.extract_strided_slice %19 {offsets = [0, 256], sizes = [1, 128], strides = [1, 1]} : vector<1x512xf32> to vector<1x128xf32>
    %33 = math.tanh %32 : vector<1x128xf32>
    %34 = vector.extract_strided_slice %19 {offsets = [0, 384], sizes = [1, 128], strides = [1, 1]} : vector<1x512xf32> to vector<1x128xf32>
    %35 = arith.negf %34 : vector<1x128xf32>
    %36 = math.exp %35 : vector<1x128xf32>
    %cst_21 = arith.constant 1.000000e+00 : f32
    %37 = vector.broadcast %cst_21 : f32 to vector<1x128xf32>
    %38 = arith.addf %37, %36 : vector<1x128xf32>
    %39 = arith.divf %37, %38 : vector<1x128xf32>
    %40 = arith.mulf %31, %15 : vector<1x128xf32>
    %41 = arith.mulf %25, %33 : vector<1x128xf32>
    %42 = arith.addf %40, %41 : vector<1x128xf32>
    %43 = math.tanh %42 : vector<1x128xf32>
    %44 = arith.mulf %39, %43 : vector<1x128xf32>
    %c1 = arith.constant 1 : index
    %c0_22 = arith.constant 0 : index
    %45 = vector.load %arg25[%c1, %c0_22] : memref<8x512xf32, #tpu.memory_space<vmem>>, vector<1x512xf32>
    %c0_23 = arith.constant 0 : index
    %c0_24 = arith.constant 0 : index
    %46 = vector.load %arg8[%c0_23, %c0_24] : memref<128x512xf32, #tpu.memory_space<vmem>>, vector<128x512xf32>
    %cst_25 = arith.constant dense<0.000000e+00> : vector<1x512xf32>
    %47 = tpu.matmul %44, %46, %cst_25 {dimension_numbers = #tpu.dot_dimension_numbers<[1], [0], [0], [1], [0, 0, 1, 1], [], []>} : vector<1x128xf32>, vector<128x512xf32>, vector<1x512xf32> -> vector<1x512xf32>
    %48 = arith.addf %45, %47 : vector<1x512xf32>
    %49 = vector.extract_strided_slice %48 {offsets = [0, 0], sizes = [1, 128], strides = [1, 1]} : vector<1x512xf32> to vector<1x128xf32>
    %50 = arith.negf %49 : vector<1x128xf32>
    %51 = math.exp %50 : vector<1x128xf32>
    %cst_26 = arith.constant 1.000000e+00 : f32
    %52 = vector.broadcast %cst_26 : f32 to vector<1x128xf32>
    %53 = arith.addf %52, %51 : vector<1x128xf32>
    %54 = arith.divf %52, %53 : vector<1x128xf32>
    %55 = vector.extract_strided_slice %48 {offsets = [0, 128], sizes = [1, 128], strides = [1, 1]} : vector<1x512xf32> to vector<1x128xf32>
    %56 = arith.negf %55 : vector<1x128xf32>
    %57 = math.exp %56 : vector<1x128xf32>
    %cst_27 = arith.constant 1.000000e+00 : f32
    %58 = vector.broadcast %cst_27 : f32 to vector<1x128xf32>
    %59 = arith.addf %58, %57 : vector<1x128xf32>
    %60 = arith.divf %58, %59 : vector<1x128xf32>
    %61 = vector.extract_strided_slice %48 {offsets = [0, 256], sizes = [1, 128], strides = [1, 1]} : vector<1x512xf32> to vector<1x128xf32>
    %62 = math.tanh %61 : vector<1x128xf32>
    %63 = vector.extract_strided_slice %48 {offsets = [0, 384], sizes = [1, 128], strides = [1, 1]} : vector<1x512xf32> to vector<1x128xf32>
    %64 = arith.negf %63 : vector<1x128xf32>
    %65 = math.exp %64 : vector<1x128xf32>
    %cst_28 = arith.constant 1.000000e+00 : f32
    %66 = vector.broadcast %cst_28 : f32 to vector<1x128xf32>
    %67 = arith.addf %66, %65 : vector<1x128xf32>
    %68 = arith.divf %66, %67 : vector<1x128xf32>
    %69 = arith.mulf %60, %42 : vector<1x128xf32>
    %70 = arith.mulf %54, %62 : vector<1x128xf32>
    %71 = arith.addf %69, %70 : vector<1x128xf32>
    %72 = math.tanh %71 : vector<1x128xf32>
    %73 = arith.mulf %68, %72 : vector<1x128xf32>
    %c2 = arith.constant 2 : index
    %c0_29 = arith.constant 0 : index
    %74 = vector.load %arg25[%c2, %c0_29] : memref<8x512xf32, #tpu.memory_space<vmem>>, vector<1x512xf32>
    %c0_30 = arith.constant 0 : index
    %c0_31 = arith.constant 0 : index
    %75 = vector.load %arg8[%c0_30, %c0_31] : memref<128x512xf32, #tpu.memory_space<vmem>>, vector<128x512xf32>
    %cst_32 = arith.constant dense<0.000000e+00> : vector<1x512xf32>
    %76 = tpu.matmul %73, %75, %cst_32 {dimension_numbers = #tpu.dot_dimension_numbers<[1], [0], [0], [1], [0, 0, 1, 1], [], []>} : vector<1x128xf32>, vector<128x512xf32>, vector<1x512xf32> -> vector<1x512xf32>
    %77 = arith.addf %74, %76 : vector<1x512xf32>
    %78 = vector.extract_strided_slice %77 {offsets = [0, 0], sizes = [1, 128], strides = [1, 1]} : vector<1x512xf32> to vector<1x128xf32>
    %79 = arith.negf %78 : vector<1x128xf32>
    %80 = math.exp %79 : vector<1x128xf32>
    %cst_33 = arith.constant 1.000000e+00 : f32
    %81 = vector.broadcast %cst_33 : f32 to vector<1x128xf32>
    %82 = arith.addf %81, %80 : vector<1x128xf32>
    %83 = arith.divf %81, %82 : vector<1x128xf32>
    %84 = vector.extract_strided_slice %77 {offsets = [0, 128], sizes = [1, 128], strides = [1, 1]} : vector<1x512xf32> to vector<1x128xf32>
    %85 = arith.negf %84 : vector<1x128xf32>
    %86 = math.exp %85 : vector<1x128xf32>
    %cst_34 = arith.constant 1.000000e+00 : f32
    %87 = vector.broadcast %cst_34 : f32 to vector<1x128xf32>
    %88 = arith.addf %87, %86 : vector<1x128xf32>
    %89 = arith.divf %87, %88 : vector<1x128xf32>
    %90 = vector.extract_strided_slice %77 {offsets = [0, 256], sizes = [1, 128], strides = [1, 1]} : vector<1x512xf32> to vector<1x128xf32>
    %91 = math.tanh %90 : vector<1x128xf32>
    %92 = vector.extract_strided_slice %77 {offsets = [0, 384], sizes = [1, 128], strides = [1, 1]} : vector<1x512xf32> to vector<1x128xf32>
    %93 = arith.negf %92 : vector<1x128xf32>
    %94 = math.exp %93 : vector<1x128xf32>
    %cst_35 = arith.constant 1.000000e+00 : f32
    %95 = vector.broadcast %cst_35 : f32 to vector<1x128xf32>
    %96 = arith.addf %95, %94 : vector<1x128xf32>
    %97 = arith.divf %95, %96 : vector<1x128xf32>
    %98 = arith.mulf %89, %71 : vector<1x128xf32>
    %99 = arith.mulf %83, %91 : vector<1x128xf32>
    %100 = arith.addf %98, %99 : vector<1x128xf32>
    %101 = math.tanh %100 : vector<1x128xf32>
    %102 = arith.mulf %97, %101 : vector<1x128xf32>
    %c3 = arith.constant 3 : index
    %c0_36 = arith.constant 0 : index
    %103 = vector.load %arg25[%c3, %c0_36] : memref<8x512xf32, #tpu.memory_space<vmem>>, vector<1x512xf32>
    %c0_37 = arith.constant 0 : index
    %c0_38 = arith.constant 0 : index
    %104 = vector.load %arg8[%c0_37, %c0_38] : memref<128x512xf32, #tpu.memory_space<vmem>>, vector<128x512xf32>
    %cst_39 = arith.constant dense<0.000000e+00> : vector<1x512xf32>
    %105 = tpu.matmul %102, %104, %cst_39 {dimension_numbers = #tpu.dot_dimension_numbers<[1], [0], [0], [1], [0, 0, 1, 1], [], []>} : vector<1x128xf32>, vector<128x512xf32>, vector<1x512xf32> -> vector<1x512xf32>
    %106 = arith.addf %103, %105 : vector<1x512xf32>
    %107 = vector.extract_strided_slice %106 {offsets = [0, 0], sizes = [1, 128], strides = [1, 1]} : vector<1x512xf32> to vector<1x128xf32>
    %108 = arith.negf %107 : vector<1x128xf32>
    %109 = math.exp %108 : vector<1x128xf32>
    %cst_40 = arith.constant 1.000000e+00 : f32
    %110 = vector.broadcast %cst_40 : f32 to vector<1x128xf32>
    %111 = arith.addf %110, %109 : vector<1x128xf32>
    %112 = arith.divf %110, %111 : vector<1x128xf32>
    %113 = vector.extract_strided_slice %106 {offsets = [0, 128], sizes = [1, 128], strides = [1, 1]} : vector<1x512xf32> to vector<1x128xf32>
    %114 = arith.negf %113 : vector<1x128xf32>
    %115 = math.exp %114 : vector<1x128xf32>
    %cst_41 = arith.constant 1.000000e+00 : f32
    %116 = vector.broadcast %cst_41 : f32 to vector<1x128xf32>
    %117 = arith.addf %116, %115 : vector<1x128xf32>
    %118 = arith.divf %116, %117 : vector<1x128xf32>
    %119 = vector.extract_strided_slice %106 {offsets = [0, 256], sizes = [1, 128], strides = [1, 1]} : vector<1x512xf32> to vector<1x128xf32>
    %120 = math.tanh %119 : vector<1x128xf32>
    %121 = vector.extract_strided_slice %106 {offsets = [0, 384], sizes = [1, 128], strides = [1, 1]} : vector<1x512xf32> to vector<1x128xf32>
    %122 = arith.negf %121 : vector<1x128xf32>
    %123 = math.exp %122 : vector<1x128xf32>
    %cst_42 = arith.constant 1.000000e+00 : f32
    %124 = vector.broadcast %cst_42 : f32 to vector<1x128xf32>
    %125 = arith.addf %124, %123 : vector<1x128xf32>
    %126 = arith.divf %124, %125 : vector<1x128xf32>
    %127 = arith.mulf %118, %100 : vector<1x128xf32>
    %128 = arith.mulf %112, %120 : vector<1x128xf32>
    %129 = arith.addf %127, %128 : vector<1x128xf32>
    %130 = math.tanh %129 : vector<1x128xf32>
    %131 = arith.mulf %126, %130 : vector<1x128xf32>
    %c4 = arith.constant 4 : index
    %c0_43 = arith.constant 0 : index
    %132 = vector.load %arg25[%c4, %c0_43] : memref<8x512xf32, #tpu.memory_space<vmem>>, vector<1x512xf32>
    %c0_44 = arith.constant 0 : index
    %c0_45 = arith.constant 0 : index
    %133 = vector.load %arg8[%c0_44, %c0_45] : memref<128x512xf32, #tpu.memory_space<vmem>>, vector<128x512xf32>
    %cst_46 = arith.constant dense<0.000000e+00> : vector<1x512xf32>
    %134 = tpu.matmul %131, %133, %cst_46 {dimension_numbers = #tpu.dot_dimension_numbers<[1], [0], [0], [1], [0, 0, 1, 1], [], []>} : vector<1x128xf32>, vector<128x512xf32>, vector<1x512xf32> -> vector<1x512xf32>
    %135 = arith.addf %132, %134 : vector<1x512xf32>
    %136 = vector.extract_strided_slice %135 {offsets = [0, 0], sizes = [1, 128], strides = [1, 1]} : vector<1x512xf32> to vector<1x128xf32>
    %137 = arith.negf %136 : vector<1x128xf32>
    %138 = math.exp %137 : vector<1x128xf32>
    %cst_47 = arith.constant 1.000000e+00 : f32
    %139 = vector.broadcast %cst_47 : f32 to vector<1x128xf32>
    %140 = arith.addf %139, %138 : vector<1x128xf32>
    %141 = arith.divf %139, %140 : vector<1x128xf32>
    %142 = vector.extract_strided_slice %135 {offsets = [0, 128], sizes = [1, 128], strides = [1, 1]} : vector<1x512xf32> to vector<1x128xf32>
    %143 = arith.negf %142 : vector<1x128xf32>
    %144 = math.exp %143 : vector<1x128xf32>
    %cst_48 = arith.constant 1.000000e+00 : f32
    %145 = vector.broadcast %cst_48 : f32 to vector<1x128xf32>
    %146 = arith.addf %145, %144 : vector<1x128xf32>
    %147 = arith.divf %145, %146 : vector<1x128xf32>
    %148 = vector.extract_strided_slice %135 {offsets = [0, 256], sizes = [1, 128], strides = [1, 1]} : vector<1x512xf32> to vector<1x128xf32>
    %149 = math.tanh %148 : vector<1x128xf32>
    %150 = vector.extract_strided_slice %135 {offsets = [0, 384], sizes = [1, 128], strides = [1, 1]} : vector<1x512xf32> to vector<1x128xf32>
    %151 = arith.negf %150 : vector<1x128xf32>
    %152 = math.exp %151 : vector<1x128xf32>
    %cst_49 = arith.constant 1.000000e+00 : f32
    %153 = vector.broadcast %cst_49 : f32 to vector<1x128xf32>
    %154 = arith.addf %153, %152 : vector<1x128xf32>
    %155 = arith.divf %153, %154 : vector<1x128xf32>
    %156 = arith.mulf %147, %129 : vector<1x128xf32>
    %157 = arith.mulf %141, %149 : vector<1x128xf32>
    %158 = arith.addf %156, %157 : vector<1x128xf32>
    %159 = math.tanh %158 : vector<1x128xf32>
    %160 = arith.mulf %155, %159 : vector<1x128xf32>
    %c5 = arith.constant 5 : index
    %c0_50 = arith.constant 0 : index
    %161 = vector.load %arg25[%c5, %c0_50] : memref<8x512xf32, #tpu.memory_space<vmem>>, vector<1x512xf32>
    %c0_51 = arith.constant 0 : index
    %c0_52 = arith.constant 0 : index
    %162 = vector.load %arg8[%c0_51, %c0_52] : memref<128x512xf32, #tpu.memory_space<vmem>>, vector<128x512xf32>
    %cst_53 = arith.constant dense<0.000000e+00> : vector<1x512xf32>
    %163 = tpu.matmul %160, %162, %cst_53 {dimension_numbers = #tpu.dot_dimension_numbers<[1], [0], [0], [1], [0, 0, 1, 1], [], []>} : vector<1x128xf32>, vector<128x512xf32>, vector<1x512xf32> -> vector<1x512xf32>
    %164 = arith.addf %161, %163 : vector<1x512xf32>
    %165 = vector.extract_strided_slice %164 {offsets = [0, 0], sizes = [1, 128], strides = [1, 1]} : vector<1x512xf32> to vector<1x128xf32>
    %166 = arith.negf %165 : vector<1x128xf32>
    %167 = math.exp %166 : vector<1x128xf32>
    %cst_54 = arith.constant 1.000000e+00 : f32
    %168 = vector.broadcast %cst_54 : f32 to vector<1x128xf32>
    %169 = arith.addf %168, %167 : vector<1x128xf32>
    %170 = arith.divf %168, %169 : vector<1x128xf32>
    %171 = vector.extract_strided_slice %164 {offsets = [0, 128], sizes = [1, 128], strides = [1, 1]} : vector<1x512xf32> to vector<1x128xf32>
    %172 = arith.negf %171 : vector<1x128xf32>
    %173 = math.exp %172 : vector<1x128xf32>
    %cst_55 = arith.constant 1.000000e+00 : f32
    %174 = vector.broadcast %cst_55 : f32 to vector<1x128xf32>
    %175 = arith.addf %174, %173 : vector<1x128xf32>
    %176 = arith.divf %174, %175 : vector<1x128xf32>
    %177 = vector.extract_strided_slice %164 {offsets = [0, 256], sizes = [1, 128], strides = [1, 1]} : vector<1x512xf32> to vector<1x128xf32>
    %178 = math.tanh %177 : vector<1x128xf32>
    %179 = vector.extract_strided_slice %164 {offsets = [0, 384], sizes = [1, 128], strides = [1, 1]} : vector<1x512xf32> to vector<1x128xf32>
    %180 = arith.negf %179 : vector<1x128xf32>
    %181 = math.exp %180 : vector<1x128xf32>
    %cst_56 = arith.constant 1.000000e+00 : f32
    %182 = vector.broadcast %cst_56 : f32 to vector<1x128xf32>
    %183 = arith.addf %182, %181 : vector<1x128xf32>
    %184 = arith.divf %182, %183 : vector<1x128xf32>
    %185 = arith.mulf %176, %158 : vector<1x128xf32>
    %186 = arith.mulf %170, %178 : vector<1x128xf32>
    %187 = arith.addf %185, %186 : vector<1x128xf32>
    %188 = math.tanh %187 : vector<1x128xf32>
    %189 = arith.mulf %184, %188 : vector<1x128xf32>
    %c0_57 = arith.constant 0 : index
    %c0_58 = arith.constant 0 : index
    %190 = vector.load %arg10[%c0_57, %c0_58] : memref<128x32xf32, #tpu.memory_space<vmem>>, vector<128x32xf32>
    %cst_59 = arith.constant dense<0.000000e+00> : vector<1x32xf32>
    %191 = tpu.matmul %189, %190, %cst_59 {dimension_numbers = #tpu.dot_dimension_numbers<[1], [0], [0], [1], [0, 0, 1, 1], [], []>} : vector<1x128xf32>, vector<128x32xf32>, vector<1x32xf32> -> vector<1x32xf32>
    %c0_60 = arith.constant 0 : index
    %c0_61 = arith.constant 0 : index
    %192 = vector.load %arg11[%c0_60, %c0_61] : memref<1x32xf32, #tpu.memory_space<vmem>>, vector<1x32xf32>
    %193 = arith.addf %191, %192 : vector<1x32xf32>
    %194 = vector.extract_strided_slice %193 {offsets = [0, 0], sizes = [1, 16], strides = [1, 1]} : vector<1x32xf32> to vector<1x16xf32>
    %195 = vector.extract_strided_slice %193 {offsets = [0, 16], sizes = [1, 16], strides = [1, 1]} : vector<1x32xf32> to vector<1x16xf32>
    %c0_62 = arith.constant 0 : index
    %c0_63 = arith.constant 0 : index
    %196 = vector.load %arg23[%c0_62, %c0_63] : memref<1x16xf32, #tpu.memory_space<vmem>>, vector<1x16xf32>
    tpu.vector_store %arg23[%c0_62, %c0_63], %194 {strides = array<i32>} : memref<1x16xf32, #tpu.memory_space<vmem>>, vector<1x16xf32>,
    %c0_64 = arith.constant 0 : index
    %c0_65 = arith.constant 0 : index
    %197 = vector.load %arg24[%c0_64, %c0_65] : memref<1x16xf32, #tpu.memory_space<vmem>>, vector<1x16xf32>
    tpu.vector_store %arg24[%c0_64, %c0_65], %195 {strides = array<i32>} : memref<1x16xf32, #tpu.memory_space<vmem>>, vector<1x16xf32>,
    %cst_66 = arith.constant 5.000000e-01 : f32
    %198 = vector.broadcast %cst_66 : f32 to vector<1x16xf32>
    %199 = arith.mulf %198, %195 : vector<1x16xf32>
    %200 = math.exp %199 : vector<1x16xf32>
    %c0_67 = arith.constant 0 : index
    %c0_68 = arith.constant 0 : index
    %201 = vector.load %arg5[%c0_67, %c0_68] : memref<1x16xf32, #tpu.memory_space<vmem>>, vector<1x16xf32>
    %202 = arith.mulf %201, %200 : vector<1x16xf32>
    %203 = arith.addf %194, %202 : vector<1x16xf32>
    %c0_69 = arith.constant 0 : index
    %c0_70 = arith.constant 0 : index
    %204 = vector.load %arg12[%c0_69, %c0_70] : memref<16x128xf32, #tpu.memory_space<vmem>>, vector<16x128xf32>
    %cst_71 = arith.constant dense<0.000000e+00> : vector<1x128xf32>
    %205 = tpu.matmul %203, %204, %cst_71 {dimension_numbers = #tpu.dot_dimension_numbers<[1], [0], [0], [1], [0, 0, 1, 1], [], []>} : vector<1x16xf32>, vector<16x128xf32>, vector<1x128xf32> -> vector<1x128xf32>
    %c0_72 = arith.constant 0 : index
    %c0_73 = arith.constant 0 : index
    %206 = vector.load %arg4[%c0_72, %c0_73] : memref<1x8xf32, #tpu.memory_space<vmem>>, vector<1x8xf32>
    %c0_74 = arith.constant 0 : index
    %c0_75 = arith.constant 0 : index
    %207 = vector.load %arg13[%c0_74, %c0_75] : memref<8x128xf32, #tpu.memory_space<vmem>>, vector<8x128xf32>
    %cst_76 = arith.constant dense<0.000000e+00> : vector<1x128xf32>
    %208 = tpu.matmul %206, %207, %cst_76 {dimension_numbers = #tpu.dot_dimension_numbers<[1], [0], [0], [1], [0, 0, 1, 1], [], []>} : vector<1x8xf32>, vector<8x128xf32>, vector<1x128xf32> -> vector<1x128xf32>
    %209 = arith.addf %205, %208 : vector<1x128xf32>
    %c0_77 = arith.constant 0 : index
    %c0_78 = arith.constant 0 : index
    %210 = vector.load %arg14[%c0_77, %c0_78] : memref<1x128xf32, #tpu.memory_space<vmem>>, vector<1x128xf32>
    %211 = arith.addf %209, %210 : vector<1x128xf32>
    %cst_79 = arith.constant 0.000000e+00 : f32
    %212 = vector.broadcast %cst_79 : f32 to vector<1x128xf32>
    %cst_80 = arith.constant 0.000000e+00 : f32
    %213 = vector.broadcast %cst_80 : f32 to vector<8x128xf32>
    %c0_81 = arith.constant 0 : index
    %c0_82 = arith.constant 0 : index
    %214 = vector.load %arg27[%c0_81, %c0_82] : memref<8x128xf32, #tpu.memory_space<vmem>>, vector<8x128xf32>
    tpu.vector_store %arg27[%c0_81, %c0_82], %213 {strides = array<i32>} : memref<8x128xf32, #tpu.memory_space<vmem>>, vector<8x128xf32>,
    %c0_83 = arith.constant 0 : index
    %c0_84 = arith.constant 0 : index
    %215 = vector.load %arg1[%c0_83, %c0_84] : memref<8x1xi32, #tpu.memory_space<vmem>>, vector<8x1xi32>
    %216 = vector.broadcast %215 : vector<8x1xi32> to vector<8x128xi32>
    %217 = arith.cmpi eq, %0, %216 : vector<8x128xi32>
    %218 = arith.extui %217 : vector<8x128xi1> to vector<8x128xi32>
    %219 = arith.sitofp %218 : vector<8x128xi32> to vector<8x128xf32>
    %c0_85 = arith.constant 0 : index
    %c0_86 = arith.constant 0 : index
    %220 = vector.load %arg15[%c0_85, %c0_86] : memref<128x128xf32, #tpu.memory_space<vmem>>, vector<128x128xf32>
    %cst_87 = arith.constant dense<0.000000e+00> : vector<8x128xf32>
    %221 = tpu.matmul %219, %220, %cst_87 {dimension_numbers = #tpu.dot_dimension_numbers<[1], [0], [0], [1], [0, 0, 1, 1], [], []>} : vector<8x128xf32>, vector<128x128xf32>, vector<8x128xf32> -> vector<8x128xf32>
    %cst_88 = arith.constant 0.000000e+00 : f32
    %222 = vector.broadcast %cst_88 : f32 to vector<8x128xf32>
    %223 = arith.maximumf %221, %222 : vector<8x128xf32>
    %c0_89 = arith.constant 0 : index
    %c0_90 = arith.constant 0 : index
    %224 = vector.load %arg16[%c0_89, %c0_90] : memref<128x512xf32, #tpu.memory_space<vmem>>, vector<128x512xf32>
    %cst_91 = arith.constant dense<0.000000e+00> : vector<8x512xf32>
    %225 = tpu.matmul %223, %224, %cst_91 {dimension_numbers = #tpu.dot_dimension_numbers<[1], [0], [0], [1], [0, 0, 1, 1], [], []>} : vector<8x128xf32>, vector<128x512xf32>, vector<8x512xf32> -> vector<8x512xf32>
    %c0_92 = arith.constant 0 : index
    %c0_93 = arith.constant 0 : index
    %226 = vector.load %arg18[%c0_92, %c0_93] : memref<1x512xf32, #tpu.memory_space<vmem>>, vector<1x512xf32>
    %227 = vector.broadcast %226 : vector<1x512xf32> to vector<8x512xf32>
    %228 = arith.addf %225, %227 : vector<8x512xf32>
    %c0_94 = arith.constant 0 : index
    %c0_95 = arith.constant 0 : index
    %229 = vector.load %arg26[%c0_94, %c0_95] : memref<8x512xf32, #tpu.memory_space<vmem>>, vector<8x512xf32>
    tpu.vector_store %arg26[%c0_94, %c0_95], %228 {strides = array<i32>} : memref<8x512xf32, #tpu.memory_space<vmem>>, vector<8x512xf32>,
    %c0_96 = arith.constant 0 : index
    %c0_97 = arith.constant 0 : index
    %230 = vector.load %arg26[%c0_96, %c0_97] : memref<8x512xf32, #tpu.memory_space<vmem>>, vector<1x512xf32>
    %c0_98 = arith.constant 0 : index
    %c0_99 = arith.constant 0 : index
    %231 = vector.load %arg17[%c0_98, %c0_99] : memref<128x512xf32, #tpu.memory_space<vmem>>, vector<128x512xf32>
    %cst_100 = arith.constant dense<0.000000e+00> : vector<1x512xf32>
    %232 = tpu.matmul %211, %231, %cst_100 {dimension_numbers = #tpu.dot_dimension_numbers<[1], [0], [0], [1], [0, 0, 1, 1], [], []>} : vector<1x128xf32>, vector<128x512xf32>, vector<1x512xf32> -> vector<1x512xf32>
    %233 = arith.addf %230, %232 : vector<1x512xf32>
    %234 = vector.extract_strided_slice %233 {offsets = [0, 0], sizes = [1, 128], strides = [1, 1]} : vector<1x512xf32> to vector<1x128xf32>
    %235 = arith.negf %234 : vector<1x128xf32>
    %236 = math.exp %235 : vector<1x128xf32>
    %cst_101 = arith.constant 1.000000e+00 : f32
    %237 = vector.broadcast %cst_101 : f32 to vector<1x128xf32>
    %238 = arith.addf %237, %236 : vector<1x128xf32>
    %239 = arith.divf %237, %238 : vector<1x128xf32>
    %240 = vector.extract_strided_slice %233 {offsets = [0, 128], sizes = [1, 128], strides = [1, 1]} : vector<1x512xf32> to vector<1x128xf32>
    %241 = arith.negf %240 : vector<1x128xf32>
    %242 = math.exp %241 : vector<1x128xf32>
    %cst_102 = arith.constant 1.000000e+00 : f32
    %243 = vector.broadcast %cst_102 : f32 to vector<1x128xf32>
    %244 = arith.addf %243, %242 : vector<1x128xf32>
    %245 = arith.divf %243, %244 : vector<1x128xf32>
    %246 = vector.extract_strided_slice %233 {offsets = [0, 256], sizes = [1, 128], strides = [1, 1]} : vector<1x512xf32> to vector<1x128xf32>
    %247 = math.tanh %246 : vector<1x128xf32>
    %248 = vector.extract_strided_slice %233 {offsets = [0, 384], sizes = [1, 128], strides = [1, 1]} : vector<1x512xf32> to vector<1x128xf32>
    %249 = arith.negf %248 : vector<1x128xf32>
    %250 = math.exp %249 : vector<1x128xf32>
    %cst_103 = arith.constant 1.000000e+00 : f32
    %251 = vector.broadcast %cst_103 : f32 to vector<1x128xf32>
    %252 = arith.addf %251, %250 : vector<1x128xf32>
    %253 = arith.divf %251, %252 : vector<1x128xf32>
    %254 = arith.mulf %245, %212 : vector<1x128xf32>
    %255 = arith.mulf %239, %247 : vector<1x128xf32>
    %256 = arith.addf %254, %255 : vector<1x128xf32>
    %257 = math.tanh %256 : vector<1x128xf32>
    %258 = arith.mulf %253, %257 : vector<1x128xf32>
    %c0_104 = arith.constant 0 : index
    %c0_105 = arith.constant 0 : index
    %259 = vector.load %arg27[%c0_104, %c0_105] : memref<8x128xf32, #tpu.memory_space<vmem>>, vector<1x128xf32>
    tpu.vector_store %arg27[%c0_104, %c0_105], %258 {strides = array<i32>} : memref<8x128xf32, #tpu.memory_space<vmem>>, vector<1x128xf32>,
    %c1_106 = arith.constant 1 : index
    %c0_107 = arith.constant 0 : index
    %260 = vector.load %arg26[%c1_106, %c0_107] : memref<8x512xf32, #tpu.memory_space<vmem>>, vector<1x512xf32>
    %c0_108 = arith.constant 0 : index
    %c0_109 = arith.constant 0 : index
    %261 = vector.load %arg17[%c0_108, %c0_109] : memref<128x512xf32, #tpu.memory_space<vmem>>, vector<128x512xf32>
    %cst_110 = arith.constant dense<0.000000e+00> : vector<1x512xf32>
    %262 = tpu.matmul %258, %261, %cst_110 {dimension_numbers = #tpu.dot_dimension_numbers<[1], [0], [0], [1], [0, 0, 1, 1], [], []>} : vector<1x128xf32>, vector<128x512xf32>, vector<1x512xf32> -> vector<1x512xf32>
    %263 = arith.addf %260, %262 : vector<1x512xf32>
    %264 = vector.extract_strided_slice %263 {offsets = [0, 0], sizes = [1, 128], strides = [1, 1]} : vector<1x512xf32> to vector<1x128xf32>
    %265 = arith.negf %264 : vector<1x128xf32>
    %266 = math.exp %265 : vector<1x128xf32>
    %cst_111 = arith.constant 1.000000e+00 : f32
    %267 = vector.broadcast %cst_111 : f32 to vector<1x128xf32>
    %268 = arith.addf %267, %266 : vector<1x128xf32>
    %269 = arith.divf %267, %268 : vector<1x128xf32>
    %270 = vector.extract_strided_slice %263 {offsets = [0, 128], sizes = [1, 128], strides = [1, 1]} : vector<1x512xf32> to vector<1x128xf32>
    %271 = arith.negf %270 : vector<1x128xf32>
    %272 = math.exp %271 : vector<1x128xf32>
    %cst_112 = arith.constant 1.000000e+00 : f32
    %273 = vector.broadcast %cst_112 : f32 to vector<1x128xf32>
    %274 = arith.addf %273, %272 : vector<1x128xf32>
    %275 = arith.divf %273, %274 : vector<1x128xf32>
    %276 = vector.extract_strided_slice %263 {offsets = [0, 256], sizes = [1, 128], strides = [1, 1]} : vector<1x512xf32> to vector<1x128xf32>
    %277 = math.tanh %276 : vector<1x128xf32>
    %278 = vector.extract_strided_slice %263 {offsets = [0, 384], sizes = [1, 128], strides = [1, 1]} : vector<1x512xf32> to vector<1x128xf32>
    %279 = arith.negf %278 : vector<1x128xf32>
    %280 = math.exp %279 : vector<1x128xf32>
    %cst_113 = arith.constant 1.000000e+00 : f32
    %281 = vector.broadcast %cst_113 : f32 to vector<1x128xf32>
    %282 = arith.addf %281, %280 : vector<1x128xf32>
    %283 = arith.divf %281, %282 : vector<1x128xf32>
    %284 = arith.mulf %275, %256 : vector<1x128xf32>
    %285 = arith.mulf %269, %277 : vector<1x128xf32>
    %286 = arith.addf %284, %285 : vector<1x128xf32>
    %287 = math.tanh %286 : vector<1x128xf32>
    %288 = arith.mulf %283, %287 : vector<1x128xf32>
    %c1_114 = arith.constant 1 : index
    %c0_115 = arith.constant 0 : index
    %289 = vector.load %arg27[%c1_114, %c0_115] : memref<8x128xf32, #tpu.memory_space<vmem>>, vector<1x128xf32>
    tpu.vector_store %arg27[%c1_114, %c0_115], %288 {strides = array<i32>} : memref<8x128xf32, #tpu.memory_space<vmem>>, vector<1x128xf32>,
    %c2_116 = arith.constant 2 : index
    %c0_117 = arith.constant 0 : index
    %290 = vector.load %arg26[%c2_116, %c0_117] : memref<8x512xf32, #tpu.memory_space<vmem>>, vector<1x512xf32>
    %c0_118 = arith.constant 0 : index
    %c0_119 = arith.constant 0 : index
    %291 = vector.load %arg17[%c0_118, %c0_119] : memref<128x512xf32, #tpu.memory_space<vmem>>, vector<128x512xf32>
    %cst_120 = arith.constant dense<0.000000e+00> : vector<1x512xf32>
    %292 = tpu.matmul %288, %291, %cst_120 {dimension_numbers = #tpu.dot_dimension_numbers<[1], [0], [0], [1], [0, 0, 1, 1], [], []>} : vector<1x128xf32>, vector<128x512xf32>, vector<1x512xf32> -> vector<1x512xf32>
    %293 = arith.addf %290, %292 : vector<1x512xf32>
    %294 = vector.extract_strided_slice %293 {offsets = [0, 0], sizes = [1, 128], strides = [1, 1]} : vector<1x512xf32> to vector<1x128xf32>
    %295 = arith.negf %294 : vector<1x128xf32>
    %296 = math.exp %295 : vector<1x128xf32>
    %cst_121 = arith.constant 1.000000e+00 : f32
    %297 = vector.broadcast %cst_121 : f32 to vector<1x128xf32>
    %298 = arith.addf %297, %296 : vector<1x128xf32>
    %299 = arith.divf %297, %298 : vector<1x128xf32>
    %300 = vector.extract_strided_slice %293 {offsets = [0, 128], sizes = [1, 128], strides = [1, 1]} : vector<1x512xf32> to vector<1x128xf32>
    %301 = arith.negf %300 : vector<1x128xf32>
    %302 = math.exp %301 : vector<1x128xf32>
    %cst_122 = arith.constant 1.000000e+00 : f32
    %303 = vector.broadcast %cst_122 : f32 to vector<1x128xf32>
    %304 = arith.addf %303, %302 : vector<1x128xf32>
    %305 = arith.divf %303, %304 : vector<1x128xf32>
    %306 = vector.extract_strided_slice %293 {offsets = [0, 256], sizes = [1, 128], strides = [1, 1]} : vector<1x512xf32> to vector<1x128xf32>
    %307 = math.tanh %306 : vector<1x128xf32>
    %308 = vector.extract_strided_slice %293 {offsets = [0, 384], sizes = [1, 128], strides = [1, 1]} : vector<1x512xf32> to vector<1x128xf32>
    %309 = arith.negf %308 : vector<1x128xf32>
    %310 = math.exp %309 : vector<1x128xf32>
    %cst_123 = arith.constant 1.000000e+00 : f32
    %311 = vector.broadcast %cst_123 : f32 to vector<1x128xf32>
    %312 = arith.addf %311, %310 : vector<1x128xf32>
    %313 = arith.divf %311, %312 : vector<1x128xf32>
    %314 = arith.mulf %305, %286 : vector<1x128xf32>
    %315 = arith.mulf %299, %307 : vector<1x128xf32>
    %316 = arith.addf %314, %315 : vector<1x128xf32>
    %317 = math.tanh %316 : vector<1x128xf32>
    %318 = arith.mulf %313, %317 : vector<1x128xf32>
    %c2_124 = arith.constant 2 : index
    %c0_125 = arith.constant 0 : index
    %319 = vector.load %arg27[%c2_124, %c0_125] : memref<8x128xf32, #tpu.memory_space<vmem>>, vector<1x128xf32>
    tpu.vector_store %arg27[%c2_124, %c0_125], %318 {strides = array<i32>} : memref<8x128xf32, #tpu.memory_space<vmem>>, vector<1x128xf32>,
    %c3_126 = arith.constant 3 : index
    %c0_127 = arith.constant 0 : index
    %320 = vector.load %arg26[%c3_126, %c0_127] : memref<8x512xf32, #tpu.memory_space<vmem>>, vector<1x512xf32>
    %c0_128 = arith.constant 0 : index
    %c0_129 = arith.constant 0 : index
    %321 = vector.load %arg17[%c0_128, %c0_129] : memref<128x512xf32, #tpu.memory_space<vmem>>, vector<128x512xf32>
    %cst_130 = arith.constant dense<0.000000e+00> : vector<1x512xf32>
    %322 = tpu.matmul %318, %321, %cst_130 {dimension_numbers = #tpu.dot_dimension_numbers<[1], [0], [0], [1], [0, 0, 1, 1], [], []>} : vector<1x128xf32>, vector<128x512xf32>, vector<1x512xf32> -> vector<1x512xf32>
    %323 = arith.addf %320, %322 : vector<1x512xf32>
    %324 = vector.extract_strided_slice %323 {offsets = [0, 0], sizes = [1, 128], strides = [1, 1]} : vector<1x512xf32> to vector<1x128xf32>
    %325 = arith.negf %324 : vector<1x128xf32>
    %326 = math.exp %325 : vector<1x128xf32>
    %cst_131 = arith.constant 1.000000e+00 : f32
    %327 = vector.broadcast %cst_131 : f32 to vector<1x128xf32>
    %328 = arith.addf %327, %326 : vector<1x128xf32>
    %329 = arith.divf %327, %328 : vector<1x128xf32>
    %330 = vector.extract_strided_slice %323 {offsets = [0, 128], sizes = [1, 128], strides = [1, 1]} : vector<1x512xf32> to vector<1x128xf32>
    %331 = arith.negf %330 : vector<1x128xf32>
    %332 = math.exp %331 : vector<1x128xf32>
    %cst_132 = arith.constant 1.000000e+00 : f32
    %333 = vector.broadcast %cst_132 : f32 to vector<1x128xf32>
    %334 = arith.addf %333, %332 : vector<1x128xf32>
    %335 = arith.divf %333, %334 : vector<1x128xf32>
    %336 = vector.extract_strided_slice %323 {offsets = [0, 256], sizes = [1, 128], strides = [1, 1]} : vector<1x512xf32> to vector<1x128xf32>
    %337 = math.tanh %336 : vector<1x128xf32>
    %338 = vector.extract_strided_slice %323 {offsets = [0, 384], sizes = [1, 128], strides = [1, 1]} : vector<1x512xf32> to vector<1x128xf32>
    %339 = arith.negf %338 : vector<1x128xf32>
    %340 = math.exp %339 : vector<1x128xf32>
    %cst_133 = arith.constant 1.000000e+00 : f32
    %341 = vector.broadcast %cst_133 : f32 to vector<1x128xf32>
    %342 = arith.addf %341, %340 : vector<1x128xf32>
    %343 = arith.divf %341, %342 : vector<1x128xf32>
    %344 = arith.mulf %335, %316 : vector<1x128xf32>
    %345 = arith.mulf %329, %337 : vector<1x128xf32>
    %346 = arith.addf %344, %345 : vector<1x128xf32>
    %347 = math.tanh %346 : vector<1x128xf32>
    %348 = arith.mulf %343, %347 : vector<1x128xf32>
    %c3_134 = arith.constant 3 : index
    %c0_135 = arith.constant 0 : index
    %349 = vector.load %arg27[%c3_134, %c0_135] : memref<8x128xf32, #tpu.memory_space<vmem>>, vector<1x128xf32>
    tpu.vector_store %arg27[%c3_134, %c0_135], %348 {strides = array<i32>} : memref<8x128xf32, #tpu.memory_space<vmem>>, vector<1x128xf32>,
    %c4_136 = arith.constant 4 : index
    %c0_137 = arith.constant 0 : index
    %350 = vector.load %arg26[%c4_136, %c0_137] : memref<8x512xf32, #tpu.memory_space<vmem>>, vector<1x512xf32>
    %c0_138 = arith.constant 0 : index
    %c0_139 = arith.constant 0 : index
    %351 = vector.load %arg17[%c0_138, %c0_139] : memref<128x512xf32, #tpu.memory_space<vmem>>, vector<128x512xf32>
    %cst_140 = arith.constant dense<0.000000e+00> : vector<1x512xf32>
    %352 = tpu.matmul %348, %351, %cst_140 {dimension_numbers = #tpu.dot_dimension_numbers<[1], [0], [0], [1], [0, 0, 1, 1], [], []>} : vector<1x128xf32>, vector<128x512xf32>, vector<1x512xf32> -> vector<1x512xf32>
    %353 = arith.addf %350, %352 : vector<1x512xf32>
    %354 = vector.extract_strided_slice %353 {offsets = [0, 0], sizes = [1, 128], strides = [1, 1]} : vector<1x512xf32> to vector<1x128xf32>
    %355 = arith.negf %354 : vector<1x128xf32>
    %356 = math.exp %355 : vector<1x128xf32>
    %cst_141 = arith.constant 1.000000e+00 : f32
    %357 = vector.broadcast %cst_141 : f32 to vector<1x128xf32>
    %358 = arith.addf %357, %356 : vector<1x128xf32>
    %359 = arith.divf %357, %358 : vector<1x128xf32>
    %360 = vector.extract_strided_slice %353 {offsets = [0, 128], sizes = [1, 128], strides = [1, 1]} : vector<1x512xf32> to vector<1x128xf32>
    %361 = arith.negf %360 : vector<1x128xf32>
    %362 = math.exp %361 : vector<1x128xf32>
    %cst_142 = arith.constant 1.000000e+00 : f32
    %363 = vector.broadcast %cst_142 : f32 to vector<1x128xf32>
    %364 = arith.addf %363, %362 : vector<1x128xf32>
    %365 = arith.divf %363, %364 : vector<1x128xf32>
    %366 = vector.extract_strided_slice %353 {offsets = [0, 256], sizes = [1, 128], strides = [1, 1]} : vector<1x512xf32> to vector<1x128xf32>
    %367 = math.tanh %366 : vector<1x128xf32>
    %368 = vector.extract_strided_slice %353 {offsets = [0, 384], sizes = [1, 128], strides = [1, 1]} : vector<1x512xf32> to vector<1x128xf32>
    %369 = arith.negf %368 : vector<1x128xf32>
    %370 = math.exp %369 : vector<1x128xf32>
    %cst_143 = arith.constant 1.000000e+00 : f32
    %371 = vector.broadcast %cst_143 : f32 to vector<1x128xf32>
    %372 = arith.addf %371, %370 : vector<1x128xf32>
    %373 = arith.divf %371, %372 : vector<1x128xf32>
    %374 = arith.mulf %365, %346 : vector<1x128xf32>
    %375 = arith.mulf %359, %367 : vector<1x128xf32>
    %376 = arith.addf %374, %375 : vector<1x128xf32>
    %377 = math.tanh %376 : vector<1x128xf32>
    %378 = arith.mulf %373, %377 : vector<1x128xf32>
    %c4_144 = arith.constant 4 : index
    %c0_145 = arith.constant 0 : index
    %379 = vector.load %arg27[%c4_144, %c0_145] : memref<8x128xf32, #tpu.memory_space<vmem>>, vector<1x128xf32>
    tpu.vector_store %arg27[%c4_144, %c0_145], %378 {strides = array<i32>} : memref<8x128xf32, #tpu.memory_space<vmem>>, vector<1x128xf32>,
    %c5_146 = arith.constant 5 : index
    %c0_147 = arith.constant 0 : index
    %380 = vector.load %arg26[%c5_146, %c0_147] : memref<8x512xf32, #tpu.memory_space<vmem>>, vector<1x512xf32>
    %c0_148 = arith.constant 0 : index
    %c0_149 = arith.constant 0 : index
    %381 = vector.load %arg17[%c0_148, %c0_149] : memref<128x512xf32, #tpu.memory_space<vmem>>, vector<128x512xf32>
    %cst_150 = arith.constant dense<0.000000e+00> : vector<1x512xf32>
    %382 = tpu.matmul %378, %381, %cst_150 {dimension_numbers = #tpu.dot_dimension_numbers<[1], [0], [0], [1], [0, 0, 1, 1], [], []>} : vector<1x128xf32>, vector<128x512xf32>, vector<1x512xf32> -> vector<1x512xf32>
    %383 = arith.addf %380, %382 : vector<1x512xf32>
    %384 = vector.extract_strided_slice %383 {offsets = [0, 0], sizes = [1, 128], strides = [1, 1]} : vector<1x512xf32> to vector<1x128xf32>
    %385 = arith.negf %384 : vector<1x128xf32>
    %386 = math.exp %385 : vector<1x128xf32>
    %cst_151 = arith.constant 1.000000e+00 : f32
    %387 = vector.broadcast %cst_151 : f32 to vector<1x128xf32>
    %388 = arith.addf %387, %386 : vector<1x128xf32>
    %389 = arith.divf %387, %388 : vector<1x128xf32>
    %390 = vector.extract_strided_slice %383 {offsets = [0, 128], sizes = [1, 128], strides = [1, 1]} : vector<1x512xf32> to vector<1x128xf32>
    %391 = arith.negf %390 : vector<1x128xf32>
    %392 = math.exp %391 : vector<1x128xf32>
    %cst_152 = arith.constant 1.000000e+00 : f32
    %393 = vector.broadcast %cst_152 : f32 to vector<1x128xf32>
    %394 = arith.addf %393, %392 : vector<1x128xf32>
    %395 = arith.divf %393, %394 : vector<1x128xf32>
    %396 = vector.extract_strided_slice %383 {offsets = [0, 256], sizes = [1, 128], strides = [1, 1]} : vector<1x512xf32> to vector<1x128xf32>
    %397 = math.tanh %396 : vector<1x128xf32>
    %398 = vector.extract_strided_slice %383 {offsets = [0, 384], sizes = [1, 128], strides = [1, 1]} : vector<1x512xf32> to vector<1x128xf32>
    %399 = arith.negf %398 : vector<1x128xf32>
    %400 = math.exp %399 : vector<1x128xf32>
    %cst_153 = arith.constant 1.000000e+00 : f32
    %401 = vector.broadcast %cst_153 : f32 to vector<1x128xf32>
    %402 = arith.addf %401, %400 : vector<1x128xf32>
    %403 = arith.divf %401, %402 : vector<1x128xf32>
    %404 = arith.mulf %395, %376 : vector<1x128xf32>
    %405 = arith.mulf %389, %397 : vector<1x128xf32>
    %406 = arith.addf %404, %405 : vector<1x128xf32>
    %407 = math.tanh %406 : vector<1x128xf32>
    %408 = arith.mulf %403, %407 : vector<1x128xf32>
    %c5_154 = arith.constant 5 : index
    %c0_155 = arith.constant 0 : index
    %409 = vector.load %arg27[%c5_154, %c0_155] : memref<8x128xf32, #tpu.memory_space<vmem>>, vector<1x128xf32>
    tpu.vector_store %arg27[%c5_154, %c0_155], %408 {strides = array<i32>} : memref<8x128xf32, #tpu.memory_space<vmem>>, vector<1x128xf32>,
    %c0_156 = arith.constant 0 : index
    %c0_157 = arith.constant 0 : index
    %410 = vector.load %arg27[%c0_156, %c0_157] : memref<8x128xf32, #tpu.memory_space<vmem>>, vector<8x128xf32>
    %c0_158 = arith.constant 0 : index
    %c0_159 = arith.constant 0 : index
    %411 = vector.load %arg19[%c0_158, %c0_159] : memref<128x128xf32, #tpu.memory_space<vmem>>, vector<128x128xf32>
    %cst_160 = arith.constant dense<0.000000e+00> : vector<8x128xf32>
    %412 = tpu.matmul %410, %411, %cst_160 {dimension_numbers = #tpu.dot_dimension_numbers<[1], [0], [0], [1], [0, 0, 1, 1], [], []>} : vector<8x128xf32>, vector<128x128xf32>, vector<8x128xf32> -> vector<8x128xf32>
    %c0_161 = arith.constant 0 : index
    %c0_162 = arith.constant 0 : index
    %413 = vector.load %arg20[%c0_161, %c0_162] : memref<1x128xf32, #tpu.memory_space<vmem>>, vector<1x128xf32>
    %414 = vector.broadcast %413 : vector<1x128xf32> to vector<8x128xf32>
    %415 = arith.addf %412, %414 : vector<8x128xf32>
    %416 = vector.extract_strided_slice %415 {offsets = [0, 0], sizes = [6, 128], strides = [1, 1]} : vector<8x128xf32> to vector<6x128xf32>
    %cst_163 = arith.constant dense<0xFF800000> : vector<6xf32>
    %417 = vector.multi_reduction <maximumf>, %416, %cst_163 [1] : vector<6x128xf32> to vector<6xf32>
    %418 = vector.shape_cast %417 : vector<6xf32> to vector<6x1xf32>
    %419 = vector.broadcast %418 : vector<6x1xf32> to vector<6x128xf32>
    %420 = arith.subf %416, %419 : vector<6x128xf32>
    %421 = math.exp %420 : vector<6x128xf32>
    %cst_164 = arith.constant dense<0.000000e+00> : vector<6xf32>
    %422 = vector.multi_reduction <add>, %421, %cst_164 [1] : vector<6x128xf32> to vector<6xf32>
    %423 = vector.shape_cast %422 : vector<6xf32> to vector<6x1xf32>
    %424 = math.log %423 : vector<6x1xf32>
    %425 = vector.broadcast %424 : vector<6x1xf32> to vector<6x128xf32>
    %426 = arith.subf %420, %425 : vector<6x128xf32>
    %c0_165 = arith.constant 0 : index
    %c0_166 = arith.constant 0 : index
    %427 = vector.load %arg22[%c0_165, %c0_166] : memref<6x128xf32, #tpu.memory_space<vmem>>, vector<6x128xf32>
    tpu.vector_store %arg22[%c0_165, %c0_166], %426 {strides = array<i32>} : memref<6x128xf32, #tpu.memory_space<vmem>>, vector<6x128xf32>,
    %428 = tpu.iota {dimensions = array<i32: 1>} : vector<6x128xi32>
    %429 = vector.broadcast %418 : vector<6x1xf32> to vector<6x128xf32>
    %430 = arith.cmpf oeq, %416, %429 : vector<6x128xf32>
    %c128_i32 = arith.constant 128 : i32
    %431 = vector.broadcast %c128_i32 : i32 to vector<6x128xi32>
    %432 = arith.select %430, %428, %431 : vector<6x128xi1>, vector<6x128xi32>
    %cst_167 = arith.constant dense<2147483647> : vector<6xi32>
    %433 = vector.multi_reduction <minsi>, %432, %cst_167 [1] : vector<6x128xi32> to vector<6xi32>
    %434 = vector.shape_cast %433 : vector<6xi32> to vector<6x1xi32>
    %c0_168 = arith.constant 0 : index
    %c0_169 = arith.constant 0 : index
    %435 = vector.load %arg21[%c0_168, %c0_169] : memref<6x1xi32, #tpu.memory_space<vmem>>, vector<6x1xi32>
    tpu.vector_store %arg21[%c0_168, %c0_169], %434 {strides = array<i32>} : memref<6x1xi32, #tpu.memory_space<vmem>>, vector<6x1xi32>,
    return
  }
}

</mosaic_0001>

<bundles_post_ra>
// kernel: tpu_custom_call.1
= control target key start
LH: loop header
LB: loop body
LE: loop exit
PB: predicated region body
PF: predicated region fallthrough
CT: control target
= control target key end

     0   :  { %s7099_s0 = inlined_call_operand.vmem [shape: s32[8,1], index: 0, kind: input, shape index: {}]   ;;  %s7100_s1 = inlined_call_operand.vmem [shape: s32[8,1], index: 1, kind: input, shape index: {}]   ;;  %s7101_s2 = inlined_call_operand.vmem [shape: f32[1,128], index: 2, kind: input, shape index: {}]   ;;  %s7102_s3 = inlined_call_operand.vmem [shape: f32[1,128], index: 3, kind: input, shape index: {}]   ;;  %s7103_s4 = inlined_call_operand.vmem [shape: f32[1,8], index: 4, kind: input, shape index: {}]   ;;  %s7104_s5 = inlined_call_operand.vmem [shape: f32[1,16], index: 5, kind: input, shape index: {}]   ;;  %s7105_s6 = inlined_call_operand.vmem [shape: f32[128,128], index: 6, kind: input, shape index: {}]   ;;  %s7106_s7 = inlined_call_operand.hbm [shape: f32[128,512], index: 7, kind: input, shape index: {}]   ;;  %s7107_s8 = inlined_call_operand.hbm [shape: f32[128,512], index: 8, kind: input, shape index: {}]   ;;  %s7108_s9 = inlined_call_operand.vmem [shape: f32[1,512], index: 9, kind: input, shape index: {}]   ;;  %s7109_s10 = inlined_call_operand.vmem [shape: f32[128,32], index: 10, kind: input, shape index: {}]   ;;  %s7110_s11 = inlined_call_operand.vmem [shape: f32[1,32], index: 11, kind: input, shape index: {}]   ;;  %s7111_s12 = inlined_call_operand.vmem [shape: f32[16,128], index: 12, kind: input, shape index: {}]   ;;  %s7112_s13 = inlined_call_operand.vmem [shape: f32[8,128], index: 13, kind: input, shape index: {}]   ;;  %s7113_s14 = inlined_call_operand.vmem [shape: f32[1,128], index: 14, kind: input, shape index: {}]   ;;  %s7114_s15 = inlined_call_operand.hbm [shape: f32[128,128], index: 15, kind: input, shape index: {}]   ;;  %s7115_s16 = inlined_call_operand.hbm [shape: f32[128,512], index: 16, kind: input, shape index: {}]   ;;  %s7116_s17 = inlined_call_operand.hbm [shape: f32[128,512], index: 17, kind: input, shape index: {}]   ;;  %s7117_s18 = inlined_call_operand.vmem [shape: f32[1,512], index: 18, kind: input, shape index: {}]   ;;  %s7118_s19 = inlined_call_operand.hbm [shape: f32[128,128], index: 19, kind: input, shape index: {}]   ;;  %s7119_s20 = inlined_call_operand.vmem [shape: f32[1,128], index: 20, kind: input, shape index: {}]   ;;  %s7120_s21 = inlined_call_operand.vmem [shape: s32[6,1], index: 21, kind: output, shape index: {0}]   ;;  %s7121_s22 = inlined_call_operand.hbm [shape: f32[6,128], index: 22, kind: output, shape index: {1}]   ;;  %s7122_s23 = inlined_call_operand.hbm [shape: f32[1,16], index: 23, kind: output, shape index: {2}]   ;;  %s7123_s24 = inlined_call_operand.hbm [shape: f32[1,16], index: 24, kind: output, shape index: {3}]  }
   0x1   :  { %7128 = sst [smem:[#allocation26_spill]] %s7099_s0 }
   0x2   :  { %7129 = sst [smem:[#allocation27_spill]] %s7100_s1 }
   0x3   :  { %7130 = sst [smem:[#allocation28_spill]] %s7101_s2 }
   0x4   :  { %7131 = sst [smem:[#allocation29_spill]] %s7102_s3 }
   0x5   :  { %7132 = sst [smem:[#allocation30_spill]] %s7103_s4 }
   0x6   :  { %7133 = sst [smem:[#allocation31_spill]] %s7104_s5 }
   0x7   :  { %7134 = sst [smem:[#allocation32_spill]] %s7105_s6 }
   0x8   :  { %7135 = sst [smem:[#allocation33_spill]] %s7106_s7 }
   0x9   :  { %7136 = sst [smem:[#allocation34_spill]] %s7107_s8 }
   0xa   :  { %7137 = sst [smem:[#allocation35_spill]] %s7120_s21 }
   0xb   :  { %7138 = sst [smem:[#allocation36_spill]] %s7123_s24 }
   0xc   :  { %30 = vsyncpa [#allocation6], 0 }
   0xd   :  { %31 = vsyncpa [#allocation9], 0 }
   0xe   :  { %32 = vsyncpa [#allocation12], 0 }
   0xf   :  { %33 = vsyncpa [#allocation15], 0 }
  0x10   :  { %34 = vsyncpa [#allocation7], 0 }
  0x11   :  { %35 = vsyncpa [#allocation18], 0  ;;  %s5866_s5 = smov [#allocation8]   ;;  %s5867_s27 = smov [#allocation11]  }
  0x12   :  { %s67_s26 = sshll.u32 %s5866_s5, 4  ;;  %s103_s28 = sshll.u32 %s5867_s27, 4  ;;  %s68_s26 = int_to_ptr.vmem [resolvable:$true] %s67_s26  ;;  %s6011_s28 = int_to_ptr.vmem [resolvable:$true] %s103_s28 }
  0x13   :  { %s7139_s29 = sld [smem:[#allocation34_spill]] }
  0x19   :  { %s5656_s0 = scalar_lea.hbm %s7139_s29, 8192 }
  0x1a   :  { %p5657_p0 = scmp.ne.s32.totalorder %s7139_s29, %s5656_s0  ;;  %p5660_p1 = scmp.lt.u32.totalorder %s5656_s0, %s7139_s29 }
  0x1c   :  { %p5662_p2 = pnand %p5660_p1, %p5657_p0 }
  0x1e   :  { %5665 = shalt.err (!%p5662_p2)
}
  0x1f   :  { %s5666_s8 = scalar_lea.vmem %s68_s26, 8192  ;;  %p5671_p4 = scmp.lt.s32.totalorder %s68_s26, %s68_s26 }
  0x20   :  { %p5667_p3 = scmp.ne.s32.totalorder %s68_s26, %s5666_s8  ;;  %p5672_p5 = scmp.lt.s32.totalorder %s5666_s8, %s5666_s8 }
  0x22   :  { %p5673_p6 = por %p5672_p5, %p5671_p4 }
  0x24   :  { %p5674_p7 = pnand %p5673_p6, %p5667_p3 }
  0x26   :  { %5677 = shalt.err (!%p5674_p7)
}
  0x27   :  { %s5868_s4 = smov 512   ;;  %s5869_s1 = smov 32  }
  0x28   :  { %73 = dma.hbm_to_vmem [thread:$0]  %s7139_s29, 8192, %s68_s26, [#allocation9], %s5868_s4, %s5868_s4, %s5869_s1  }
  0x29   :  { %s5678_s0 = scalar_lea.hbm %s7115_s16, 8192 }
  0x2a   :  { %p5679_p8 = scmp.ne.s32.totalorder %s7115_s16, %s5678_s0  ;;  %p5682_p9 = scmp.lt.u32.totalorder %s5678_s0, %s7115_s16 }
  0x2c   :  { %p5684_p10 = pnand %p5682_p9, %p5679_p8 }
  0x2e   :  { %5687 = shalt.err (!%p5684_p10)
}
  0x2f   :  { %s5688_s8 = scalar_lea.vmem %s6011_s28, 8192  ;;  %p5693_p12 = scmp.lt.s32.totalorder %s6011_s28, %s6011_s28 }
  0x30   :  { %p5689_p11 = scmp.ne.s32.totalorder %s6011_s28, %s5688_s8  ;;  %p5694_p13 = scmp.lt.s32.totalorder %s5688_s8, %s5688_s8 }
  0x32   :  { %p5695_p0 = por %p5694_p13, %p5693_p12 }
  0x34   :  { %p5696_p1 = pnand %p5695_p0, %p5689_p11 }
  0x36   :  { %5699 = shalt.err (!%p5696_p1)
}
  0x37   :  { %109 = dma.hbm_to_vmem [thread:$0]  %s7115_s16, 8192, %s6011_s28, [#allocation12], %s5868_s4, %s5868_s4, %s5869_s1  }
  0x38   :  { %s5870_s5 = smov [#allocation5]   ;;  %s5871_s6 = smov [#allocation10]  }
  0x39   :  { %s55_s27 = sshll.u32 %s5870_s5, 4  ;;  %s91_s2 = sshll.u32 %s5871_s6, 4  ;;  %s56_s27 = int_to_ptr.vmem [resolvable:$true] %s55_s27  ;;  %s6048_s2 = int_to_ptr.vmem [resolvable:$true] %s91_s2 }
  0x3a   :  { %s7140_s30 = sld [smem:[#allocation33_spill]] }
  0x40   :  { %s5700_s3 = scalar_lea.hbm %s7140_s30, 8192 }
  0x41   :  { %p5701_p2 = scmp.ne.s32.totalorder %s7140_s30, %s5700_s3  ;;  %p5704_p3 = scmp.lt.u32.totalorder %s5700_s3, %s7140_s30 }
  0x43   :  { %p5706_p4 = pnand %p5704_p3, %p5701_p2 }
  0x45   :  { %5709 = shalt.err (!%p5706_p4)
}
  0x46   :  { %s5710_s16 = scalar_lea.vmem %s56_s27, 8192  ;;  %p5715_p6 = scmp.lt.s32.totalorder %s56_s27, %s56_s27 }
  0x47   :  { %p5711_p5 = scmp.ne.s32.totalorder %s56_s27, %s5710_s16  ;;  %p5716_p7 = scmp.lt.s32.totalorder %s5710_s16, %s5710_s16 }
  0x49   :  { %p5717_p8 = por %p5716_p7, %p5715_p6 }
  0x4b   :  { %p5718_p9 = pnand %p5717_p8, %p5711_p5 }
  0x4d   :  { %5721 = shalt.err (!%p5718_p9)
}
  0x4e   :  { %61 = dma.hbm_to_vmem [thread:$0]  %s7140_s30, 8192, %s56_s27, [#allocation6], %s5868_s4, %s5868_s4, %s5869_s1  }
  0x4f   :  { %s5722_s21 = scalar_lea.hbm %s7114_s15, 2048 }
  0x50   :  { %p5723_p10 = scmp.ne.s32.totalorder %s7114_s15, %s5722_s21  ;;  %p5726_p11 = scmp.lt.u32.totalorder %s5722_s21, %s7114_s15 }
  0x52   :  { %p5728_p12 = pnand %p5726_p11, %p5723_p10 }
  0x54   :  { %5731 = shalt.err (!%p5728_p12)
}
  0x55   :  { %s5732_s3 = scalar_lea.vmem %s6048_s2, 2048  ;;  %p5737_p0 = scmp.lt.s32.totalorder %s6048_s2, %s6048_s2 }
  0x56   :  { %p5733_p13 = scmp.ne.s32.totalorder %s6048_s2, %s5732_s3  ;;  %p5738_p1 = scmp.lt.s32.totalorder %s5732_s3, %s5732_s3 }
  0x58   :  { %p5739_p2 = por %p5738_p1, %p5737_p0 }
  0x5a   :  { %p5740_p3 = pnand %p5739_p2, %p5733_p13 }
  0x5c   :  { %5743 = shalt.err (!%p5740_p3)
}
  0x5d   :  { %s5872_s27 = smov 128   ;;  %s5873_s30 = smov 8  }
  0x5e   :  { %97 = dma.hbm_to_vmem [thread:$0]  %s7114_s15, 2048, %s6048_s2, [#allocation9], %s5872_s27, %s5872_s27, %s5873_s30  }
  0x5f   :  { %s5874_s16 = smov [#allocation13]   ;;  %s5875_s26 = smov [#allocation14]  }
  0x60   :  { %s115_s28 = sshll.u32 %s5874_s16, 4  ;;  %s129_s29 = sshll.u32 %s5875_s26, 4  ;;  %s116_s28 = int_to_ptr.vmem [resolvable:$true] %s115_s28  ;;  %s6085_s29 = int_to_ptr.vmem [resolvable:$true] %s129_s29 }
  0x61   :  { %s5744_s24 = scalar_lea.hbm %s7116_s17, 8192 }
  0x62   :  { %p5745_p4 = scmp.ne.s32.totalorder %s7116_s17, %s5744_s24  ;;  %p5748_p5 = scmp.lt.u32.totalorder %s5744_s24, %s7116_s17 }
  0x64   :  { %p5750_p6 = pnand %p5748_p5, %p5745_p4 }
  0x66   :  { %5753 = shalt.err (!%p5750_p6)
}
  0x67   :  { %s5754_s15 = scalar_lea.vmem %s116_s28, 8192  ;;  %p5759_p8 = scmp.lt.s32.totalorder %s116_s28, %s116_s28 }
  0x68   :  { %p5755_p7 = scmp.ne.s32.totalorder %s116_s28, %s5754_s15  ;;  %p5760_p9 = scmp.lt.s32.totalorder %s5754_s15, %s5754_s15 }
  0x6a   :  { %p5761_p10 = por %p5760_p9, %p5759_p8 }
  0x6c   :  { %p5762_p11 = pnand %p5761_p10, %p5755_p7 }
  0x6e   :  { %5765 = shalt.err (!%p5762_p11)
}
  0x6f   :  { %121 = dma.hbm_to_vmem [thread:$0]  %s7116_s17, 8192, %s116_s28, [#allocation12], %s5868_s4, %s5868_s4, %s5869_s1  }
  0x70   :  { %s5766_s26 = scalar_lea.hbm %s7118_s19, 2048 }
  0x71   :  { %p5767_p12 = scmp.ne.s32.totalorder %s7118_s19, %s5766_s26  ;;  %p5770_p13 = scmp.lt.u32.totalorder %s5766_s26, %s7118_s19 }
  0x73   :  { %p5772_p0 = pnand %p5770_p13, %p5767_p12 }
  0x75   :  { %5775 = shalt.err (!%p5772_p0)
}
  0x76   :  { %s5776_s0 = scalar_lea.vmem %s6085_s29, 2048  ;;  %p5781_p2 = scmp.lt.s32.totalorder %s6085_s29, %s6085_s29 }
  0x77   :  { %p5777_p1 = scmp.ne.s32.totalorder %s6085_s29, %s5776_s0  ;;  %p5782_p3 = scmp.lt.s32.totalorder %s5776_s0, %s5776_s0 }
  0x79   :  { %p5783_p4 = por %p5782_p3, %p5781_p2 }
  0x7b   :  { %p5784_p5 = pnand %p5783_p4, %p5777_p1 }
  0x7d   :  { %5787 = shalt.err (!%p5784_p5)
}
  0x7e   :  { %135 = dma.hbm_to_vmem [thread:$0]  %s7118_s19, 2048, %s6085_s29, [#allocation15], %s5872_s27, %s5872_s27, %s5873_s30  }
  0x7f   :  { %5854 = dma.done.wait [#allocation6], 8192  }
  0x80   :  { %5855 = vsyncadd [#allocation6], 4294959104 }
  0x81   :  { %5856 = dma.done.wait [#allocation9], 10240  }
  0x82   :  { %5857 = vsyncadd [#allocation9], 4294957056 }
  0x83   :  { %5858 = dma.done.wait [#allocation12], 16384  }
  0x84   :  { %5859 = vsyncadd [#allocation12], 4294950912 }
  0x85   :  { %5860 = dma.done.wait [#allocation15], 2048  }
  0x86   :  { %5861 = vsyncadd [#allocation15], 4294965248  ;;  %v5876_v0 = vmov 0   ;;  %v5877_v1 = vmov 0.0|0.0   ;;  %s7141_s7 = sld [smem:[#allocation26_spill]]  ;;  %s7142_s19 = sld [smem:[#allocation32_spill]] }
  0x87   :  { %5455 = vset.pattern.permute.xlu0 %v5876_v0  ;;  %4440 = vmatprep.subr.bf16.mxu0 %v5877_v1  ;;  %vm5878_vm0 = vmmov 0   ;;  %v5879_v7 = vmov 0.0   ;;  %s7143_s5 = sld [smem:[#allocation27_spill]]  ;;  %v252_v13 = vld [vmem:[#allocation5 + $0x8] sm:$0xff]  ;;  %v251_v16 = vld [vmem:[#allocation5] sm:$0xff]  ;;  %s7144_s4 = sld [smem:[#allocation28_spill]] }
  0x88   :  { %4320 = vmatprep.mubr.msk.f32.mxu0 %vm5878_vm0, %v5879_v7  ;;  %2050 = vst [vmem:[#allocation4] sm:$0xff] %v5879_v7  ;;  %401 = vmatprep.mubr.f32.mxu1 %v5879_v7  ;;  %v256_v14 = vld [vmem:[#allocation5 + $0x28] sm:$0xff]  ;;  %v255_v17 = vld [vmem:[#allocation5 + $0x20] sm:$0xff]  ;;  %s7145_s3 = sld [smem:[#allocation29_spill]]  ;;  %s7146_s2 = sld [smem:[#allocation30_spill]]  ;;  %vm1900_vm2 = vcmask 64512  }
  0x89   :  { %v4464_v15 = vpack.c.bf16 %v256_v14, %v252_v13  ;;  %v4466_v19 = vpack.c.bf16 %v255_v17, %v251_v16  ;;  %v260_v20 = vld [vmem:[#allocation5 + $0x48] sm:$0xff]  ;;  %v259_v25 = vld [vmem:[#allocation5 + $0x40] sm:$0xff]  ;;  %vm1865_vm4 = vcmask 122880   ;;  %vm1974_vm5 = vcmask 130048   ;;  %s5884_s29 = smov [#allocation16]  }
  0x8a   :  { %v264_v23 = vld [vmem:[#allocation5 + $0x68] sm:$0xff]  ;;  %v263_v26 = vld [vmem:[#allocation5 + $0x60] sm:$0xff]  ;;  %vm4090_vm6 = vcmask 1045504  }
  0x8b   :  { %4465 = vmatprep.subr.bf16.mxu1 %v4464_v15  ;;  %v4468_v24 = vpack.c.bf16 %v264_v23, %v260_v20  ;;  %v4470_v27 = vpack.c.bf16 %v263_v26, %v259_v25  ;;  %v268_v28 = vld [vmem:[#allocation5 + $0x88] sm:$0xff]  ;;  %v267_v32 = vld [vmem:[#allocation5 + $0x80] sm:$0xff]  ;;  %v257_v20 = vld [vmem:[#allocation5 + $0x30] sm:$0xff] }
  0x8c   :  { %v158_v2 = vld [vmem:[%s7141_s7] sm:$0xff]  ;;  %v166_v4 = vld [vmem:[%s7142_s19 + $0x8] sm:$0xff]  ;;  %v167_v5 = vld [vmem:[%s7142_s19 + $0x10] sm:$0xff]  ;;  %4467 = vmatpush1.bf16.msra.mxu1 %v4466_v19  ;;  %s7147_s7 = sld [smem:[#allocation31_spill]] }
  0x8d   :  { %v165_v3 = vld [vmem:[%s7142_s19] sm:$0xff]  ;;  %160 = vperm.xlu0 %5455, %v158_v2   ;;  %v168_v6 = vld [vmem:[%s7142_s19 + $0x18] sm:$0xff]  ;;  %v170_v12 = vld [vmem:[%s7142_s19 + $0x28] sm:$0xff]  ;;  %4469 = vmatprep.subr.bf16.mxu1 %v4468_v24 }
  0x8e   :  { %v2051_v8 = vld [vmem:[%s7143_s5] sm:$0xff]  ;;  %v4441_v9 = vpack.c.bf16 %v166_v4, %v165_v3  ;;  %v4444_v10 = vpack.c.bf16 %v168_v6, %v167_v5  ;;  %v171_v21 = vld [vmem:[%s7142_s19 + $0x30] sm:$0xff]  ;;  %v172_v22 = vld [vmem:[%s7142_s19 + $0x38] sm:$0xff] }
  0x8f   :  { %v169_v11 = vld [vmem:[%s7142_s19 + $0x20] sm:$0xff]  ;;  %v272_v29 = vld [vmem:[#allocation5 + $0xa8] sm:$0xff]  ;;  %v4450_v30 = vpack.c.bf16 %v172_v22, %v171_v21  ;;  %v174_v34 = vld [vmem:[%s7142_s19 + $0x48] sm:$0xff] }
  0x90   :  { %4442 = vmatpush3.bf16.msra.mxu0 %v4441_v9  ;;  %v4447_v18 = vpack.c.bf16 %v170_v12, %v169_v11  ;;  %v4472_v31 = vpack.c.bf16 %v272_v29, %v268_v28  ;;  %v173_v33 = vld [vmem:[%s7142_s19 + $0x40] sm:$0xff]  ;;  %v271_v35 = vld [vmem:[#allocation5 + $0xa0] sm:$0xff]  ;;  %4471 = vmatpush1.bf16.msra.mxu1 %v4470_v27  ;;  %v276_v37 = vld [vmem:[#allocation5 + $0xc8] sm:$0xff] }
  0x91   :  { %2053 = vperm.xlu0 %5455, %v2051_v8   ;;  %4443 = vmatprep.subr.bf16.mxu0 %v5877_v1  ;;  %v4474_v36 = vpack.c.bf16 %v271_v35, %v267_v32  ;;  %v280_v38 = vld [vmem:[#allocation5 + $0xe8] sm:$0xff]  ;;  %v275_v40 = vld [vmem:[#allocation5 + $0xc0] sm:$0xff]  ;;  %v4453_v42 = vpack.c.bf16 %v174_v34, %v173_v33  ;;  %v176_v45 = vld [vmem:[%s7142_s19 + $0x58] sm:$0xff] }
  0x92   :  { %4473 = vmatprep.subr.bf16.mxu1 %v4472_v31  ;;  %v4476_v39 = vpack.c.bf16 %v280_v38, %v276_v37  ;;  %v279_v41 = vld [vmem:[#allocation5 + $0xe0] sm:$0xff]  ;;  %v284_v43 = vld [vmem:[#allocation5 + $0x108] sm:$0xff]  ;;  %v177_v54 = vld [vmem:[%s7142_s19 + $0x60] sm:$0xff]  ;;  %v5880_v31 = vmov 1.0  }
  0x93   :  { %v175_v44 = vld [vmem:[%s7142_s19 + $0x50] sm:$0xff]  ;;  %v4478_v47 = vpack.c.bf16 %v279_v41, %v275_v40  ;;  %v283_v49 = vld [vmem:[#allocation5 + $0x100] sm:$0xff]  ;;  %v180_v0 = vld [vmem:[%s7142_s19 + $0x78] sm:$0xff] }
  0x94   :  { %4445 = vmatpush3.bf16.msra.mxu0 %v4444_v10  ;;  %v288_v46 = vld [vmem:[#allocation5 + $0x128] sm:$0xff]  ;;  %4475 = vmatpush1.bf16.msra.mxu1 %v4474_v36  ;;  %v287_v50 = vld [vmem:[#allocation5 + $0x120] sm:$0xff]  ;;  %v4456_v51 = vpack.c.bf16 %v176_v45, %v175_v44  ;;  %v254_v2 = vld [vmem:[#allocation5 + $0x18] sm:$0xff] }
  0x95   :  { %4446 = vmatprep.subr.bf16.mxu0 %v5877_v1  ;;  %4477 = vmatprep.subr.bf16.mxu1 %v4476_v39  ;;  %v4480_v48 = vpack.c.bf16 %v288_v46, %v284_v43  ;;  %v292_v52 = vld [vmem:[#allocation5 + $0x148] sm:$0xff]  ;;  %v178_v55 = vld [vmem:[%s7142_s19 + $0x68] sm:$0xff]  ;;  %v4482_v56 = vpack.c.bf16 %v287_v50, %v283_v49  ;;  %v258_v3 = vld [vmem:[#allocation5 + $0x38] sm:$0xff] }
  0x96   :  { %v296_v53 = vld [vmem:[#allocation5 + $0x168] sm:$0xff]  ;;  %v291_v58 = vld [vmem:[#allocation5 + $0x140] sm:$0xff]  ;;  %v4459_v60 = vpack.c.bf16 %v178_v55, %v177_v54  ;;  %v4496_v12 = vpack.c.bf16 %v258_v3, %v254_v2  ;;  %v253_v19 = vld [vmem:[#allocation5 + $0x10] sm:$0xff] }
  0x97   :  { %v4484_v57 = vpack.c.bf16 %v296_v53, %v292_v52  ;;  %v295_v59 = vld [vmem:[#allocation5 + $0x160] sm:$0xff]  ;;  %v300_v61 = vld [vmem:[#allocation5 + $0x188] sm:$0xff]  ;;  %v262_v22 = vld [vmem:[#allocation5 + $0x58] sm:$0xff]  ;;  %v4498_v24 = vpack.c.bf16 %v257_v20, %v253_v19 }
  0x98   :  { %4448 = vmatpush3.bf16.msra.mxu0 %v4447_v18  ;;  %4479 = vmatpush1.bf16.msra.mxu1 %v4478_v47  ;;  %v304_v62 = vld [vmem:[#allocation5 + $0x1a8] sm:$0xff]  ;;  %v4486_v4 = vpack.c.bf16 %v295_v59, %v291_v58  ;;  %v299_v6 = vld [vmem:[#allocation5 + $0x180] sm:$0xff]  ;;  %v156_v18 = vlaneseq  ;;  %v266_v23 = vld [vmem:[#allocation5 + $0x78] sm:$0xff] }
  0x99   :  { %4449 = vmatprep.subr.bf16.mxu0 %v5877_v1  ;;  %4481 = vmatprep.subr.bf16.mxu1 %v4480_v48  ;;  %v179_v63 = vld [vmem:[%s7142_s19 + $0x70] sm:$0xff]  ;;  %v4488_v5 = vpack.c.bf16 %v304_v62, %v300_v61  ;;  %v303_v8 = vld [vmem:[#allocation5 + $0x1a0] sm:$0xff]  ;;  %v4500_v26 = vpack.c.bf16 %v266_v23, %v262_v22  ;;  %v261_v27 = vld [vmem:[#allocation5 + $0x50] sm:$0xff] }
  0x9a   :  { %v4462_v9 = vpack.c.bf16 %v180_v0, %v179_v63  ;;  %v308_v10 = vld [vmem:[#allocation5 + $0x1c8] sm:$0xff]  ;;  %v4490_v13 = vpack.c.bf16 %v303_v8, %v299_v6  ;;  %v307_v15 = vld [vmem:[#allocation5 + $0x1c0] sm:$0xff]  ;;  %v6189_v21 = vand.u32 127, %v156_v18  ;;  %v265_v28 = vld [vmem:[#allocation5 + $0x70] sm:$0xff] }
  0x9b   :  { %v312_v11 = vld [vmem:[#allocation5 + $0x1e8] sm:$0xff]  ;;  %v311_v16 = vld [vmem:[#allocation5 + $0x1e0] sm:$0xff]  ;;  %v270_v29 = vld [vmem:[#allocation5 + $0x98] sm:$0xff]  ;;  %v4502_v32 = vpack.c.bf16 %v265_v28, %v261_v27 }
  0x9c   :  { %4451 = vmatpush3.bf16.msra.mxu0 %v4450_v30  ;;  %4483 = vmatpush1.bf16.msra.mxu1 %v4482_v56  ;;  %v4492_v14 = vpack.c.bf16 %v312_v11, %v308_v10  ;;  %v4494_v17 = vpack.c.bf16 %v311_v16, %v307_v15  ;;  %v274_v30 = vld [vmem:[#allocation5 + $0xb8] sm:$0xff]  ;;  %v269_v34 = vld [vmem:[#allocation5 + $0x90] sm:$0xff]  ;;  %v486_v11 = vld [vmem:[#allocation8] sm:$0xff] }
  0x9d   :  { %4452 = vmatprep.subr.bf16.mxu0 %v5877_v1  ;;  %4485 = vmatprep.subr.bf16.mxu1 %v4484_v57  ;;  %v4504_v33 = vpack.c.bf16 %v274_v30, %v270_v29  ;;  %v273_v35 = vld [vmem:[#allocation5 + $0xb0] sm:$0xff]  ;;  %v278_v36 = vld [vmem:[#allocation5 + $0xd8] sm:$0xff]  ;;  %v495_v15 = vld [vmem:[#allocation8 + $0x48] sm:$0xff] }
  0x9e   :  { %v282_v37 = vld [vmem:[#allocation5 + $0xf8] sm:$0xff]  ;;  %v4506_v38 = vpack.c.bf16 %v273_v35, %v269_v34  ;;  %v277_v40 = vld [vmem:[#allocation5 + $0xd0] sm:$0xff]  ;;  %v499_v16 = vld [vmem:[#allocation8 + $0x68] sm:$0xff] }
  0x9f   :  { %v4508_v39 = vpack.c.bf16 %v282_v37, %v278_v36  ;;  %v281_v41 = vld [vmem:[#allocation5 + $0xf0] sm:$0xff]  ;;  %v290_v43 = vld [vmem:[#allocation5 + $0x138] sm:$0xff]  ;;  %v494_v23 = vld [vmem:[#allocation8 + $0x40] sm:$0xff] }
  0xa0   :  { %4454 = vmatpush3.bf16.msra.mxu0 %v4453_v42  ;;  %4487 = vmatpush1.bf16.msra.mxu1 %v4486_v4  ;;  %v286_v42 = vld [vmem:[#allocation5 + $0x118] sm:$0xff]  ;;  %v4510_v44 = vpack.c.bf16 %v281_v41, %v277_v40  ;;  %v285_v46 = vld [vmem:[#allocation5 + $0x110] sm:$0xff]  ;;  %v487_v4 = vld [vmem:[#allocation8 + $0x8] sm:$0xff] }
  0xa1   :  { %4455 = vmatprep.subr.bf16.mxu0 %v5877_v1  ;;  %4489 = vmatprep.subr.bf16.mxu1 %v4488_v5  ;;  %v4512_v45 = vpack.c.bf16 %v290_v43, %v286_v42  ;;  %v289_v47 = vld [vmem:[#allocation5 + $0x130] sm:$0xff]  ;;  %v294_v48 = vld [vmem:[#allocation5 + $0x158] sm:$0xff]  ;;  %v491_v5 = vld [vmem:[#allocation8 + $0x28] sm:$0xff] }
  0xa2   :  { %v298_v49 = vld [vmem:[#allocation5 + $0x178] sm:$0xff]  ;;  %v4514_v50 = vpack.c.bf16 %v289_v47, %v285_v46  ;;  %v293_v52 = vld [vmem:[#allocation5 + $0x150] sm:$0xff]  ;;  %v6194_v8 = vpack.c.bf16 %v491_v5, %v487_v4  ;;  %v503_v29 = vld [vmem:[#allocation8 + $0x88] sm:$0xff] }
  0xa3   :  { %v297_v53 = vld [vmem:[#allocation5 + $0x170] sm:$0xff]  ;;  %v302_v54 = vld [vmem:[#allocation5 + $0x198] sm:$0xff]  ;;  %v527_v5 = vld [vmem:[#allocation8 + $0x148] sm:$0xff] }
  0xa4   :  { %4457 = vmatpush3.bf16.msra.mxu0 %v4456_v51  ;;  %4491 = vmatpush1.bf16.msra.mxu1 %v4490_v13  ;;  %v4516_v51 = vpack.c.bf16 %v298_v49, %v294_v48  ;;  %v306_v55 = vld [vmem:[#allocation5 + $0x1b8] sm:$0xff]  ;;  %v4518_v56 = vpack.c.bf16 %v297_v53, %v293_v52  ;;  %v301_v58 = vld [vmem:[#allocation5 + $0x190] sm:$0xff] }
  0xa5   :  { %4458 = vmatprep.subr.bf16.mxu0 %v5877_v1  ;;  %4493 = vmatprep.subr.bf16.mxu1 %v4492_v14  ;;  %v4520_v57 = vpack.c.bf16 %v306_v55, %v302_v54  ;;  %v305_v59 = vld [vmem:[#allocation5 + $0x1b0] sm:$0xff]  ;;  %v314_v61 = vld [vmem:[#allocation5 + $0x1f8] sm:$0xff] }
  0xa6   :  { %v4522_v62 = vpack.c.bf16 %v305_v59, %v301_v58  ;;  %v309_v0 = vld [vmem:[#allocation5 + $0x1d0] sm:$0xff]  ;;  %v489_v6 = vld [vmem:[#allocation8 + $0x18] sm:$0xff] }
  0xa7   :  { %v313_v2 = vld [vmem:[#allocation5 + $0x1f0] sm:$0xff]  ;;  %v501_v19 = vld [vmem:[#allocation8 + $0x78] sm:$0xff] }
  0xa8   :  { %4460 = vmatpush3.bf16.msra.mxu0 %v4459_v60  ;;  %4495 = vmatpush1.bf16.msra.mxu1 %v4494_v17  ;;  %v310_v60 = vld [vmem:[#allocation5 + $0x1d8] sm:$0xff]  ;;  %v4526_v3 = vpack.c.bf16 %v313_v2, %v309_v0  ;;  %v488_v13 = vld [vmem:[#allocation8 + $0x10] sm:$0xff] }
  0xa9   :  { %4461 = vmatprep.subr.bf16.mxu0 %v5877_v1  ;;  %v4524_v63 = vpack.c.bf16 %v314_v61, %v310_v60  ;;  %4529 = vmatprep.subr.bf16.mxu1 %v6194_v8  ;;  %v492_v14 = vld [vmem:[#allocation8 + $0x30] sm:$0xff]  ;;  %v497_v17 = vld [vmem:[#allocation8 + $0x58] sm:$0xff] }
  0xaa   :  { %v6202_v22 = vpack.c.bf16 %v492_v14, %v488_v13  ;;  %v496_v27 = vld [vmem:[#allocation8 + $0x50] sm:$0xff]  ;;  %v509_v34 = vld [vmem:[#allocation8 + $0xb8] sm:$0xff]  ;;  %v526_v14 = vld [vmem:[#allocation8 + $0x140] sm:$0xff] }
  0xab   :  { %v500_v28 = vld [vmem:[#allocation8 + $0x70] sm:$0xff]  ;;  %v513_v46 = vld [vmem:[#allocation8 + $0xd8] sm:$0xff] }
  0xac   :  { %4463 = vmatpush3.bf16.msra.mxu0 %v4462_v9  ;;  %v493_v9 = vld [vmem:[#allocation8 + $0x38] sm:$0xff]  ;;  %v6212_v37 = vpack.c.bf16 %v500_v28, %v496_v27  ;;  %v504_v42 = vld [vmem:[#allocation8 + $0x90] sm:$0xff]  ;;  %v539_v27 = vld [vmem:[#allocation8 + $0x1a8] sm:$0xff] }
  0xad   :  { %4497 = vmatprep.subr.bf16.mxu0 %v4496_v12  ;;  %v6196_v10 = vpack.c.bf16 %v493_v9, %v489_v6  ;;  %v490_v12 = vld [vmem:[#allocation8 + $0x20] sm:$0xff]  ;;  %v508_v43 = vld [vmem:[#allocation8 + $0xb0] sm:$0xff]  ;;  %v517_v47 = vld [vmem:[#allocation8 + $0xf8] sm:$0xff] }
  0xae   :  { %v6200_v20 = vpack.c.bf16 %v490_v12, %v486_v11  ;;  %v6226_v49 = vpack.c.bf16 %v508_v43, %v504_v42  ;;  %v6232_v53 = vpack.c.bf16 %v517_v47, %v513_v46  ;;  %v512_v54 = vld [vmem:[#allocation8 + $0xd0] sm:$0xff]  ;;  %v521_v58 = vld [vmem:[#allocation8 + $0x118] sm:$0xff]  ;;  %v531_v6 = vld [vmem:[#allocation8 + $0x168] sm:$0xff] }
  0xaf   :  { %v516_v55 = vld [vmem:[#allocation8 + $0xf0] sm:$0xff]  ;;  %v525_v59 = vld [vmem:[#allocation8 + $0x138] sm:$0xff]  ;;  %v543_v43 = vld [vmem:[#allocation8 + $0x1c8] sm:$0xff] }
  0xb0   :  { %v6238_v61 = vpack.c.bf16 %v516_v55, %v512_v54  ;;  %v6244_v2 = vpack.c.bf16 %v525_v59, %v521_v58  ;;  %v524_v4 = vld [vmem:[#allocation8 + $0x130] sm:$0xff]  ;;  %v529_v9 = vld [vmem:[#allocation8 + $0x158] sm:$0xff] }
  0xb1   :  { %v533_v11 = vld [vmem:[#allocation8 + $0x178] sm:$0xff]  ;;  %v540_v42 = vld [vmem:[#allocation8 + $0x1b0] sm:$0xff] }
  0xb2   :  { %v537_v28 = vld [vmem:[#allocation8 + $0x198] sm:$0xff]  ;;  %v548_v58 = vld [vmem:[#allocation8 + $0x1f0] sm:$0xff] }
  0xb3   :  { %v549_v46 = vld [vmem:[#allocation8 + $0x1f8] sm:$0xff] }
 0x10c   :  { %v161_v25 = vpop.permute.xlu0 %160 }
 0x10d   :  { %vm162_vm1 = vcmp.eq.s32.totalorder %v6189_v21, %v161_v25  ;;  %v6204_v25 = vpack.c.bf16 %v499_v16, %v495_v15  ;;  %v530_v15 = vld [vmem:[#allocation8 + $0x160] sm:$0xff]  ;;  %v6254_v16 = vpack.c.bf16 %v531_v6, %v527_v5  ;;  %v315_v6 = vld [vmem:[%s7108_s9] sm:$0xf] }
 0x10e   :  { %4321 = vmatmul.mubr.msk.f32.vlgmr.msra.gmra.mrb[0].mxu0 %vm162_vm1, %v5880_v31 }
 0x10f   :  { %4499 = vmatpush1.bf16.msra.mxu0 %v4498_v24  ;;  %472 = vmatprep.mubr.f32.mxu0 %v5879_v7  ;;  %v498_v24 = vld [vmem:[#allocation8 + $0x60] sm:$0xff] }
 0x110   :  { %4501 = vmatprep.subr.bf16.mxu0 %v4500_v26  ;;  %v6206_v26 = vpack.c.bf16 %v501_v19, %v497_v17  ;;  %v6210_v36 = vpack.c.bf16 %v498_v24, %v494_v23  ;;  %v6256_v17 = vpack.c.bf16 %v533_v11, %v529_v9  ;;  %v528_v19 = vld [vmem:[#allocation8 + $0x150] sm:$0xff]  ;;  %v535_v24 = vld [vmem:[#allocation8 + $0x188] sm:$0xff] }
 0x111   :  { %v532_v23 = vld [vmem:[#allocation8 + $0x170] sm:$0xff] }
 0x113   :  { %4503 = vmatpush1.bf16.msra.mxu0 %v4502_v32  ;;  %v507_v32 = vld [vmem:[#allocation8 + $0xa8] sm:$0xff] }
 0x114   :  { %4505 = vmatprep.subr.bf16.mxu0 %v4504_v33  ;;  %v505_v33 = vld [vmem:[#allocation8 + $0x98] sm:$0xff]  ;;  %v6216_v40 = vpack.c.bf16 %v507_v32, %v503_v29  ;;  %v6262_v32 = vpack.c.bf16 %v532_v23, %v528_v19 }
 0x115   :  { %v6218_v41 = vpack.c.bf16 %v509_v34, %v505_v33  ;;  %v541_v29 = vld [vmem:[#allocation8 + $0x1b8] sm:$0xff]  ;;  %v534_v33 = vld [vmem:[#allocation8 + $0x180] sm:$0xff] }
 0x116   :  { %v538_v34 = vld [vmem:[#allocation8 + $0x1a0] sm:$0xff] }
 0x117   :  { %4507 = vmatpush1.bf16.msra.mxu0 %v4506_v38  ;;  %v502_v38 = vld [vmem:[#allocation8 + $0x80] sm:$0xff]  ;;  %v6272_v47 = vpack.c.bf16 %v538_v34, %v534_v33 }
 0x118   :  { %4509 = vmatprep.subr.bf16.mxu0 %v4508_v39  ;;  %v506_v39 = vld [vmem:[#allocation8 + $0xa0] sm:$0xff] }
 0x119   :  { %v6224_v48 = vpack.c.bf16 %v506_v39, %v502_v38  ;;  %v6268_v38 = vpack.c.bf16 %v541_v29, %v537_v28  ;;  %v536_v39 = vld [vmem:[#allocation8 + $0x190] sm:$0xff] }
 0x11b   :  { %4511 = vmatpush1.bf16.msra.mxu0 %v4510_v44  ;;  %v511_v44 = vld [vmem:[#allocation8 + $0xc8] sm:$0xff] }
 0x11c   :  { %4513 = vmatprep.subr.bf16.mxu0 %v4512_v45  ;;  %v515_v45 = vld [vmem:[#allocation8 + $0xe8] sm:$0xff] }
 0x11d   :  { %v6230_v52 = vpack.c.bf16 %v515_v45, %v511_v44  ;;  %v547_v44 = vld [vmem:[#allocation8 + $0x1e8] sm:$0xff]  ;;  %v545_v45 = vld [vmem:[#allocation8 + $0x1d8] sm:$0xff] }
 0x11e   :  { %v6278_v54 = vpack.c.bf16 %v547_v44, %v543_v43  ;;  %v6280_v55 = vpack.c.bf16 %v549_v46, %v545_v45 }
 0x11f   :  { %4515 = vmatpush1.bf16.msra.mxu0 %v4514_v50  ;;  %v510_v50 = vld [vmem:[#allocation8 + $0xc0] sm:$0xff] }
 0x120   :  { %4517 = vmatprep.subr.bf16.mxu0 %v4516_v51  ;;  %v514_v51 = vld [vmem:[#allocation8 + $0xe0] sm:$0xff] }
 0x121   :  { %v6236_v60 = vpack.c.bf16 %v514_v51, %v510_v50  ;;  %v6274_v50 = vpack.c.bf16 %v540_v42, %v536_v39  ;;  %v542_v51 = vld [vmem:[#allocation8 + $0x1c0] sm:$0xff]  ;;  %v5881_v42 = vmov 1966171168  }
 0x122   :  { %v699_v43 = vunpack.c.l.s4 %v5881_v42 }
 0x123   :  { %4519 = vmatpush1.bf16.msra.mxu0 %v4518_v56  ;;  %v519_v56 = vld [vmem:[#allocation8 + $0x108] sm:$0xff] }
 0x124   :  { %4521 = vmatprep.subr.bf16.mxu0 %v4520_v57  ;;  %v523_v57 = vld [vmem:[#allocation8 + $0x128] sm:$0xff]  ;;  %v700_v44 = vunpack.c.0.s8 %v699_v43 }
 0x125   :  { %v6242_v0 = vpack.c.bf16 %v523_v57, %v519_v56  ;;  %v546_v56 = vld [vmem:[#allocation8 + $0x1e0] sm:$0xff]  ;;  %v544_v57 = vld [vmem:[#allocation8 + $0x1d0] sm:$0xff] }
 0x126   :  { %v6284_v59 = vpack.c.bf16 %v546_v56, %v542_v51 }
 0x127   :  { %4523 = vmatpush1.bf16.msra.mxu0 %v4522_v62  ;;  %v518_v62 = vld [vmem:[#allocation8 + $0x100] sm:$0xff] }
 0x128   :  { %4525 = vmatprep.subr.bf16.mxu0 %v4524_v63  ;;  %v522_v63 = vld [vmem:[#allocation8 + $0x120] sm:$0xff] }
 0x129   :  { %v6248_v12 = vpack.c.bf16 %v522_v63, %v518_v62  ;;  %v6286_v62 = vpack.c.bf16 %v548_v58, %v544_v57  ;;  %v483_v63 = vld [vmem:[%s7144_s4] sm:$0x1] }
 0x12b   :  { %4527 = vmatpush1.bf16.msra.mxu0 %v4526_v3  ;;  %v520_v3 = vld [vmem:[#allocation8 + $0x110] sm:$0xff] }
 0x12c   :  { %4561 = vmatprep.subr.bf16.mxu0 %v6196_v10  ;;  %v6250_v13 = vpack.c.bf16 %v524_v4, %v520_v3  ;;  %v6332_v3 = vshrl.u32 %v156_v18, 7 }
 0x12e   :  { %v319_v4 = vsub.s32 0, %v6332_v3  ;;  %v327_v5 = vsub.s32 2, %v6332_v3  ;;  %v323_v9 = vsub.s32 1, %v6332_v3  ;;  %v331_v11 = vsub.s32 3, %v6332_v3 }
 0x12f   :  { %v6350_v45 = vsub.s32 %v700_v44, %v6332_v3 }
 0x130   :  { %v324_v18 = vrot.slane %v315_v6, %v323_v9  ;;  %v332_v19 = vrot.slane %v315_v6, %v331_v11 }
 0x1e1   :  { %v247_v30 = vpop.f32.mrb[0].mxu0 }
 0x1e2   :  { %v4322_v35 = vpop.f32.mrb[1].mxu0  ;;  %402 = vmatmul.mubr.f32.vlgmr.msra.gmra.mrb[0].mxu1 %v247_v30  ;;  %473 = vmatmul.mubr.f32.vlgmr.msra.gmra.mrb[2].mxu0 %v247_v30  ;;  %v6260_v30 = vpack.c.bf16 %v530_v15, %v526_v14  ;;  %v320_v14 = vrot.slane %v315_v6, %v319_v4  ;;  %v328_v15 = vrot.slane %v315_v6, %v327_v5 }
 0x1e3   :  { %4531 = vmatpush1.bf16.msra.mxu1 %v6200_v20  ;;  %4563 = vmatpush1.bf16.msra.mxu0 %v6202_v22  ;;  %v6266_v35 = vpack.c.bf16 %v539_v27, %v535_v24 }
 0x1e4   :  { %4533 = vmatprep.subr.bf16.mxu1 %v6204_v25  ;;  %4565 = vmatprep.subr.bf16.mxu0 %v6206_v26 }
 0x1e5   :  { %614 = vmatprep.mubr.f32.mxu1 %v5879_v7  ;;  %685 = vmatprep.mubr.f32.mxu0 %v5879_v7 }
 0x1e7   :  { %4535 = vmatpush1.bf16.msra.mxu1 %v6210_v36  ;;  %4567 = vmatpush1.bf16.msra.mxu0 %v6212_v37 }
 0x1e8   :  { %4537 = vmatprep.subr.bf16.mxu1 %v6216_v40  ;;  %4569 = vmatprep.subr.bf16.mxu0 %v6218_v41 }
 0x1eb   :  { %4539 = vmatpush1.bf16.msra.mxu1 %v6224_v48  ;;  %4571 = vmatpush1.bf16.msra.mxu0 %v6226_v49 }
 0x1ec   :  { %4541 = vmatprep.subr.bf16.mxu1 %v6230_v52  ;;  %4573 = vmatprep.subr.bf16.mxu0 %v6232_v53 }
 0x1ef   :  { %4543 = vmatpush1.bf16.msra.mxu1 %v6236_v60  ;;  %4575 = vmatpush1.bf16.msra.mxu0 %v6238_v61 }
 0x1f0   :  { %4545 = vmatprep.subr.bf16.mxu1 %v6242_v0  ;;  %4577 = vmatprep.subr.bf16.mxu0 %v6244_v2 }
 0x1f3   :  { %4547 = vmatpush1.bf16.msra.mxu1 %v6248_v12  ;;  %4579 = vmatpush1.bf16.msra.mxu0 %v6250_v13 }
 0x1f4   :  { %4549 = vmatprep.subr.bf16.mxu1 %v6254_v16  ;;  %4581 = vmatprep.subr.bf16.mxu0 %v6256_v17 }
 0x1f7   :  { %4551 = vmatpush1.bf16.msra.mxu1 %v6260_v30  ;;  %4583 = vmatpush1.bf16.msra.mxu0 %v6262_v32 }
 0x1f8   :  { %4553 = vmatprep.subr.bf16.mxu1 %v6266_v35  ;;  %4585 = vmatprep.subr.bf16.mxu0 %v6268_v38 }
 0x1fb   :  { %4555 = vmatpush1.bf16.msra.mxu1 %v6272_v47  ;;  %4587 = vmatpush1.bf16.msra.mxu0 %v6274_v50 }
 0x1fc   :  { %4557 = vmatprep.subr.bf16.mxu1 %v6278_v54  ;;  %4589 = vmatprep.subr.bf16.mxu0 %v6280_v55 }
 0x1ff   :  { %4559 = vmatpush1.bf16.msra.mxu1 %v6284_v59  ;;  %4591 = vmatpush1.bf16.msra.mxu0 %v6286_v62 }
 0x200   :  { %4593 = vmatprep.subr.bf16.mxu1 %v6194_v8  ;;  %4625 = vmatprep.subr.bf16.mxu0 %v6196_v10 }
 0x202   :  { %615 = vmatmul.mubr.f32.vlgmr.msra.gmra.mrb[2].mxu1 %v483_v63  ;;  %686 = vmatmul.mubr.f32.vlgmr.msra.gmra.mrb[4].mxu0 %v483_v63 }
 0x203   :  { %4595 = vmatpush1.bf16.msra.mxu1 %v6200_v20  ;;  %4627 = vmatpush1.bf16.msra.mxu0 %v6202_v22 }
 0x204   :  { %4597 = vmatprep.subr.bf16.mxu1 %v6204_v25  ;;  %4629 = vmatprep.subr.bf16.mxu0 %v6206_v26 }
 0x205   :  { %819 = vmatprep.mubr.f32.mxu1 %v5879_v7  ;;  %890 = vmatprep.mubr.f32.mxu0 %v5879_v7 }
 0x207   :  { %4599 = vmatpush1.bf16.msra.mxu1 %v6210_v36  ;;  %4631 = vmatpush1.bf16.msra.mxu0 %v6212_v37 }
 0x208   :  { %4601 = vmatprep.subr.bf16.mxu1 %v6216_v40  ;;  %4633 = vmatprep.subr.bf16.mxu0 %v6218_v41 }
 0x20b   :  { %4603 = vmatpush1.bf16.msra.mxu1 %v6224_v48  ;;  %4635 = vmatpush1.bf16.msra.mxu0 %v6226_v49 }
 0x20c   :  { %4605 = vmatprep.subr.bf16.mxu1 %v6230_v52  ;;  %4637 = vmatprep.subr.bf16.mxu0 %v6232_v53 }
 0x20f   :  { %4607 = vmatpush1.bf16.msra.mxu1 %v6236_v60  ;;  %4639 = vmatpush1.bf16.msra.mxu0 %v6238_v61 }
 0x210   :  { %4609 = vmatprep.subr.bf16.mxu1 %v6242_v0  ;;  %4641 = vmatprep.subr.bf16.mxu0 %v6244_v2 }
 0x213   :  { %4611 = vmatpush1.bf16.msra.mxu1 %v6248_v12  ;;  %4643 = vmatpush1.bf16.msra.mxu0 %v6250_v13 }
 0x214   :  { %4613 = vmatprep.subr.bf16.mxu1 %v6254_v16  ;;  %4645 = vmatprep.subr.bf16.mxu0 %v6256_v17 }
 0x217   :  { %4615 = vmatpush1.bf16.msra.mxu1 %v6260_v30  ;;  %4647 = vmatpush1.bf16.msra.mxu0 %v6262_v32 }
 0x218   :  { %4617 = vmatprep.subr.bf16.mxu1 %v6266_v35  ;;  %4649 = vmatprep.subr.bf16.mxu0 %v6268_v38 }
 0x21b   :  { %4619 = vmatpush1.bf16.msra.mxu1 %v6272_v47  ;;  %4651 = vmatpush1.bf16.msra.mxu0 %v6274_v50 }
 0x21c   :  { %4621 = vmatprep.subr.bf16.mxu1 %v6278_v54  ;;  %4653 = vmatprep.subr.bf16.mxu0 %v6280_v55 }
 0x21f   :  { %4623 = vmatpush1.bf16.msra.mxu1 %v6284_v59  ;;  %4655 = vmatpush1.bf16.msra.mxu0 %v6286_v62 }
 0x220   :  { %4657 = vmatprep.subr.bf16.mxu1 %v6194_v8  ;;  %4689 = vmatprep.subr.bf16.mxu0 %v6196_v10 }
 0x2b5   :  { %v403_v23 = vpop.f32.mrb[0].mxu1  ;;  %v474_v24 = vpop.f32.mrb[2].mxu0 }
 0x2b6   :  { %v404_v27 = vadd.f32 %v403_v23, %v320_v14  ;;  %v475_v28 = vadd.f32 %v474_v24, %v328_v15  ;;  %v405_v29 = vpop.f32.mrb[1].mxu1  ;;  %v476_v33 = vpop.f32.mrb[3].mxu0 }
 0x2b7   :  { %v406_v34 = vadd.f32 %v405_v29, %v324_v18  ;;  %v477_v39 = vadd.f32 %v476_v33, %v332_v19 }
 0x2b8   :  { %479 = vst [vmem:[#allocation2] sm:$0xff] %v404_v27  ;;  %481 = vst [vmem:[#allocation2 + $0x10] sm:$0xff] %v475_v28 }
 0x2b9   :  { %480 = vst [vmem:[#allocation2 + $0x8] sm:$0xff] %v406_v34  ;;  %482 = vst [vmem:[#allocation2 + $0x18] sm:$0xff] %v477_v39 }
 0x2c0   :  { %v485_v19 = vld [vmem:[#allocation2] ss:$8 sm:$0xf] }
 0x2d5   :  { %v616_v46 = vpop.f32.mrb[2].mxu1  ;;  %v687_v51 = vpop.f32.mrb[4].mxu0 }
 0x2d6   :  { %v618_v56 = vpop.f32.mrb[3].mxu1  ;;  %v689_v57 = vpop.f32.mrb[5].mxu0 }
 0x2d7   :  { %v696_v58 = vcombine.low %v616_v46, %v618_v56  ;;  %v697_v63 = vcombine.low %v687_v51, %v689_v57  ;;  %v484_v56 = vld [vmem:[%s7145_s3] sm:$0x1] }
 0x2d9   :  { %v704_v6 = vrot.slane %v696_v58, %v6350_v45  ;;  %v711_v14 = vrot.slane %v697_v63, %v6350_v45 }
 0x2db   :  { %v712_v15 = vcombine.low %v704_v6, %v711_v14 }
 0x2dd   :  { %v719_v18 = vrot.slane %v712_v15, %v6350_v45 }
 0x2df   :  { %v721_v23 = vadd.f32 %v719_v18, %v485_v19 }
 0x2e1   :  { %v4174_v24 = vmul.f32 -1.442695, %v721_v23  ;;  %v729_v27 = vrot.slane %v721_v23, 1  ;;  %v740_v29 = vrot.slane %v721_v23, 3  ;;  %v737_v39 = vrot.slane %v721_v23, 2 }
 0x2e3   :  { %5456 = vpow2.f32 %v4174_v24  ;;  %v4175_v28 = vmul.f32 -1.442695, %v729_v27  ;;  %v4176_v33 = vmul.f32 -1.442695, %v740_v29 }
 0x2e5   :  { %5458 = vpow2.f32 %v4175_v28 }
 0x2e6   :  { %5460 = vpow2.f32 %v4176_v33 }
 0x2ed   :  { %v5457_v34 = vpop.eup %5456 }
 0x2ee   :  { %v725_v42 = vadd.f32 1.0, %v5457_v34 }
 0x2ef   :  { %v5459_v43 = vpop.eup %5458 }
 0x2f0   :  { %5462 = vrcp.f32 %v725_v42  ;;  %v734_v44 = vadd.f32 1.0, %v5459_v43  ;;  %v5461_v46 = vpop.eup %5460 }
 0x2f1   :  { %5464 = vtanh.f32 %v737_v39  ;;  %v745_v63 = vadd.f32 1.0, %v5461_v46  ;;  %v754_v46 = vld [vmem:[#allocation2 + $0x1] ss:$8 sm:$0xf] }
 0x2f2   :  { %5466 = vrcp.f32 %v734_v44 }
 0x2f3   :  { %5468 = vrcp.f32 %v745_v63 }
 0x2fa   :  { %v5463_v51 = vpop.eup %5462 }
 0x2fb   :  { %v5465_v57 = vpop.eup %5464 }
 0x2fc   :  { %v5467_v58 = vpop.eup %5466  ;;  %v749_v14 = vmul.f32 %v5465_v57, %v5463_v51 }
 0x2fd   :  { %v748_v6 = vmul.f32 %v5467_v58, %v484_v56  ;;  %v5469_v18 = vpop.eup %5468 }
 0x2ff   :  { %v6358_v15 = vadd.f32 %v749_v14, %v748_v6 }
 0x301   :  { %5470 = vtanh.f32 %v6358_v15 }
 0x30b   :  { %v5471_v19 = vpop.eup %5470 }
 0x30c   :  { %v752_v23 = vmul.f32 %v5471_v19, %v5469_v18 }
 0x30e   :  { %820 = vmatmul.mubr.f32.vlgmr.msra.gmra.mrb[4].mxu1 %v752_v23  ;;  %891 = vmatmul.mubr.f32.vlgmr.msra.gmra.mrb[6].mxu0 %v752_v23 }
 0x30f   :  { %4659 = vmatpush1.bf16.msra.mxu1 %v6200_v20  ;;  %4691 = vmatpush1.bf16.msra.mxu0 %v6202_v22 }
 0x310   :  { %4661 = vmatprep.subr.bf16.mxu1 %v6204_v25  ;;  %4693 = vmatprep.subr.bf16.mxu0 %v6206_v26 }
 0x311   :  { %1024 = vmatprep.mubr.f32.mxu1 %v5879_v7  ;;  %1095 = vmatprep.mubr.f32.mxu0 %v5879_v7 }
 0x313   :  { %4663 = vmatpush1.bf16.msra.mxu1 %v6210_v36  ;;  %4695 = vmatpush1.bf16.msra.mxu0 %v6212_v37 }
 0x314   :  { %4665 = vmatprep.subr.bf16.mxu1 %v6216_v40  ;;  %4697 = vmatprep.subr.bf16.mxu0 %v6218_v41 }
 0x317   :  { %4667 = vmatpush1.bf16.msra.mxu1 %v6224_v48  ;;  %4699 = vmatpush1.bf16.msra.mxu0 %v6226_v49 }
 0x318   :  { %4669 = vmatprep.subr.bf16.mxu1 %v6230_v52  ;;  %4701 = vmatprep.subr.bf16.mxu0 %v6232_v53 }
 0x31b   :  { %4671 = vmatpush1.bf16.msra.mxu1 %v6236_v60  ;;  %4703 = vmatpush1.bf16.msra.mxu0 %v6238_v61 }
 0x31c   :  { %4673 = vmatprep.subr.bf16.mxu1 %v6242_v0  ;;  %4705 = vmatprep.subr.bf16.mxu0 %v6244_v2 }
 0x31f   :  { %4675 = vmatpush1.bf16.msra.mxu1 %v6248_v12  ;;  %4707 = vmatpush1.bf16.msra.mxu0 %v6250_v13 }
 0x320   :  { %4677 = vmatprep.subr.bf16.mxu1 %v6254_v16  ;;  %4709 = vmatprep.subr.bf16.mxu0 %v6256_v17 }
 0x323   :  { %4679 = vmatpush1.bf16.msra.mxu1 %v6260_v30  ;;  %4711 = vmatpush1.bf16.msra.mxu0 %v6262_v32 }
 0x324   :  { %4681 = vmatprep.subr.bf16.mxu1 %v6266_v35  ;;  %4713 = vmatprep.subr.bf16.mxu0 %v6268_v38 }
 0x327   :  { %4683 = vmatpush1.bf16.msra.mxu1 %v6272_v47  ;;  %4715 = vmatpush1.bf16.msra.mxu0 %v6274_v50 }
 0x328   :  { %4685 = vmatprep.subr.bf16.mxu1 %v6278_v54  ;;  %4717 = vmatprep.subr.bf16.mxu0 %v6280_v55 }
 0x32b   :  { %4687 = vmatpush1.bf16.msra.mxu1 %v6284_v59  ;;  %4719 = vmatpush1.bf16.msra.mxu0 %v6286_v62 }
 0x32c   :  { %4721 = vmatprep.subr.bf16.mxu1 %v6194_v8  ;;  %4753 = vmatprep.subr.bf16.mxu0 %v6196_v10 }
 0x3e1   :  { %v821_v24 = vpop.f32.mrb[4].mxu1  ;;  %v892_v27 = vpop.f32.mrb[6].mxu0 }
 0x3e2   :  { %v823_v28 = vpop.f32.mrb[5].mxu1  ;;  %v894_v29 = vpop.f32.mrb[7].mxu0 }
 0x3e3   :  { %v901_v33 = vcombine.low %v821_v24, %v823_v28  ;;  %v902_v34 = vcombine.low %v892_v27, %v894_v29 }
 0x3e5   :  { %v909_v39 = vrot.slane %v901_v33, %v6350_v45  ;;  %v916_v42 = vrot.slane %v902_v34, %v6350_v45 }
 0x3e7   :  { %v917_v43 = vcombine.low %v909_v39, %v916_v42 }
 0x3e9   :  { %v924_v44 = vrot.slane %v917_v43, %v6350_v45 }
 0x3eb   :  { %v926_v51 = vadd.f32 %v924_v44, %v754_v46 }
 0x3ed   :  { %v4177_v56 = vmul.f32 -1.442695, %v926_v51  ;;  %v934_v57 = vrot.slane %v926_v51, 1  ;;  %v945_v63 = vrot.slane %v926_v51, 3  ;;  %v942_v18 = vrot.slane %v926_v51, 2 }
 0x3ef   :  { %5472 = vpow2.f32 %v4177_v56  ;;  %v4178_v58 = vmul.f32 -1.442695, %v934_v57  ;;  %v4179_v6 = vmul.f32 -1.442695, %v945_v63 }
 0x3f1   :  { %5474 = vpow2.f32 %v4178_v58 }
 0x3f2   :  { %5476 = vpow2.f32 %v4179_v6 }
 0x3f9   :  { %v5473_v14 = vpop.eup %5472 }
 0x3fa   :  { %v930_v19 = vadd.f32 1.0, %v5473_v14 }
 0x3fb   :  { %v5475_v23 = vpop.eup %5474 }
 0x3fc   :  { %5478 = vrcp.f32 %v930_v19  ;;  %v939_v24 = vadd.f32 1.0, %v5475_v23  ;;  %v5477_v27 = vpop.eup %5476  ;;  %v959_v23 = vld [vmem:[#allocation2 + $0x2] ss:$8 sm:$0xf] }
 0x3fd   :  { %5480 = vtanh.f32 %v942_v18  ;;  %v950_v34 = vadd.f32 1.0, %v5477_v27 }
 0x3fe   :  { %5482 = vrcp.f32 %v939_v24 }
 0x3ff   :  { %5484 = vrcp.f32 %v950_v34 }
 0x406   :  { %v5479_v28 = vpop.eup %5478 }
 0x407   :  { %v5481_v29 = vpop.eup %5480 }
 0x408   :  { %v5483_v33 = vpop.eup %5482  ;;  %v954_v42 = vmul.f32 %v5481_v29, %v5479_v28 }
 0x409   :  { %v953_v39 = vmul.f32 %v5483_v33, %v6358_v15  ;;  %v5485_v44 = vpop.eup %5484 }
 0x40b   :  { %v6399_v43 = vadd.f32 %v954_v42, %v953_v39 }
 0x40d   :  { %5486 = vtanh.f32 %v6399_v43 }
 0x417   :  { %v5487_v46 = vpop.eup %5486 }
 0x418   :  { %v957_v51 = vmul.f32 %v5487_v46, %v5485_v44 }
 0x41a   :  { %1025 = vmatmul.mubr.f32.vlgmr.msra.gmra.mrb[6].mxu1 %v957_v51  ;;  %1096 = vmatmul.mubr.f32.vlgmr.msra.gmra.mrb[8].mxu0 %v957_v51 }
 0x41b   :  { %4723 = vmatpush1.bf16.msra.mxu1 %v6200_v20  ;;  %4755 = vmatpush1.bf16.msra.mxu0 %v6202_v22 }
 0x41c   :  { %4725 = vmatprep.subr.bf16.mxu1 %v6204_v25  ;;  %4757 = vmatprep.subr.bf16.mxu0 %v6206_v26 }
 0x41d   :  { %1229 = vmatprep.mubr.f32.mxu1 %v5879_v7  ;;  %1300 = vmatprep.mubr.f32.mxu0 %v5879_v7 }
 0x41f   :  { %4727 = vmatpush1.bf16.msra.mxu1 %v6210_v36  ;;  %4759 = vmatpush1.bf16.msra.mxu0 %v6212_v37 }
 0x420   :  { %4729 = vmatprep.subr.bf16.mxu1 %v6216_v40  ;;  %4761 = vmatprep.subr.bf16.mxu0 %v6218_v41 }
 0x423   :  { %4731 = vmatpush1.bf16.msra.mxu1 %v6224_v48  ;;  %4763 = vmatpush1.bf16.msra.mxu0 %v6226_v49 }
 0x424   :  { %4733 = vmatprep.subr.bf16.mxu1 %v6230_v52  ;;  %4765 = vmatprep.subr.bf16.mxu0 %v6232_v53 }
 0x427   :  { %4735 = vmatpush1.bf16.msra.mxu1 %v6236_v60  ;;  %4767 = vmatpush1.bf16.msra.mxu0 %v6238_v61 }
 0x428   :  { %4737 = vmatprep.subr.bf16.mxu1 %v6242_v0  ;;  %4769 = vmatprep.subr.bf16.mxu0 %v6244_v2 }
 0x42b   :  { %4739 = vmatpush1.bf16.msra.mxu1 %v6248_v12  ;;  %4771 = vmatpush1.bf16.msra.mxu0 %v6250_v13 }
 0x42c   :  { %4741 = vmatprep.subr.bf16.mxu1 %v6254_v16  ;;  %4773 = vmatprep.subr.bf16.mxu0 %v6256_v17 }
 0x42f   :  { %4743 = vmatpush1.bf16.msra.mxu1 %v6260_v30  ;;  %4775 = vmatpush1.bf16.msra.mxu0 %v6262_v32 }
 0x430   :  { %4745 = vmatprep.subr.bf16.mxu1 %v6266_v35  ;;  %4777 = vmatprep.subr.bf16.mxu0 %v6268_v38 }
 0x433   :  { %4747 = vmatpush1.bf16.msra.mxu1 %v6272_v47  ;;  %4779 = vmatpush1.bf16.msra.mxu0 %v6274_v50 }
 0x434   :  { %4749 = vmatprep.subr.bf16.mxu1 %v6278_v54  ;;  %4781 = vmatprep.subr.bf16.mxu0 %v6280_v55 }
 0x437   :  { %4751 = vmatpush1.bf16.msra.mxu1 %v6284_v59  ;;  %4783 = vmatpush1.bf16.msra.mxu0 %v6286_v62 }
 0x438   :  { %4785 = vmatprep.subr.bf16.mxu1 %v6194_v8  ;;  %4817 = vmatprep.subr.bf16.mxu0 %v6196_v10 }
 0x4ed   :  { %v1026_v7 = vpop.f32.mrb[6].mxu1  ;;  %v1097_v15 = vpop.f32.mrb[8].mxu0 }
 0x4ee   :  { %v1028_v56 = vpop.f32.mrb[7].mxu1  ;;  %v1099_v57 = vpop.f32.mrb[9].mxu0 }
 0x4ef   :  { %v1106_v58 = vcombine.low %v1026_v7, %v1028_v56  ;;  %v1107_v63 = vcombine.low %v1097_v15, %v1099_v57 }
 0x4f1   :  { %v1114_v6 = vrot.slane %v1106_v58, %v6350_v45  ;;  %v1121_v14 = vrot.slane %v1107_v63, %v6350_v45 }
 0x4f3   :  { %v1122_v18 = vcombine.low %v1114_v6, %v1121_v14 }
 0x4f5   :  { %v1129_v19 = vrot.slane %v1122_v18, %v6350_v45 }
 0x4f7   :  { %v1131_v24 = vadd.f32 %v1129_v19, %v959_v23 }
 0x4f9   :  { %v4180_v27 = vmul.f32 -1.442695, %v1131_v24  ;;  %v1139_v28 = vrot.slane %v1131_v24, 1  ;;  %v1150_v33 = vrot.slane %v1131_v24, 3  ;;  %v1147_v42 = vrot.slane %v1131_v24, 2 }
 0x4fb   :  { %5488 = vpow2.f32 %v4180_v27  ;;  %v4181_v29 = vmul.f32 -1.442695, %v1139_v28  ;;  %v4182_v34 = vmul.f32 -1.442695, %v1150_v33 }
 0x4fd   :  { %5490 = vpow2.f32 %v4181_v29 }
 0x4fe   :  { %5492 = vpow2.f32 %v4182_v34 }
 0x505   :  { %v5489_v39 = vpop.eup %5488 }
 0x506   :  { %v1135_v44 = vadd.f32 1.0, %v5489_v39 }
 0x507   :  { %v5491_v46 = vpop.eup %5490 }
 0x508   :  { %5494 = vrcp.f32 %v1135_v44  ;;  %v1144_v51 = vadd.f32 1.0, %v5491_v46  ;;  %v5493_v7 = vpop.eup %5492 }
 0x509   :  { %5496 = vtanh.f32 %v1147_v42  ;;  %v1155_v58 = vadd.f32 1.0, %v5493_v7 }
 0x50a   :  { %5498 = vrcp.f32 %v1144_v51  ;;  %v1164_v51 = vld [vmem:[#allocation2 + $0x3] ss:$8 sm:$0xf] }
 0x50b   :  { %5500 = vrcp.f32 %v1155_v58 }
 0x512   :  { %v5495_v15 = vpop.eup %5494 }
 0x513   :  { %v5497_v56 = vpop.eup %5496 }
 0x514   :  { %v5499_v57 = vpop.eup %5498  ;;  %v1159_v6 = vmul.f32 %v5497_v56, %v5495_v15 }
 0x515   :  { %v1158_v63 = vmul.f32 %v5499_v57, %v6399_v43  ;;  %v5501_v18 = vpop.eup %5500  ;;  %v6447_v43 = vld [vmem:[#allocation4] sm:$0xff] }
 0x517   :  { %v6440_v14 = vadd.f32 %v1159_v6, %v1158_v63 }
 0x519   :  { %5502 = vtanh.f32 %v6440_v14 }
 0x523   :  { %v5503_v19 = vpop.eup %5502 }
 0x524   :  { %v1162_v23 = vmul.f32 %v5503_v19, %v5501_v18 }
 0x526   :  { %1230 = vmatmul.mubr.f32.vlgmr.msra.gmra.mrb[8].mxu1 %v1162_v23  ;;  %1301 = vmatmul.mubr.f32.vlgmr.msra.gmra.mrb[10].mxu0 %v1162_v23 }
 0x527   :  { %4787 = vmatpush1.bf16.msra.mxu1 %v6200_v20  ;;  %4819 = vmatpush1.bf16.msra.mxu0 %v6202_v22 }
 0x528   :  { %4789 = vmatprep.subr.bf16.mxu1 %v6204_v25  ;;  %4821 = vmatprep.subr.bf16.mxu0 %v6206_v26 }
 0x529   :  { %1434 = vmatprep.mubr.f32.mxu1 %v6447_v43  ;;  %1505 = vmatprep.mubr.f32.mxu0 %v6447_v43 }
 0x52b   :  { %4791 = vmatpush1.bf16.msra.mxu1 %v6210_v36  ;;  %4823 = vmatpush1.bf16.msra.mxu0 %v6212_v37 }
 0x52c   :  { %4793 = vmatprep.subr.bf16.mxu1 %v6216_v40  ;;  %4825 = vmatprep.subr.bf16.mxu0 %v6218_v41 }
 0x52f   :  { %4795 = vmatpush1.bf16.msra.mxu1 %v6224_v48  ;;  %4827 = vmatpush1.bf16.msra.mxu0 %v6226_v49 }
 0x530   :  { %4797 = vmatprep.subr.bf16.mxu1 %v6230_v52  ;;  %4829 = vmatprep.subr.bf16.mxu0 %v6232_v53 }
 0x533   :  { %4799 = vmatpush1.bf16.msra.mxu1 %v6236_v60  ;;  %4831 = vmatpush1.bf16.msra.mxu0 %v6238_v61 }
 0x534   :  { %4801 = vmatprep.subr.bf16.mxu1 %v6242_v0  ;;  %4833 = vmatprep.subr.bf16.mxu0 %v6244_v2 }
 0x537   :  { %4803 = vmatpush1.bf16.msra.mxu1 %v6248_v12  ;;  %4835 = vmatpush1.bf16.msra.mxu0 %v6250_v13 }
 0x538   :  { %4805 = vmatprep.subr.bf16.mxu1 %v6254_v16  ;;  %4837 = vmatprep.subr.bf16.mxu0 %v6256_v17 }
 0x53b   :  { %4807 = vmatpush1.bf16.msra.mxu1 %v6260_v30  ;;  %4839 = vmatpush1.bf16.msra.mxu0 %v6262_v32 }
 0x53c   :  { %4809 = vmatprep.subr.bf16.mxu1 %v6266_v35  ;;  %4841 = vmatprep.subr.bf16.mxu0 %v6268_v38 }
 0x53f   :  { %4811 = vmatpush1.bf16.msra.mxu1 %v6272_v47  ;;  %4843 = vmatpush1.bf16.msra.mxu0 %v6274_v50 }
 0x540   :  { %4813 = vmatprep.subr.bf16.mxu1 %v6278_v54  ;;  %4845 = vmatprep.subr.bf16.mxu0 %v6280_v55 }
 0x543   :  { %4815 = vmatpush1.bf16.msra.mxu1 %v6284_v59  ;;  %4847 = vmatpush1.bf16.msra.mxu0 %v6286_v62 }
 0x544   :  { %4849 = vmatprep.subr.bf16.mxu1 %v6194_v8  ;;  %4881 = vmatprep.subr.bf16.mxu0 %v6196_v10 }
 0x5f9   :  { %v1231_v24 = vpop.f32.mrb[8].mxu1  ;;  %v1302_v27 = vpop.f32.mrb[10].mxu0 }
 0x5fa   :  { %v1233_v28 = vpop.f32.mrb[9].mxu1  ;;  %v1304_v29 = vpop.f32.mrb[11].mxu0 }
 0x5fb   :  { %v1311_v33 = vcombine.low %v1231_v24, %v1233_v28  ;;  %v1312_v34 = vcombine.low %v1302_v27, %v1304_v29 }
 0x5fd   :  { %v1319_v39 = vrot.slane %v1311_v33, %v6350_v45  ;;  %v1326_v42 = vrot.slane %v1312_v34, %v6350_v45 }
 0x5ff   :  { %v1327_v44 = vcombine.low %v1319_v39, %v1326_v42 }
 0x601   :  { %v1334_v46 = vrot.slane %v1327_v44, %v6350_v45 }
 0x603   :  { %v1336_v7 = vadd.f32 %v1334_v46, %v1164_v51 }
 0x605   :  { %v4183_v15 = vmul.f32 -1.442695, %v1336_v7  ;;  %v1344_v56 = vrot.slane %v1336_v7, 1  ;;  %v1355_v10 = vrot.slane %v1336_v7, 3  ;;  %v1352_v63 = vrot.slane %v1336_v7, 2 }
 0x607   :  { %5504 = vpow2.f32 %v4183_v15  ;;  %v4184_v8 = vmul.f32 -1.442695, %v1344_v56  ;;  %v4185_v57 = vmul.f32 -1.442695, %v1355_v10  ;;  %v1899_v15 = vld [vmem:[%s7112_s13] sm:$0xff]  ;;  %v2058_v56 = vld [vmem:[#allocation10] sm:$0xff] }
 0x608   :  { %v1898_v10 = vld [vmem:[%s7146_s2] sm:$0x1]  ;;  %s4131_s2 = sshll.u32 %s5884_s29, 4  ;;  %s4132_s2 = int_to_ptr.vmem [resolvable:$true] %s4131_s2 }
 0x609   :  { %5506 = vpow2.f32 %v4184_v8  ;;  %v2059_v8 = vld [vmem:[#allocation10 + $0x8] sm:$0xff] }
 0x60a   :  { %5508 = vpow2.f32 %v4185_v57  ;;  %v4940_v57 = vpack.c.bf16 %v2059_v8, %v2058_v56  ;;  %v2183_v56 = vld [vmem:[#allocation11 + $0x130] sm:$0xff] }
 0x611   :  { %v5505_v58 = vpop.eup %5504 }
 0x612   :  { %v1340_v6 = vadd.f32 1.0, %v5505_v58  ;;  %v2060_v58 = vld [vmem:[#allocation10 + $0x10] sm:$0xff] }
 0x613   :  { %v5507_v18 = vpop.eup %5506 }
 0x614   :  { %5510 = vrcp.f32 %v1340_v6  ;;  %v1349_v19 = vadd.f32 1.0, %v5507_v18  ;;  %v5509_v23 = vpop.eup %5508  ;;  %v2062_v18 = vld [vmem:[#allocation10 + $0x20] sm:$0xff] }
 0x615   :  { %5512 = vtanh.f32 %v1352_v63  ;;  %v1360_v29 = vadd.f32 1.0, %v5509_v23  ;;  %v2061_v63 = vld [vmem:[#allocation10 + $0x18] sm:$0xff] }
 0x616   :  { %5514 = vrcp.f32 %v1349_v19  ;;  %v4943_v6 = vpack.c.bf16 %v2061_v63, %v2060_v58  ;;  %v2063_v19 = vld [vmem:[#allocation10 + $0x28] sm:$0xff]  ;;  %v2188_v58 = vld [vmem:[#allocation11 + $0x158] sm:$0xff] }
 0x617   :  { %5516 = vrcp.f32 %v1360_v29  ;;  %v4946_v23 = vpack.c.bf16 %v2063_v19, %v2062_v18  ;;  %v2066_v29 = vld [vmem:[#allocation10 + $0x40] sm:$0xff]  ;;  %v2187_v18 = vld [vmem:[#allocation11 + $0x150] sm:$0xff] }
 0x618   :  { %v2191_v19 = vld [vmem:[#allocation11 + $0x170] sm:$0xff] }
 0x61e   :  { %v5511_v24 = vpop.eup %5510 }
 0x61f   :  { %v5513_v27 = vpop.eup %5512 }
 0x620   :  { %v5515_v28 = vpop.eup %5514  ;;  %v1364_v34 = vmul.f32 %v5513_v27, %v5511_v24  ;;  %v2064_v24 = vld [vmem:[#allocation10 + $0x30] sm:$0xff]  ;;  %v2065_v27 = vld [vmem:[#allocation10 + $0x38] sm:$0xff] }
 0x621   :  { %v1363_v33 = vmul.f32 %v5515_v28, %v6440_v14  ;;  %v5517_v42 = vpop.eup %5516  ;;  %v4949_v28 = vpack.c.bf16 %v2065_v27, %v2064_v24  ;;  %v5017_v24 = vpack.c.bf16 %v2191_v19, %v2187_v18  ;;  %v1780_v27 = vld [vmem:[%s7109_s10 + $0x10] sm:$0xff] }
 0x623   :  { %v6483_v39 = vadd.f32 %v1364_v34, %v1363_v33  ;;  %v2067_v33 = vld [vmem:[#allocation10 + $0x48] sm:$0xff] }
 0x624   :  { %v4952_v34 = vpack.c.bf16 %v2067_v33, %v2066_v29  ;;  %v2196_v29 = vld [vmem:[#allocation11 + $0x198] sm:$0xff] }
 0x625   :  { %5518 = vtanh.f32 %v6483_v39 }
 0x62f   :  { %v5519_v44 = vpop.eup %5518 }
 0x630   :  { %v1367_v46 = vmul.f32 %v5519_v44, %v5517_v42  ;;  %v2069_v42 = vld [vmem:[#allocation10 + $0x58] sm:$0xff] }
 0x632   :  { %1435 = vmatmul.mubr.f32.vlgmr.msra.gmra.mrb[10].mxu1 %v1367_v46  ;;  %1506 = vmatmul.mubr.f32.vlgmr.msra.gmra.mrb[12].mxu0 %v1367_v46  ;;  %v2070_v46 = vld [vmem:[#allocation10 + $0x60] sm:$0xff] }
 0x633   :  { %4851 = vmatpush1.bf16.msra.mxu1 %v6200_v20  ;;  %4883 = vmatpush1.bf16.msra.mxu0 %v6202_v22 }
 0x634   :  { %4853 = vmatprep.subr.bf16.mxu1 %v6204_v25  ;;  %4885 = vmatprep.subr.bf16.mxu0 %v6206_v26 }
 0x635   :  { %1639 = vmatprep.mubr.f32.mxu1 %v6447_v43  ;;  %1710 = vmatprep.mubr.f32.mxu0 %v6447_v43 }
 0x637   :  { %4855 = vmatpush1.bf16.msra.mxu1 %v6210_v36  ;;  %4887 = vmatpush1.bf16.msra.mxu0 %v6212_v37 }
 0x638   :  { %4857 = vmatprep.subr.bf16.mxu1 %v6216_v40  ;;  %4889 = vmatprep.subr.bf16.mxu0 %v6218_v41 }
 0x63b   :  { %4859 = vmatpush1.bf16.msra.mxu1 %v6224_v48  ;;  %4891 = vmatpush1.bf16.msra.mxu0 %v6226_v49 }
 0x63c   :  { %4861 = vmatprep.subr.bf16.mxu1 %v6230_v52  ;;  %4893 = vmatprep.subr.bf16.mxu0 %v6232_v53  ;;  %v1369_v52 = vld [vmem:[#allocation2 + $0x4] ss:$8 sm:$0xf] }
 0x63f   :  { %4863 = vmatpush1.bf16.msra.mxu1 %v6236_v60  ;;  %4895 = vmatpush1.bf16.msra.mxu0 %v6238_v61 }
 0x640   :  { %4865 = vmatprep.subr.bf16.mxu1 %v6242_v0  ;;  %4897 = vmatprep.subr.bf16.mxu0 %v6244_v2 }
 0x643   :  { %4867 = vmatpush1.bf16.msra.mxu1 %v6248_v12  ;;  %4899 = vmatpush1.bf16.msra.mxu0 %v6250_v13 }
 0x644   :  { %4869 = vmatprep.subr.bf16.mxu1 %v6254_v16  ;;  %4901 = vmatprep.subr.bf16.mxu0 %v6256_v17 }
 0x647   :  { %4871 = vmatpush1.bf16.msra.mxu1 %v6260_v30  ;;  %4903 = vmatpush1.bf16.msra.mxu0 %v6262_v32 }
 0x648   :  { %4873 = vmatprep.subr.bf16.mxu1 %v6266_v35  ;;  %4905 = vmatprep.subr.bf16.mxu0 %v6268_v38 }
 0x64b   :  { %4875 = vmatpush1.bf16.msra.mxu1 %v6272_v47  ;;  %4907 = vmatpush1.bf16.msra.mxu0 %v6274_v50 }
 0x64c   :  { %4877 = vmatprep.subr.bf16.mxu1 %v6278_v54  ;;  %4909 = vmatprep.subr.bf16.mxu0 %v6280_v55 }
 0x64f   :  { %4879 = vmatpush1.bf16.msra.mxu1 %v6284_v59  ;;  %4911 = vmatpush1.bf16.msra.mxu0 %v6286_v62 }
 0x650   :  { %4358 = vmatprep.subr.mxu0 %v6447_v43  ;;  %4912 = vmatprep.subr.bf16.mxu1 %v5877_v1 }
 0x705   :  { %v1436_v20 = vpop.f32.mrb[10].mxu1  ;;  %v1507_v22 = vpop.f32.mrb[12].mxu0 }
 0x706   :  { %v1438_v25 = vpop.f32.mrb[11].mxu1  ;;  %v1509_v26 = vpop.f32.mrb[13].mxu0 }
 0x707   :  { %v1516_v36 = vcombine.low %v1436_v20, %v1438_v25  ;;  %v1517_v37 = vcombine.low %v1507_v22, %v1509_v26  ;;  %v2071_v20 = vld [vmem:[#allocation10 + $0x68] sm:$0xff]  ;;  %v2072_v25 = vld [vmem:[#allocation10 + $0x70] sm:$0xff]  ;;  %v2073_v26 = vld [vmem:[#allocation10 + $0x78] sm:$0xff] }
 0x708   :  { %v4958_v22 = vpack.c.bf16 %v2071_v20, %v2070_v46  ;;  %v1782_v20 = vld [vmem:[%s7109_s10 + $0x20] sm:$0xff] }
 0x709   :  { %v1524_v40 = vrot.slane %v1516_v36, %v6350_v45  ;;  %v1531_v41 = vrot.slane %v1517_v37, %v6350_v45  ;;  %v4961_v36 = vpack.c.bf16 %v2073_v26, %v2072_v25  ;;  %v2054_v37 = vpop.permute.xlu0 %2053  ;;  %v2204_v25 = vld [vmem:[#allocation11 + $0x1d8] sm:$0xff] }
 0x70a   :  { %vm2055_vm3 = vcmp.eq.s32.totalorder %v6189_v21, %v2054_v37 }
 0x70b   :  { %v1532_v48 = vcombine.low %v1524_v40, %v1531_v41  ;;  %v2148_v40 = vld [vmem:[#allocation11 + $0x18] sm:$0xff] }
 0x70c   :  { %v2152_v41 = vld [vmem:[#allocation11 + $0x38] sm:$0xff] }
 0x70d   :  { %v1539_v49 = vrot.slane %v1532_v48, %v6350_v45  ;;  %v4995_v48 = vpack.c.bf16 %v2152_v41, %v2148_v40  ;;  %v2203_v40 = vld [vmem:[#allocation11 + $0x1d0] sm:$0xff] }
 0x70e   :  { %v2207_v41 = vld [vmem:[#allocation11 + $0x1f0] sm:$0xff] }
 0x70f   :  { %v1541_v53 = vadd.f32 %v1539_v49, %v1369_v52  ;;  %v2147_v49 = vld [vmem:[#allocation11 + $0x10] sm:$0xff] }
 0x710   :  { %v2151_v52 = vld [vmem:[#allocation11 + $0x30] sm:$0xff] }
 0x711   :  { %v4186_v60 = vmul.f32 -1.442695, %v1541_v53  ;;  %v1549_v61 = vrot.slane %v1541_v53, 1  ;;  %v1560_v2 = vrot.slane %v1541_v53, 3  ;;  %v1557_v16 = vrot.slane %v1541_v53, 2 }
 0x712   :  { %v4997_v53 = vpack.c.bf16 %v2151_v52, %v2147_v49  ;;  %v1784_v49 = vld [vmem:[%s7109_s10 + $0x30] sm:$0xff]  ;;  %v1785_v52 = vld [vmem:[%s7109_s10 + $0x38] sm:$0xff] }
 0x713   :  { %5520 = vpow2.f32 %v4186_v60  ;;  %v4187_v0 = vmul.f32 -1.442695, %v1549_v61  ;;  %v4188_v12 = vmul.f32 -1.442695, %v1560_v2  ;;  %v2156_v60 = vld [vmem:[#allocation11 + $0x58] sm:$0xff]  ;;  %v2155_v2 = vld [vmem:[#allocation11 + $0x50] sm:$0xff] }
 0x714   :  { %v2160_v61 = vld [vmem:[#allocation11 + $0x78] sm:$0xff] }
 0x715   :  { %5522 = vpow2.f32 %v4187_v0  ;;  %v4999_v0 = vpack.c.bf16 %v2160_v61, %v2156_v60  ;;  %v1786_v60 = vld [vmem:[%s7109_s10 + $0x40] sm:$0xff]  ;;  %v1787_v61 = vld [vmem:[%s7109_s10 + $0x48] sm:$0xff] }
 0x716   :  { %5524 = vpow2.f32 %v4188_v12  ;;  %v2159_v12 = vld [vmem:[#allocation11 + $0x70] sm:$0xff] }
 0x71d   :  { %v5521_v13 = vpop.eup %5520 }
 0x71e   :  { %v1545_v17 = vadd.f32 1.0, %v5521_v13  ;;  %v5001_v13 = vpack.c.bf16 %v2159_v12, %v2155_v2  ;;  %v1788_v2 = vld [vmem:[%s7109_s10 + $0x50] sm:$0xff]  ;;  %v1789_v12 = vld [vmem:[%s7109_s10 + $0x58] sm:$0xff] }
 0x71f   :  { %v5523_v30 = vpop.eup %5522 }
 0x720   :  { %5526 = vrcp.f32 %v1545_v17  ;;  %v1554_v32 = vadd.f32 1.0, %v5523_v30  ;;  %v5525_v35 = vpop.eup %5524  ;;  %v2163_v30 = vld [vmem:[#allocation11 + $0x90] sm:$0xff] }
 0x721   :  { %5528 = vtanh.f32 %v1557_v16  ;;  %v1565_v54 = vadd.f32 1.0, %v5525_v35  ;;  %v2164_v16 = vld [vmem:[#allocation11 + $0x98] sm:$0xff] }
 0x722   :  { %5530 = vrcp.f32 %v1554_v32  ;;  %v2167_v32 = vld [vmem:[#allocation11 + $0xb0] sm:$0xff] }
 0x723   :  { %5532 = vrcp.f32 %v1565_v54  ;;  %v5005_v35 = vpack.c.bf16 %v2167_v32, %v2163_v30  ;;  %v2171_v54 = vld [vmem:[#allocation11 + $0xd0] sm:$0xff]  ;;  %v1792_v30 = vld [vmem:[%s7109_s10 + $0x70] sm:$0xff] }
 0x724   :  { %v1793_v32 = vld [vmem:[%s7109_s10 + $0x78] sm:$0xff] }
 0x72a   :  { %v5527_v38 = vpop.eup %5526 }
 0x72b   :  { %v5529_v47 = vpop.eup %5528 }
 0x72c   :  { %v5531_v50 = vpop.eup %5530  ;;  %v1569_v59 = vmul.f32 %v5529_v47, %v5527_v38  ;;  %v2172_v38 = vld [vmem:[#allocation11 + $0xd8] sm:$0xff] }
 0x72d   :  { %v1568_v55 = vmul.f32 %v5531_v50, %v6483_v39  ;;  %v5533_v14 = vpop.eup %5532  ;;  %v2068_v39 = vld [vmem:[#allocation10 + $0x50] sm:$0xff]  ;;  %v2176_v47 = vld [vmem:[#allocation11 + $0xf8] sm:$0xff] }
 0x72e   :  { %v4955_v44 = vpack.c.bf16 %v2069_v42, %v2068_v39  ;;  %v5007_v50 = vpack.c.bf16 %v2176_v47, %v2172_v38  ;;  %v2195_v39 = vld [vmem:[#allocation11 + $0x190] sm:$0xff] }
 0x72f   :  { %v6524_v62 = vadd.f32 %v1569_v59, %v1568_v55  ;;  %v2175_v55 = vld [vmem:[#allocation11 + $0xf0] sm:$0xff] }
 0x730   :  { %v5009_v59 = vpack.c.bf16 %v2175_v55, %v2171_v54  ;;  %v2199_v42 = vld [vmem:[#allocation11 + $0x1b0] sm:$0xff] }
 0x731   :  { %5534 = vtanh.f32 %v6524_v62  ;;  %v5021_v46 = vpack.c.bf16 %v2199_v42, %v2195_v39 }
 0x73b   :  { %v5535_v51 = vpop.eup %5534 }
 0x73c   :  { %v1572_v7 = vmul.f32 %v5535_v51, %v5533_v14  ;;  %v2180_v14 = vld [vmem:[#allocation11 + $0x118] sm:$0xff] }
 0x73d   :  { %v2184_v51 = vld [vmem:[#allocation11 + $0x138] sm:$0xff] }
 0x73e   :  { %1640 = vmatmul.mubr.f32.vlgmr.msra.gmra.mrb[12].mxu1 %v1572_v7  ;;  %1711 = vmatmul.mubr.f32.vlgmr.msra.gmra.mrb[14].mxu0 %v1572_v7  ;;  %v5011_v7 = vpack.c.bf16 %v2184_v51, %v2180_v14 }
 0x73f   :  { %4359 = vmatpush3.msra.mxu0 %v1899_v15  ;;  %4360 = vmatprep.mubr.msk.f32.mxu0 %vm5878_vm0, %v6447_v43  ;;  %v2179_v15 = vld [vmem:[#allocation11 + $0x110] sm:$0xff] }
 0x740   :  { %4939 = vmatprep.subr.bf16.mxu0 %v5877_v1  ;;  %4355 = vmatprep.mubr.msk.f32.mxu1 %vm5878_vm0, %v6447_v43  ;;  %v5013_v8 = vpack.c.bf16 %v2183_v56, %v2179_v15 }
 0x742   :  { %4361 = vmatmul.mubr.msk.f32.vlgmr.msra.gmra.mrb[16].mxu0 %vm1900_vm2, %v1898_v10  ;;  %v1778_v10 = vld [vmem:[%s7109_s10] sm:$0xff] }
 0x743   :  { %4941 = vmatpush3.bf16.msra.mxu0 %v4940_v57  ;;  %4402 = vmatprep.mubr.msk.f32.mxu0 %vm5878_vm0, %v6447_v43  ;;  %v1779_v57 = vld [vmem:[%s7109_s10 + $0x8] sm:$0xff] }
 0x744   :  { %4942 = vmatprep.subr.bf16.mxu0 %v5877_v1  ;;  %v4913_v63 = vpack.c.bf16 %v1779_v57, %v1778_v10  ;;  %v1574_v10 = vld [vmem:[#allocation2 + $0x5] ss:$8 sm:$0xf] }
 0x746   :  { %4914 = vmatpush3.bf16.msra.mxu1 %v4913_v63 }
 0x747   :  { %4944 = vmatpush3.bf16.msra.mxu0 %v4943_v6  ;;  %v2192_v6 = vld [vmem:[#allocation11 + $0x178] sm:$0xff]  ;;  %4915 = vmatprep.subr.bf16.mxu1 %v5877_v1 }
 0x748   :  { %4945 = vmatprep.subr.bf16.mxu0 %v5877_v1 }
 0x74b   :  { %4947 = vmatpush3.bf16.msra.mxu0 %v4946_v23  ;;  %v5015_v23 = vpack.c.bf16 %v2192_v6, %v2188_v58 }
 0x74c   :  { %4948 = vmatprep.subr.bf16.mxu0 %v5877_v1 }
 0x74f   :  { %4950 = vmatpush3.bf16.msra.mxu0 %v4949_v28  ;;  %v1781_v28 = vld [vmem:[%s7109_s10 + $0x18] sm:$0xff] }
 0x750   :  { %4951 = vmatprep.subr.bf16.mxu0 %v5877_v1  ;;  %v4916_v33 = vpack.c.bf16 %v1781_v28, %v1780_v27 }
 0x752   :  { %4917 = vmatpush3.bf16.msra.mxu1 %v4916_v33 }
 0x753   :  { %4953 = vmatpush3.bf16.msra.mxu0 %v4952_v34  ;;  %v2200_v34 = vld [vmem:[#allocation11 + $0x1b8] sm:$0xff]  ;;  %4918 = vmatprep.subr.bf16.mxu1 %v5877_v1 }
 0x754   :  { %4954 = vmatprep.subr.bf16.mxu0 %v5877_v1 }
 0x757   :  { %4956 = vmatpush3.bf16.msra.mxu0 %v4955_v44  ;;  %v5019_v44 = vpack.c.bf16 %v2200_v34, %v2196_v29 }
 0x758   :  { %4957 = vmatprep.subr.bf16.mxu0 %v5877_v1 }
 0x75b   :  { %4959 = vmatpush3.bf16.msra.mxu0 %v4958_v22  ;;  %v1783_v22 = vld [vmem:[%s7109_s10 + $0x28] sm:$0xff] }
 0x75c   :  { %4960 = vmatprep.subr.bf16.mxu0 %v5877_v1  ;;  %v4919_v26 = vpack.c.bf16 %v1783_v22, %v1782_v20 }
 0x75e   :  { %4920 = vmatpush3.bf16.msra.mxu1 %v4919_v26 }
 0x75f   :  { %4962 = vmatpush3.bf16.msra.mxu0 %v4961_v36  ;;  %v2208_v36 = vld [vmem:[#allocation11 + $0x1f8] sm:$0xff]  ;;  %4921 = vmatprep.subr.bf16.mxu1 %v5877_v1 }
 0x760   :  { %4996 = vmatprep.subr.bf16.mxu0 %v4995_v48  ;;  %v5023_v37 = vpack.c.bf16 %v2208_v36, %v2204_v25  ;;  %v5025_v48 = vpack.c.bf16 %v2207_v41, %v2203_v40 }
 0x762   :  { %4403 = vmatmul.mubr.msk.f32.vlgmr.msra.gmra.mrb[18].mxu0 %vm2055_vm3, %v5880_v31  ;;  %v2168_v31 = vld [vmem:[#allocation11 + $0xb8] sm:$0xff] }
 0x763   :  { %2366 = vmatprep.mubr.f32.mxu0 %v6447_v43  ;;  %4998 = vmatpush1.bf16.msra.mxu0 %v4997_v53  ;;  %v5003_v17 = vpack.c.bf16 %v2168_v31, %v2164_v16  ;;  %v4922_v53 = vpack.c.bf16 %v1785_v52, %v1784_v49  ;;  %v1790_v16 = vld [vmem:[%s7109_s10 + $0x60] sm:$0xff]  ;;  %v1791_v31 = vld [vmem:[%s7109_s10 + $0x68] sm:$0xff] }
 0x764   :  { %5000 = vmatprep.subr.bf16.mxu0 %v4999_v0  ;;  %v4925_v0 = vpack.c.bf16 %v1787_v61, %v1786_v60 }
 0x765   :  { %4923 = vmatpush3.bf16.msra.mxu1 %v4922_v53 }
 0x766   :  { %4924 = vmatprep.subr.bf16.mxu1 %v5877_v1 }
 0x767   :  { %5002 = vmatpush1.bf16.msra.mxu0 %v5001_v13  ;;  %v4928_v13 = vpack.c.bf16 %v1789_v12, %v1788_v2 }
 0x768   :  { %5004 = vmatprep.subr.bf16.mxu0 %v5003_v17  ;;  %v4931_v17 = vpack.c.bf16 %v1791_v31, %v1790_v16  ;;  %v1896_v16 = vld [vmem:[%s7111_s12] sm:$0xff]  ;;  %v1897_v31 = vld [vmem:[%s7111_s12 + $0x8] sm:$0xff] }
 0x769   :  { %4926 = vmatpush3.bf16.msra.mxu1 %v4925_v0  ;;  %v1794_v0 = vld [vmem:[%s7110_s11] sm:$0x1]  ;;  %s5882_s11 = smov 112  }
 0x76a   :  { %4927 = vmatprep.subr.bf16.mxu1 %v5877_v1 }
 0x76b   :  { %5006 = vmatpush1.bf16.msra.mxu0 %v5005_v35  ;;  %v4934_v35 = vpack.c.bf16 %v1793_v32, %v1792_v30  ;;  %v2146_v30 = vld [vmem:[#allocation11 + $0x8] sm:$0xff] }
 0x76c   :  { %5008 = vmatprep.subr.bf16.mxu0 %v5007_v50  ;;  %v2150_v32 = vld [vmem:[#allocation11 + $0x28] sm:$0xff] }
 0x76d   :  { %4929 = vmatpush3.bf16.msra.mxu1 %v4928_v13 }
 0x76e   :  { %4930 = vmatprep.subr.bf16.mxu1 %v5877_v1 }
 0x76f   :  { %5010 = vmatpush1.bf16.msra.mxu0 %v5009_v59 }
 0x770   :  { %5012 = vmatprep.subr.bf16.mxu0 %v5011_v7 }
 0x771   :  { %4932 = vmatpush3.bf16.msra.mxu1 %v4931_v17  ;;  %v4937_v17 = vpack.c.bf16 %v1897_v31, %v1896_v16  ;;  %v2145_v16 = vld [vmem:[#allocation11] sm:$0xff] }
 0x772   :  { %4933 = vmatprep.subr.bf16.mxu1 %v5877_v1  ;;  %v2149_v31 = vld [vmem:[#allocation11 + $0x20] sm:$0xff] }
 0x773   :  { %5014 = vmatpush1.bf16.msra.mxu0 %v5013_v8 }
 0x774   :  { %5016 = vmatprep.subr.bf16.mxu0 %v5015_v23 }
 0x775   :  { %4935 = vmatpush3.bf16.msra.mxu1 %v4934_v35  ;;  %v4963_v35 = vpack.c.bf16 %v2150_v32, %v2146_v30  ;;  %v2154_v30 = vld [vmem:[#allocation11 + $0x48] sm:$0xff] }
 0x776   :  { %4936 = vmatprep.subr.bf16.mxu1 %v5877_v1  ;;  %v2158_v32 = vld [vmem:[#allocation11 + $0x68] sm:$0xff] }
 0x777   :  { %5018 = vmatpush1.bf16.msra.mxu0 %v5017_v24 }
 0x778   :  { %5020 = vmatprep.subr.bf16.mxu0 %v5019_v44 }
 0x77b   :  { %5022 = vmatpush1.bf16.msra.mxu0 %v5021_v46 }
 0x77c   :  { %5024 = vmatprep.subr.bf16.mxu0 %v5023_v37 }
 0x77f   :  { %5026 = vmatpush1.bf16.msra.mxu0 %v5025_v48  ;;  %v6623_v48 = vld [vmem:[%s7117_s18] sm:$0xf] }
 0x780   :  { %v2226_v49 = vrot.slane %v6623_v48, %v331_v11 }
 0x811   :  { %v1641_v38 = vpop.f32.mrb[12].mxu1  ;;  %v1712_v47 = vpop.f32.mrb[14].mxu0 }
 0x812   :  { %v1643_v50 = vpop.f32.mrb[13].mxu1  ;;  %v1714_v54 = vpop.f32.mrb[15].mxu0 }
 0x813   :  { %v1721_v55 = vcombine.low %v1641_v38, %v1643_v50  ;;  %v1722_v59 = vcombine.low %v1712_v47, %v1714_v54  ;;  %v2381_v54 = vld [vmem:[#allocation13 + $0x18] sm:$0xff] }
 0x815   :  { %v1729_v14 = vrot.slane %v1721_v55, %v6350_v45  ;;  %v1736_v51 = vrot.slane %v1722_v59, %v6350_v45  ;;  %v6608_v7 = vpop.f32.mrb[16].mxu0  ;;  %v2385_v55 = vld [vmem:[#allocation13 + $0x38] sm:$0xff] }
 0x816   :  { %v4362_v15 = vpop.f32.mrb[17].mxu0  ;;  %v6648_v59 = vpack.c.bf16 %v2385_v55, %v2381_v54  ;;  %v2153_v54 = vld [vmem:[#allocation11 + $0x40] sm:$0xff] }
 0x817   :  { %v1737_v56 = vcombine.low %v1729_v14, %v1736_v51  ;;  %v2380_v14 = vld [vmem:[#allocation13 + $0x10] sm:$0xff]  ;;  %v2157_v55 = vld [vmem:[#allocation11 + $0x60] sm:$0xff] }
 0x818   :  { %v2384_v51 = vld [vmem:[#allocation13 + $0x30] sm:$0xff]  ;;  %5060 = vmatprep.subr.bf16.mxu0 %v6648_v59 }
 0x819   :  { %v1744_v8 = vrot.slane %v1737_v56, %v6350_v45  ;;  %v6650_v15 = vpack.c.bf16 %v2384_v51, %v2380_v14  ;;  %v2389_v56 = vld [vmem:[#allocation13 + $0x58] sm:$0xff]  ;;  %v2162_v14 = vld [vmem:[#allocation11 + $0x88] sm:$0xff] }
 0x81a   :  { %v2166_v51 = vld [vmem:[#allocation11 + $0xa8] sm:$0xff] }
 0x81b   :  { %v1746_v57 = vadd.f32 %v1744_v8, %v1574_v10  ;;  %v2393_v8 = vld [vmem:[#allocation13 + $0x78] sm:$0xff] }
 0x81c   :  { %v6653_v10 = vpack.c.bf16 %v2393_v8, %v2389_v56  ;;  %v4969_v56 = vpack.c.bf16 %v2157_v55, %v2153_v54  ;;  %v4971_v8 = vpack.c.bf16 %v2166_v51, %v2162_v14  ;;  %v2383_v54 = vld [vmem:[#allocation13 + $0x28] sm:$0xff]  ;;  %v2378_v51 = vld [vmem:[#allocation13] sm:$0xff] }
 0x81d   :  { %v4189_v58 = vmul.f32 -1.442695, %v1746_v57  ;;  %v1754_v63 = vrot.slane %v1746_v57, 1  ;;  %v1765_v18 = vrot.slane %v1746_v57, 3  ;;  %v1762_v24 = vrot.slane %v1746_v57, 2  ;;  %v2388_v57 = vld [vmem:[#allocation13 + $0x50] sm:$0xff] }
 0x81f   :  { %5536 = vpow2.f32 %v4189_v58  ;;  %v4190_v6 = vmul.f32 -1.442695, %v1754_v63  ;;  %v4191_v19 = vmul.f32 -1.442695, %v1765_v18  ;;  %v2392_v58 = vld [vmem:[#allocation13 + $0x70] sm:$0xff]  ;;  %v2401_v18 = vld [vmem:[#allocation13 + $0xb8] sm:$0xff] }
 0x820   :  { %v6657_v63 = vpack.c.bf16 %v2392_v58, %v2388_v57  ;;  %v2161_v57 = vld [vmem:[#allocation11 + $0x80] sm:$0xff] }
 0x821   :  { %5538 = vpow2.f32 %v4190_v6  ;;  %v2397_v6 = vld [vmem:[#allocation13 + $0x98] sm:$0xff]  ;;  %v2165_v58 = vld [vmem:[#allocation11 + $0xa0] sm:$0xff] }
 0x822   :  { %5540 = vpow2.f32 %v4191_v19  ;;  %v6659_v19 = vpack.c.bf16 %v2401_v18, %v2397_v6  ;;  %v2170_v6 = vld [vmem:[#allocation11 + $0xc8] sm:$0xff] }
 0x823   :  { %v2174_v18 = vld [vmem:[#allocation11 + $0xe8] sm:$0xff] }
 0x829   :  { %v5537_v23 = vpop.eup %5536 }
 0x82a   :  { %v1750_v27 = vadd.f32 1.0, %v5537_v23  ;;  %v2396_v23 = vld [vmem:[#allocation13 + $0x90] sm:$0xff] }
 0x82b   :  { %v5539_v28 = vpop.eup %5538 }
 0x82c   :  { %5542 = vrcp.f32 %v1750_v27  ;;  %v1759_v29 = vadd.f32 1.0, %v5539_v28  ;;  %v5541_v33 = vpop.eup %5540  ;;  %v2405_v28 = vld [vmem:[#allocation13 + $0xd8] sm:$0xff] }
 0x82d   :  { %5544 = vtanh.f32 %v1762_v24  ;;  %v1770_v22 = vadd.f32 1.0, %v5541_v33  ;;  %v2400_v24 = vld [vmem:[#allocation13 + $0xb0] sm:$0xff] }
 0x82e   :  { %5546 = vrcp.f32 %v1759_v29  ;;  %v6663_v27 = vpack.c.bf16 %v2400_v24, %v2396_v23  ;;  %v2409_v29 = vld [vmem:[#allocation13 + $0xf8] sm:$0xff]  ;;  %v4973_v23 = vpack.c.bf16 %v2165_v58, %v2161_v57  ;;  %v4975_v24 = vpack.c.bf16 %v2174_v18, %v2170_v6  ;;  %v2391_v57 = vld [vmem:[#allocation13 + $0x68] sm:$0xff]  ;;  %v2386_v18 = vld [vmem:[#allocation13 + $0x40] sm:$0xff] }
 0x82f   :  { %5548 = vrcp.f32 %v1770_v22  ;;  %v6665_v33 = vpack.c.bf16 %v2409_v29, %v2405_v28  ;;  %v2417_v22 = vld [vmem:[#allocation13 + $0x138] sm:$0xff]  ;;  %v2169_v28 = vld [vmem:[#allocation11 + $0xc0] sm:$0xff] }
 0x830   :  { %v2173_v29 = vld [vmem:[#allocation11 + $0xe0] sm:$0xff] }
 0x835   :  { %v6611_v34 = vpop.f32.mrb[18].mxu0 }
 0x836   :  { %v5543_v39 = vpop.eup %5542  ;;  %v2144_v42 = vmax.f32 %v6611_v34, 0.0  ;;  %v4404_v44 = vpop.f32.mrb[19].mxu0 }
 0x837   :  { %v5545_v46 = vpop.eup %5544  ;;  %v2408_v44 = vld [vmem:[#allocation13 + $0xf0] sm:$0xff] }
 0x838   :  { %v5547_v20 = vpop.eup %5546  ;;  %2367 = vmatmul.mubr.f32.vlgmr.msra.gmra.mrb[20].mxu0 %v2144_v42  ;;  %v1774_v26 = vmul.f32 %v5545_v46, %v5543_v39  ;;  %v2404_v39 = vld [vmem:[#allocation13 + $0xd0] sm:$0xff] }
 0x839   :  { %v1773_v25 = vmul.f32 %v5547_v20, %v6524_v62  ;;  %2577 = vmatprep.mubr.f32.mxu0 %v6447_v43  ;;  %v5549_v37 = vpop.eup %5548  ;;  %v2222_v62 = vrot.slane %v6623_v48, %v327_v5  ;;  %5062 = vmatpush1.bf16.msra.mxu0 %v6650_v15  ;;  %v6669_v46 = vpack.c.bf16 %v2408_v44, %v2404_v39  ;;  %v2413_v20 = vld [vmem:[#allocation13 + $0x118] sm:$0xff]  ;;  %v2178_v39 = vld [vmem:[#allocation11 + $0x108] sm:$0xff] }
 0x83a   :  { %5064 = vmatprep.subr.bf16.mxu0 %v6653_v10  ;;  %v2182_v44 = vld [vmem:[#allocation11 + $0x128] sm:$0xff] }
 0x83b   :  { %v1775_v36 = vadd.f32 %v1774_v26, %v1773_v25  ;;  %v6671_v25 = vpack.c.bf16 %v2417_v22, %v2413_v20  ;;  %v2412_v26 = vld [vmem:[#allocation13 + $0x110] sm:$0xff]  ;;  %v4977_v20 = vpack.c.bf16 %v2173_v29, %v2169_v28  ;;  %v4979_v22 = vpack.c.bf16 %v2182_v44, %v2178_v39  ;;  %v2399_v28 = vld [vmem:[#allocation13 + $0xa8] sm:$0xff]  ;;  %v6707_v39 = vld [vmem:[#allocation4] sm:$0xff] }
 0x83d   :  { %5550 = vtanh.f32 %v1775_v36  ;;  %5066 = vmatpush1.bf16.msra.mxu0 %v6657_v63  ;;  %v2416_v36 = vld [vmem:[#allocation13 + $0x130] sm:$0xff] }
 0x83e   :  { %5068 = vmatprep.subr.bf16.mxu0 %v6659_v19 }
 0x841   :  { %5070 = vmatpush1.bf16.msra.mxu0 %v6663_v27 }
 0x842   :  { %5072 = vmatprep.subr.bf16.mxu0 %v6665_v33 }
 0x845   :  { %5074 = vmatpush1.bf16.msra.mxu0 %v6669_v46 }
 0x846   :  { %5076 = vmatprep.subr.bf16.mxu0 %v6671_v25 }
 0x847   :  { %v5551_v40 = vpop.eup %5550 }
 0x848   :  { %v1777_v41 = vmul.f32 %v5551_v40, %v5549_v37  ;;  %v6675_v37 = vpack.c.bf16 %v2416_v36, %v2412_v26  ;;  %v2421_v40 = vld [vmem:[#allocation13 + $0x158] sm:$0xff]  ;;  %v2177_v26 = vld [vmem:[#allocation11 + $0x100] sm:$0xff]  ;;  %v2186_v36 = vld [vmem:[#allocation11 + $0x148] sm:$0xff] }
 0x84a   :  { %4356 = vmatmul.mubr.f32.vlgmr.msra.gmra.mrb[14].mxu1 %v1777_v41  ;;  %v2425_v41 = vld [vmem:[#allocation13 + $0x178] sm:$0xff]  ;;  %5078 = vmatpush1.bf16.msra.mxu0 %v6675_v37 }
 0x84b   :  { %4367 = vmatprep.mubr.msk.f32.mxu1 %vm5878_vm0, %v6447_v43  ;;  %4938 = vmatpush3.bf16.msra.mxu1 %v4937_v17 }
 0x84c   :  { %4964 = vmatprep.subr.bf16.mxu1 %v4963_v35 }
 0x90b   :  { %v2368_v52 = vpop.f32.mrb[20].mxu0 }
 0x90c   :  { %v2369_v53 = vadd.f32 %v2368_v52, %v2222_v62  ;;  %v2370_v60 = vpop.f32.mrb[21].mxu0  ;;  %v6677_v62 = vpack.c.bf16 %v2425_v41, %v2421_v40  ;;  %v2424_v52 = vld [vmem:[#allocation13 + $0x170] sm:$0xff]  ;;  %v2190_v40 = vld [vmem:[#allocation11 + $0x168] sm:$0xff] }
 0x90d   :  { %v2371_v61 = vadd.f32 %v2370_v60, %v2226_v49  ;;  %v2420_v49 = vld [vmem:[#allocation13 + $0x150] sm:$0xff]  ;;  %v2429_v60 = vld [vmem:[#allocation13 + $0x198] sm:$0xff] }
 0x90e   :  { %2375 = vst [vmem:[#allocation3 + $0x10] sm:$0xff] %v2369_v53  ;;  %5080 = vmatprep.subr.bf16.mxu0 %v6677_v62  ;;  %v6681_v53 = vpack.c.bf16 %v2424_v52, %v2420_v49  ;;  %v4983_v49 = vpack.c.bf16 %v2190_v40, %v2186_v36  ;;  %v2185_v52 = vld [vmem:[#allocation11 + $0x140] sm:$0xff] }
 0x90f   :  { %2376 = vst [vmem:[#allocation3 + $0x18] sm:$0xff] %v2371_v61  ;;  %v2433_v61 = vld [vmem:[#allocation13 + $0x1b8] sm:$0xff]  ;;  %v2402_v36 = vld [vmem:[#allocation13 + $0xc0] sm:$0xff] }
 0x910   :  { %5082 = vmatpush1.bf16.msra.mxu0 %v6681_v53  ;;  %v2406_v40 = vld [vmem:[#allocation13 + $0xe0] sm:$0xff] }
 0x91d   :  { %v1861_v2 = vpop.f32.mrb[14].mxu1 }
 0x91e   :  { %v6634_v12 = vadd.f32 %v1861_v2, %v1794_v0  ;;  %v4357_v13 = vpop.f32.mrb[15].mxu1  ;;  %v6683_v0 = vpack.c.bf16 %v2433_v61, %v2429_v60  ;;  %v2428_v2 = vld [vmem:[#allocation13 + $0x190] sm:$0xff]  ;;  %v2189_v60 = vld [vmem:[#allocation11 + $0x160] sm:$0xff]  ;;  %v2194_v61 = vld [vmem:[#allocation11 + $0x188] sm:$0xff] }
 0x91f   :  { %v2432_v13 = vld [vmem:[#allocation13 + $0x1b0] sm:$0xff] }
 0x920   :  { %v1872_v5 = vmul.f32 0.5, %v6634_v12  ;;  %1866 = vst.msk [vmem:[#allocation17] sm:$0x1] %vm1865_vm4, %v6634_v12  ;;  %5084 = vmatprep.subr.bf16.mxu0 %v6683_v0 }
 0x922   :  { %v1873_v11 = vmul.f32 1.442695, %v1872_v5  ;;  %v6687_v5 = vpack.c.bf16 %v2432_v13, %v2428_v2  ;;  %v2198_v2 = vld [vmem:[#allocation11 + $0x1a8] sm:$0xff]  ;;  %v4985_v13 = vpack.c.bf16 %v2189_v60, %v2185_v52  ;;  %v6720_v52 = vpack.c.bf16 %v2406_v40, %v2402_v36  ;;  %v2048_v40 = vld [vmem:[%s7113_s14] sm:$0x1] }
 0x924   :  { %5552 = vpow2.f32 %v1873_v11  ;;  %5086 = vmatpush1.bf16.msra.mxu0 %v6687_v5  ;;  %v1875_v11 = vld [vmem:[%s7147_s7] sm:$0x1] }
 0x92e   :  { %v5553_v38 = vpop.eup %5552 }
 0x92f   :  { %v1883_v47 = vrot.slane %v5553_v38, %v6350_v45  ;;  %v4965_v38 = vpack.c.bf16 %v2149_v31, %v2145_v16  ;;  %v2193_v16 = vld [vmem:[#allocation11 + $0x180] sm:$0xff] }
 0x930   :  { %v2197_v31 = vld [vmem:[#allocation11 + $0x1a0] sm:$0xff] }
 0x931   :  { %v1890_v50 = vrot.slane %v1883_v47, %v6350_v45 }
 0x933   :  { %1891 = vrot.lane.b32.xlu1 %v1890_v50, %s5882_s11  ;;  %v4967_v50 = vpack.c.bf16 %v2158_v32, %v2154_v30  ;;  %v2206_v30 = vld [vmem:[#allocation11 + $0x1e8] sm:$0xff]  ;;  %v4989_v32 = vpack.c.bf16 %v2197_v31, %v2193_v16 }
 0x9a5   :  { %v1892_v17 = vpop.permute.xlu1 %1891 }
 0x9a6   :  { %v1894_v35 = vmul.f32 %v1892_v17, %v1875_v11  ;;  %v4987_v11 = vpack.c.bf16 %v2198_v2, %v2194_v61  ;;  %v2202_v17 = vld [vmem:[#allocation11 + $0x1c8] sm:$0xff]  ;;  %v2410_v61 = vld [vmem:[#allocation13 + $0x100] sm:$0xff] }
 0x9a7   :  { %v2414_v2 = vld [vmem:[#allocation13 + $0x120] sm:$0xff] }
 0x9a8   :  { %v1895_v47 = vadd.f32 %v1894_v35, %v6634_v12  ;;  %v4991_v35 = vpack.c.bf16 %v2206_v30, %v2202_v17  ;;  %v6726_v16 = vpack.c.bf16 %v2414_v2, %v2410_v61  ;;  %v2418_v17 = vld [vmem:[#allocation13 + $0x140] sm:$0xff]  ;;  %v2218_v2 = vrot.slane %v6623_v48, %v323_v9 }
 0x9a9   :  { %v2422_v30 = vld [vmem:[#allocation13 + $0x160] sm:$0xff] }
 0x9aa   :  { %4368 = vmatmul.mubr.msk.f32.vlgmr.msra.gmra.mrb[16].mxu1 %vm1974_vm5, %v1895_v47  ;;  %v2205_v47 = vld [vmem:[#allocation11 + $0x1e0] sm:$0xff] }
 0x9ab   :  { %4966 = vmatpush1.bf16.msra.mxu1 %v4965_v38  ;;  %2295 = vmatprep.mubr.f32.mxu1 %v6447_v43  ;;  %v2181_v43 = vld [vmem:[#allocation11 + $0x120] sm:$0xff] }
 0x9ac   :  { %4968 = vmatprep.subr.bf16.mxu1 %v4967_v50  ;;  %v4981_v41 = vpack.c.bf16 %v2181_v43, %v2177_v26  ;;  %v2201_v38 = vld [vmem:[#allocation11 + $0x1c0] sm:$0xff]  ;;  %v2379_v50 = vld [vmem:[#allocation13 + $0x8] sm:$0xff] }
 0x9ad   :  { %v4993_v55 = vpack.c.bf16 %v2205_v47, %v2201_v38  ;;  %v6695_v14 = vpack.c.bf16 %v2383_v54, %v2379_v50  ;;  %v2403_v26 = vld [vmem:[#allocation13 + $0xc8] sm:$0xff]  ;;  %v6732_v38 = vpack.c.bf16 %v2422_v30, %v2418_v17  ;;  %v2426_v50 = vld [vmem:[#allocation13 + $0x180] sm:$0xff] }
 0x9ae   :  { %v2407_v43 = vld [vmem:[#allocation13 + $0xe8] sm:$0xff]  ;;  %v2430_v54 = vld [vmem:[#allocation13 + $0x1a0] sm:$0xff] }
 0x9af   :  { %4970 = vmatpush1.bf16.msra.mxu1 %v4969_v56  ;;  %v2382_v56 = vld [vmem:[#allocation13 + $0x20] sm:$0xff] }
 0x9b0   :  { %4972 = vmatprep.subr.bf16.mxu1 %v4971_v8  ;;  %v2387_v8 = vld [vmem:[#allocation13 + $0x48] sm:$0xff]  ;;  %v6697_v58 = vpack.c.bf16 %v2382_v56, %v2378_v51 }
 0x9b1   :  { %v6700_v6 = vpack.c.bf16 %v2391_v57, %v2387_v8  ;;  %v2435_v51 = vld [vmem:[#allocation13 + $0x1c8] sm:$0xff]  ;;  %v2437_v8 = vld [vmem:[#allocation13 + $0x1d8] sm:$0xff] }
 0x9b2   :  { %v2439_v56 = vld [vmem:[#allocation13 + $0x1e8] sm:$0xff] }
 0x9b3   :  { %4974 = vmatpush1.bf16.msra.mxu1 %v4973_v23  ;;  %v2390_v23 = vld [vmem:[#allocation13 + $0x60] sm:$0xff]  ;;  %v6742_v57 = vpack.c.bf16 %v2439_v56, %v2435_v51 }
 0x9b4   :  { %4976 = vmatprep.subr.bf16.mxu1 %v4975_v24  ;;  %v2395_v24 = vld [vmem:[#allocation13 + $0x88] sm:$0xff]  ;;  %v6705_v29 = vpack.c.bf16 %v2390_v23, %v2386_v18  ;;  %v2441_v18 = vld [vmem:[#allocation13 + $0x1f8] sm:$0xff]  ;;  %v2434_v23 = vld [vmem:[#allocation13 + $0x1c0] sm:$0xff] }
 0x9b5   :  { %v6711_v44 = vpack.c.bf16 %v2399_v28, %v2395_v24  ;;  %v2438_v24 = vld [vmem:[#allocation13 + $0x1e0] sm:$0xff]  ;;  %v6744_v28 = vpack.c.bf16 %v2441_v18, %v2437_v8 }
 0x9b7   :  { %4978 = vmatpush1.bf16.msra.mxu1 %v4977_v20  ;;  %v2394_v20 = vld [vmem:[#allocation13 + $0x80] sm:$0xff]  ;;  %5088 = vmatprep.subr.bf16.mxu0 %v6744_v28 }
 0x9b8   :  { %4980 = vmatprep.subr.bf16.mxu1 %v4979_v22  ;;  %v2398_v22 = vld [vmem:[#allocation13 + $0xa0] sm:$0xff] }
 0x9b9   :  { %v6714_v34 = vpack.c.bf16 %v2398_v22, %v2394_v20  ;;  %v6746_v20 = vpack.c.bf16 %v2438_v24, %v2434_v23  ;;  %v2436_v22 = vld [vmem:[#allocation13 + $0x1d0] sm:$0xff] }
 0x9bb   :  { %4982 = vmatpush1.bf16.msra.mxu1 %v4981_v41  ;;  %v2411_v41 = vld [vmem:[#allocation13 + $0x108] sm:$0xff] }
 0x9bc   :  { %4984 = vmatprep.subr.bf16.mxu1 %v4983_v49  ;;  %v2415_v49 = vld [vmem:[#allocation13 + $0x128] sm:$0xff] }
 0x9bd   :  { %v6723_v60 = vpack.c.bf16 %v2415_v49, %v2411_v41 }
 0x9bf   :  { %4986 = vmatpush1.bf16.msra.mxu1 %v4985_v13  ;;  %v2419_v13 = vld [vmem:[#allocation13 + $0x148] sm:$0xff] }
 0x9c0   :  { %4988 = vmatprep.subr.bf16.mxu1 %v4987_v11  ;;  %v2423_v11 = vld [vmem:[#allocation13 + $0x168] sm:$0xff] }
 0x9c1   :  { %v6729_v31 = vpack.c.bf16 %v2423_v11, %v2419_v13 }
 0x9c3   :  { %4990 = vmatpush1.bf16.msra.mxu1 %v4989_v32  ;;  %v2427_v32 = vld [vmem:[#allocation13 + $0x188] sm:$0xff] }
 0x9c4   :  { %4992 = vmatprep.subr.bf16.mxu1 %v4991_v35  ;;  %v2431_v35 = vld [vmem:[#allocation13 + $0x1a8] sm:$0xff] }
 0x9c5   :  { %v6735_v47 = vpack.c.bf16 %v2431_v35, %v2427_v32 }
 0x9c7   :  { %4994 = vmatpush1.bf16.msra.mxu1 %v4993_v55  ;;  %v6738_v55 = vpack.c.bf16 %v2430_v54, %v2426_v50 }
 0x9c8   :  { %5028 = vmatprep.subr.bf16.mxu1 %v6695_v14 }
 0x9ca   :  { %2296 = vmatmul.mubr.f32.vlgmr.msra.gmra.mrb[18].mxu1 %v2144_v42  ;;  %v6717_v42 = vpack.c.bf16 %v2407_v43, %v2403_v26  ;;  %v2440_v26 = vld [vmem:[#allocation13 + $0x1f0] sm:$0xff] }
 0x9cb   :  { %5030 = vmatpush1.bf16.msra.mxu1 %v6697_v58  ;;  %2506 = vmatprep.mubr.f32.mxu1 %v6707_v39  ;;  %v6749_v43 = vpack.c.bf16 %v2440_v26, %v2436_v22 }
 0x9cc   :  { %5032 = vmatprep.subr.bf16.mxu1 %v6700_v6 }
 0x9cd   :  { %5090 = vmatpush1.bf16.msra.mxu0 %v6749_v43 }
 0x9ce   :  { %5124 = vmatprep.subr.bf16.mxu0 %v6648_v59 }
 0x9cf   :  { %5034 = vmatpush1.bf16.msra.mxu1 %v6705_v29 }
 0x9d0   :  { %5036 = vmatprep.subr.bf16.mxu1 %v6711_v44 }
 0x9d3   :  { %5038 = vmatpush1.bf16.msra.mxu1 %v6714_v34 }
 0x9d4   :  { %5040 = vmatprep.subr.bf16.mxu1 %v6717_v42 }
 0x9d7   :  { %5042 = vmatpush1.bf16.msra.mxu1 %v6720_v52 }
 0x9d8   :  { %5044 = vmatprep.subr.bf16.mxu1 %v6723_v60 }
 0x9db   :  { %5046 = vmatpush1.bf16.msra.mxu1 %v6726_v16 }
 0x9dc   :  { %5048 = vmatprep.subr.bf16.mxu1 %v6729_v31 }
 0x9df   :  { %5050 = vmatpush1.bf16.msra.mxu1 %v6732_v38 }
 0x9e0   :  { %5052 = vmatprep.subr.bf16.mxu1 %v6735_v47 }
 0x9e3   :  { %5054 = vmatpush1.bf16.msra.mxu1 %v6738_v55 }
 0x9e4   :  { %5056 = vmatprep.subr.bf16.mxu1 %v6742_v57 }
 0x9e7   :  { %5058 = vmatpush1.bf16.msra.mxu1 %v6746_v20 }
 0x9e8   :  { %5092 = vmatprep.subr.bf16.mxu1 %v6695_v14 }
 0xa7d   :  { %v2044_v36 = vpop.f32.mrb[16].mxu1 }
 0xa7e   :  { %v2045_v41 = vadd.f32 %v2044_v36, %v6608_v7  ;;  %v4369_v49 = vpop.f32.mrb[17].mxu1  ;;  %v2214_v7 = vrot.slane %v6623_v48, %v319_v4 }
 0xa80   :  { %v2049_v61 = vadd.f32 %v2048_v40, %v2045_v41 }
 0xa82   :  { %2507 = vmatmul.mubr.f32.vlgmr.msra.gmra.mrb[20].mxu1 %v2049_v61  ;;  %2578 = vmatmul.mubr.f32.vlgmr.msra.gmra.mrb[22].mxu0 %v2049_v61 }
 0xa83   :  { %5094 = vmatpush1.bf16.msra.mxu1 %v6697_v58  ;;  %5126 = vmatpush1.bf16.msra.mxu0 %v6650_v15 }
 0xa84   :  { %5096 = vmatprep.subr.bf16.mxu1 %v6700_v6  ;;  %5128 = vmatprep.subr.bf16.mxu0 %v6653_v10 }
 0xa85   :  { %2776 = vmatprep.mubr.f32.mxu1 %v6707_v39  ;;  %2847 = vmatprep.mubr.f32.mxu0 %v6707_v39 }
 0xa87   :  { %5098 = vmatpush1.bf16.msra.mxu1 %v6705_v29  ;;  %5130 = vmatpush1.bf16.msra.mxu0 %v6657_v63 }
 0xa88   :  { %5100 = vmatprep.subr.bf16.mxu1 %v6711_v44  ;;  %5132 = vmatprep.subr.bf16.mxu0 %v6659_v19 }
 0xa8b   :  { %5102 = vmatpush1.bf16.msra.mxu1 %v6714_v34  ;;  %5134 = vmatpush1.bf16.msra.mxu0 %v6663_v27 }
 0xa8c   :  { %5104 = vmatprep.subr.bf16.mxu1 %v6717_v42  ;;  %5136 = vmatprep.subr.bf16.mxu0 %v6665_v33 }
 0xa8f   :  { %5106 = vmatpush1.bf16.msra.mxu1 %v6720_v52  ;;  %5138 = vmatpush1.bf16.msra.mxu0 %v6669_v46 }
 0xa90   :  { %5108 = vmatprep.subr.bf16.mxu1 %v6723_v60  ;;  %5140 = vmatprep.subr.bf16.mxu0 %v6671_v25 }
 0xa93   :  { %5110 = vmatpush1.bf16.msra.mxu1 %v6726_v16  ;;  %5142 = vmatpush1.bf16.msra.mxu0 %v6675_v37 }
 0xa94   :  { %5112 = vmatprep.subr.bf16.mxu1 %v6729_v31  ;;  %5144 = vmatprep.subr.bf16.mxu0 %v6677_v62 }
 0xa97   :  { %5114 = vmatpush1.bf16.msra.mxu1 %v6732_v38  ;;  %5146 = vmatpush1.bf16.msra.mxu0 %v6681_v53 }
 0xa98   :  { %5116 = vmatprep.subr.bf16.mxu1 %v6735_v47  ;;  %5148 = vmatprep.subr.bf16.mxu0 %v6683_v0 }
 0xa9b   :  { %5118 = vmatpush1.bf16.msra.mxu1 %v6738_v55  ;;  %5150 = vmatpush1.bf16.msra.mxu0 %v6687_v5 }
 0xa9c   :  { %5120 = vmatprep.subr.bf16.mxu1 %v6742_v57  ;;  %5152 = vmatprep.subr.bf16.mxu0 %v6744_v28 }
 0xa9d   :  { %v2297_v13 = vpop.f32.mrb[18].mxu1 }
 0xa9e   :  { %v2298_v11 = vadd.f32 %v2297_v13, %v2214_v7  ;;  %v2299_v17 = vpop.f32.mrb[19].mxu1 }
 0xa9f   :  { %v2300_v30 = vadd.f32 %v2299_v17, %v2218_v2  ;;  %5122 = vmatpush1.bf16.msra.mxu1 %v6746_v20  ;;  %5154 = vmatpush1.bf16.msra.mxu0 %v6749_v43 }
 0xaa0   :  { %2373 = vst [vmem:[#allocation3] sm:$0xff] %v2298_v11  ;;  %5156 = vmatprep.subr.bf16.mxu1 %v6695_v14  ;;  %5188 = vmatprep.subr.bf16.mxu0 %v6648_v59 }
 0xaa1   :  { %2374 = vst [vmem:[#allocation3 + $0x8] sm:$0xff] %v2300_v30 }
 0xaa8   :  { %v2377_v8 = vld [vmem:[#allocation3] ss:$8 sm:$0xf] }
 0xb55   :  { %v2508_v3 = vpop.f32.mrb[20].mxu1  ;;  %v2579_v4 = vpop.f32.mrb[22].mxu0 }
 0xb56   :  { %v2510_v9 = vpop.f32.mrb[21].mxu1  ;;  %v2581_v48 = vpop.f32.mrb[23].mxu0 }
 0xb57   :  { %v2588_v32 = vcombine.low %v2508_v3, %v2510_v9  ;;  %v2589_v35 = vcombine.low %v2579_v4, %v2581_v48 }
 0xb59   :  { %v2596_v50 = vrot.slane %v2588_v32, %v6350_v45  ;;  %v2603_v54 = vrot.slane %v2589_v35, %v6350_v45 }
 0xb5b   :  { %v2604_v51 = vcombine.low %v2596_v50, %v2603_v54 }
 0xb5d   :  { %v2611_v56 = vrot.slane %v2604_v51, %v6350_v45 }
 0xb5f   :  { %v2613_v18 = vadd.f32 %v2611_v56, %v2377_v8 }
 0xb61   :  { %v4196_v23 = vmul.f32 -1.442695, %v2613_v18  ;;  %v2621_v24 = vrot.slane %v2613_v18, 1  ;;  %v2632_v26 = vrot.slane %v2613_v18, 3  ;;  %v2629_v41 = vrot.slane %v2613_v18, 2 }
 0xb63   :  { %5554 = vpow2.f32 %v4196_v23  ;;  %v4197_v22 = vmul.f32 -1.442695, %v2621_v24  ;;  %v4198_v36 = vmul.f32 -1.442695, %v2632_v26 }
 0xb65   :  { %5556 = vpow2.f32 %v4197_v22 }
 0xb66   :  { %5558 = vpow2.f32 %v4198_v36  ;;  %v2647_v36 = vld [vmem:[#allocation3 + $0x1] ss:$8 sm:$0xf] }
 0xb6d   :  { %v5555_v40 = vpop.eup %5554 }
 0xb6e   :  { %v2617_v49 = vadd.f32 1.0, %v5555_v40 }
 0xb6f   :  { %v5557_v61 = vpop.eup %5556 }
 0xb70   :  { %5560 = vrcp.f32 %v2617_v49  ;;  %v2626_v7 = vadd.f32 1.0, %v5557_v61  ;;  %v5559_v2 = vpop.eup %5558 }
 0xb71   :  { %5562 = vtanh.f32 %v2629_v41  ;;  %v2637_v30 = vadd.f32 1.0, %v5559_v2 }
 0xb72   :  { %5564 = vrcp.f32 %v2626_v7 }
 0xb73   :  { %5566 = vrcp.f32 %v2637_v30 }
 0xb7a   :  { %v5561_v13 = vpop.eup %5560 }
 0xb7b   :  { %v5563_v11 = vpop.eup %5562 }
 0xb7c   :  { %v5565_v17 = vpop.eup %5564  ;;  %v2641_v4 = vmul.f32 %v5563_v11, %v5561_v13 }
 0xb7d   :  { %v2640_v3 = vmul.f32 0.0, %v5565_v17  ;;  %v5567_v48 = vpop.eup %5566 }
 0xb7f   :  { %v6803_v9 = vadd.f32 %v2641_v4, %v2640_v3 }
 0xb81   :  { %5568 = vtanh.f32 %v6803_v9 }
 0xb8b   :  { %v5569_v32 = vpop.eup %5568 }
 0xb8c   :  { %v2644_v35 = vmul.f32 %v5569_v32, %v5567_v48 }
 0xb8e   :  { %2645 = vst [vmem:[#allocation4] sm:$0x1] %v2644_v35  ;;  %2777 = vmatmul.mubr.f32.vlgmr.msra.gmra.mrb[22].mxu1 %v2644_v35  ;;  %2848 = vmatmul.mubr.f32.vlgmr.msra.gmra.mrb[24].mxu0 %v2644_v35 }
 0xb8f   :  { %5158 = vmatpush1.bf16.msra.mxu1 %v6697_v58  ;;  %5190 = vmatpush1.bf16.msra.mxu0 %v6650_v15 }
 0xb90   :  { %5160 = vmatprep.subr.bf16.mxu1 %v6700_v6  ;;  %5192 = vmatprep.subr.bf16.mxu0 %v6653_v10 }
 0xb91   :  { %3046 = vmatprep.mubr.f32.mxu1 %v6707_v39  ;;  %3117 = vmatprep.mubr.f32.mxu0 %v6707_v39 }
 0xb93   :  { %5162 = vmatpush1.bf16.msra.mxu1 %v6705_v29  ;;  %5194 = vmatpush1.bf16.msra.mxu0 %v6657_v63 }
 0xb94   :  { %5164 = vmatprep.subr.bf16.mxu1 %v6711_v44  ;;  %5196 = vmatprep.subr.bf16.mxu0 %v6659_v19 }
 0xb97   :  { %5166 = vmatpush1.bf16.msra.mxu1 %v6714_v34  ;;  %5198 = vmatpush1.bf16.msra.mxu0 %v6663_v27 }
 0xb98   :  { %5168 = vmatprep.subr.bf16.mxu1 %v6717_v42  ;;  %5200 = vmatprep.subr.bf16.mxu0 %v6665_v33 }
 0xb9b   :  { %5170 = vmatpush1.bf16.msra.mxu1 %v6720_v52  ;;  %5202 = vmatpush1.bf16.msra.mxu0 %v6669_v46 }
 0xb9c   :  { %5172 = vmatprep.subr.bf16.mxu1 %v6723_v60  ;;  %5204 = vmatprep.subr.bf16.mxu0 %v6671_v25 }
 0xb9f   :  { %5174 = vmatpush1.bf16.msra.mxu1 %v6726_v16  ;;  %5206 = vmatpush1.bf16.msra.mxu0 %v6675_v37 }
 0xba0   :  { %5176 = vmatprep.subr.bf16.mxu1 %v6729_v31  ;;  %5208 = vmatprep.subr.bf16.mxu0 %v6677_v62 }
 0xba3   :  { %5178 = vmatpush1.bf16.msra.mxu1 %v6732_v38  ;;  %5210 = vmatpush1.bf16.msra.mxu0 %v6681_v53 }
 0xba4   :  { %5180 = vmatprep.subr.bf16.mxu1 %v6735_v47  ;;  %5212 = vmatprep.subr.bf16.mxu0 %v6683_v0 }
 0xba7   :  { %5182 = vmatpush1.bf16.msra.mxu1 %v6738_v55  ;;  %5214 = vmatpush1.bf16.msra.mxu0 %v6687_v5 }
 0xba8   :  { %5184 = vmatprep.subr.bf16.mxu1 %v6742_v57  ;;  %5216 = vmatprep.subr.bf16.mxu0 %v6744_v28 }
 0xbab   :  { %5186 = vmatpush1.bf16.msra.mxu1 %v6746_v20  ;;  %5218 = vmatpush1.bf16.msra.mxu0 %v6749_v43 }
 0xbac   :  { %5220 = vmatprep.subr.bf16.mxu1 %v6695_v14  ;;  %5252 = vmatprep.subr.bf16.mxu0 %v6648_v59 }
 0xc61   :  { %v2778_v50 = vpop.f32.mrb[22].mxu1  ;;  %v2849_v54 = vpop.f32.mrb[24].mxu0 }
 0xc62   :  { %v2780_v51 = vpop.f32.mrb[23].mxu1  ;;  %v2851_v56 = vpop.f32.mrb[25].mxu0 }
 0xc63   :  { %v2858_v8 = vcombine.low %v2778_v50, %v2780_v51  ;;  %v2859_v18 = vcombine.low %v2849_v54, %v2851_v56 }
 0xc65   :  { %v2866_v23 = vrot.slane %v2858_v8, %v6350_v45  ;;  %v2873_v24 = vrot.slane %v2859_v18, %v6350_v45 }
 0xc67   :  { %v2874_v22 = vcombine.low %v2866_v23, %v2873_v24  ;;  %v3459_v24 = vld [vmem:[#allocation13 + $0x8] sm:$0xff] }
 0xc69   :  { %v2881_v26 = vrot.slane %v2874_v22, %v6350_v45  ;;  %v3463_v22 = vld [vmem:[#allocation13 + $0x28] sm:$0xff] }
 0xc6b   :  { %v2883_v40 = vadd.f32 %v2881_v26, %v2647_v36  ;;  %v3461_v26 = vld [vmem:[#allocation13 + $0x18] sm:$0xff]  ;;  %v6888_v36 = vpack.c.bf16 %v3463_v22, %v3459_v24  ;;  %v3499_v24 = vld [vmem:[#allocation13 + $0x148] sm:$0xff] }
 0xc6c   :  { %v3503_v22 = vld [vmem:[#allocation13 + $0x168] sm:$0xff] }
 0xc6d   :  { %v4199_v41 = vmul.f32 -1.442695, %v2883_v40  ;;  %v2891_v49 = vrot.slane %v2883_v40, 1  ;;  %v2902_v59 = vrot.slane %v2883_v40, 3  ;;  %v2899_v2 = vrot.slane %v2883_v40, 2  ;;  %v3465_v40 = vld [vmem:[#allocation13 + $0x38] sm:$0xff] }
 0xc6f   :  { %5570 = vpow2.f32 %v4199_v41  ;;  %v4200_v14 = vmul.f32 -1.442695, %v2891_v49  ;;  %v4201_v61 = vmul.f32 -1.442695, %v2902_v59  ;;  %v3458_v41 = vld [vmem:[#allocation13] sm:$0xff] }
 0xc70   :  { %v3462_v49 = vld [vmem:[#allocation13 + $0x20] sm:$0xff] }
 0xc71   :  { %5572 = vpow2.f32 %v4200_v14  ;;  %v6890_v14 = vpack.c.bf16 %v3465_v40, %v3461_v26  ;;  %v6892_v59 = vpack.c.bf16 %v3462_v49, %v3458_v41  ;;  %v3501_v26 = vld [vmem:[#allocation13 + $0x158] sm:$0xff] }
 0xc72   :  { %5574 = vpow2.f32 %v4201_v61  ;;  %v3460_v61 = vld [vmem:[#allocation13 + $0x10] sm:$0xff]  ;;  %v3505_v40 = vld [vmem:[#allocation13 + $0x178] sm:$0xff] }
 0xc79   :  { %v5571_v7 = vpop.eup %5570 }
 0xc7a   :  { %v2887_v13 = vadd.f32 1.0, %v5571_v7  ;;  %v3464_v7 = vld [vmem:[#allocation13 + $0x30] sm:$0xff] }
 0xc7b   :  { %v5573_v11 = vpop.eup %5572 }
 0xc7c   :  { %5576 = vrcp.f32 %v2887_v13  ;;  %v2896_v17 = vadd.f32 1.0, %v5573_v11  ;;  %v5575_v30 = vpop.eup %5574  ;;  %v3467_v13 = vld [vmem:[#allocation13 + $0x48] sm:$0xff] }
 0xc7d   :  { %5578 = vtanh.f32 %v2899_v2  ;;  %v2907_v32 = vadd.f32 1.0, %v5575_v30  ;;  %v6895_v2 = vpack.c.bf16 %v3464_v7, %v3460_v61  ;;  %v3471_v11 = vld [vmem:[#allocation13 + $0x68] sm:$0xff]  ;;  %v6945_v61 = vpack.c.bf16 %v3503_v22, %v3499_v24  ;;  %v3498_v7 = vld [vmem:[#allocation13 + $0x140] sm:$0xff] }
 0xc7e   :  { %5580 = vrcp.f32 %v2896_v17  ;;  %v3469_v17 = vld [vmem:[#allocation13 + $0x58] sm:$0xff]  ;;  %v6900_v30 = vpack.c.bf16 %v3471_v11, %v3467_v13  ;;  %v3502_v13 = vld [vmem:[#allocation13 + $0x160] sm:$0xff]  ;;  %v3500_v11 = vld [vmem:[#allocation13 + $0x150] sm:$0xff] }
 0xc7f   :  { %5582 = vrcp.f32 %v2907_v32 }
 0xc86   :  { %v5577_v3 = vpop.eup %5576 }
 0xc87   :  { %v5579_v4 = vpop.eup %5578 }
 0xc88   :  { %v5581_v48 = vpop.eup %5580  ;;  %v2911_v50 = vmul.f32 %v5579_v4, %v5577_v3  ;;  %v3473_v3 = vld [vmem:[#allocation13 + $0x78] sm:$0xff]  ;;  %v3466_v4 = vld [vmem:[#allocation13 + $0x40] sm:$0xff] }
 0xc89   :  { %v2910_v35 = vmul.f32 %v5581_v48, %v6803_v9  ;;  %v5583_v51 = vpop.eup %5582  ;;  %v3470_v48 = vld [vmem:[#allocation13 + $0x60] sm:$0xff]  ;;  %v6902_v32 = vpack.c.bf16 %v3473_v3, %v3469_v17  ;;  %v6948_v17 = vpack.c.bf16 %v3505_v40, %v3501_v26  ;;  %v3504_v3 = vld [vmem:[#allocation13 + $0x170] sm:$0xff] }
 0xc8b   :  { %v6844_v54 = vadd.f32 %v2911_v50, %v2910_v35  ;;  %v6904_v35 = vpack.c.bf16 %v3470_v48, %v3466_v4  ;;  %v3468_v50 = vld [vmem:[#allocation13 + $0x50] sm:$0xff]  ;;  %v3507_v4 = vld [vmem:[#allocation13 + $0x188] sm:$0xff] }
 0xc8c   :  { %v3511_v48 = vld [vmem:[#allocation13 + $0x1a8] sm:$0xff] }
 0xc8d   :  { %5584 = vtanh.f32 %v6844_v54 }
 0xc97   :  { %v5585_v56 = vpop.eup %5584 }
 0xc98   :  { %v2914_v8 = vmul.f32 %v5585_v56, %v5583_v51  ;;  %v3475_v51 = vld [vmem:[#allocation13 + $0x88] sm:$0xff] }
 0xc9a   :  { %2915 = vst [vmem:[#allocation4 + $0x1] sm:$0x1] %v2914_v8  ;;  %3047 = vmatmul.mubr.f32.vlgmr.msra.gmra.mrb[24].mxu1 %v2914_v8  ;;  %3118 = vmatmul.mubr.f32.vlgmr.msra.gmra.mrb[26].mxu0 %v2914_v8  ;;  %v3479_v8 = vld [vmem:[#allocation13 + $0xa8] sm:$0xff] }
 0xc9b   :  { %5222 = vmatpush1.bf16.msra.mxu1 %v6697_v58  ;;  %5254 = vmatpush1.bf16.msra.mxu0 %v6650_v15 }
 0xc9c   :  { %5224 = vmatprep.subr.bf16.mxu1 %v6700_v6  ;;  %5256 = vmatprep.subr.bf16.mxu0 %v6653_v10 }
 0xc9d   :  { %3316 = vmatprep.mubr.f32.mxu1 %v6707_v39  ;;  %3387 = vmatprep.mubr.f32.mxu0 %v6707_v39 }
 0xc9f   :  { %5226 = vmatpush1.bf16.msra.mxu1 %v6705_v29  ;;  %5258 = vmatpush1.bf16.msra.mxu0 %v6657_v63 }
 0xca0   :  { %5228 = vmatprep.subr.bf16.mxu1 %v6711_v44  ;;  %5260 = vmatprep.subr.bf16.mxu0 %v6659_v19 }
 0xca3   :  { %5230 = vmatpush1.bf16.msra.mxu1 %v6714_v34  ;;  %5262 = vmatpush1.bf16.msra.mxu0 %v6663_v27 }
 0xca4   :  { %5232 = vmatprep.subr.bf16.mxu1 %v6717_v42  ;;  %5264 = vmatprep.subr.bf16.mxu0 %v6665_v33 }
 0xca7   :  { %5234 = vmatpush1.bf16.msra.mxu1 %v6720_v52  ;;  %5266 = vmatpush1.bf16.msra.mxu0 %v6669_v46 }
 0xca8   :  { %5236 = vmatprep.subr.bf16.mxu1 %v6723_v60  ;;  %5268 = vmatprep.subr.bf16.mxu0 %v6671_v25 }
 0xcab   :  { %5238 = vmatpush1.bf16.msra.mxu1 %v6726_v16  ;;  %5270 = vmatpush1.bf16.msra.mxu0 %v6675_v37 }
 0xcac   :  { %5240 = vmatprep.subr.bf16.mxu1 %v6729_v31  ;;  %5272 = vmatprep.subr.bf16.mxu0 %v6677_v62 }
 0xcaf   :  { %5242 = vmatpush1.bf16.msra.mxu1 %v6732_v38  ;;  %5274 = vmatpush1.bf16.msra.mxu0 %v6681_v53  ;;  %v2917_v53 = vld [vmem:[#allocation3 + $0x2] ss:$8 sm:$0xf] }
 0xcb0   :  { %5244 = vmatprep.subr.bf16.mxu1 %v6735_v47  ;;  %5276 = vmatprep.subr.bf16.mxu0 %v6683_v0 }
 0xcb3   :  { %5246 = vmatpush1.bf16.msra.mxu1 %v6738_v55  ;;  %5278 = vmatpush1.bf16.msra.mxu0 %v6687_v5 }
 0xcb4   :  { %5248 = vmatprep.subr.bf16.mxu1 %v6742_v57  ;;  %5280 = vmatprep.subr.bf16.mxu0 %v6744_v28 }
 0xcb7   :  { %5250 = vmatpush1.bf16.msra.mxu1 %v6746_v20  ;;  %5282 = vmatpush1.bf16.msra.mxu0 %v6749_v43 }
 0xcb8   :  { %5284 = vmatprep.subr.bf16.mxu1 %v6888_v36  ;;  %5316 = vmatprep.subr.bf16.mxu0 %v6890_v14 }
 0xd6d   :  { %v3048_v15 = vpop.f32.mrb[24].mxu1  ;;  %v3119_v10 = vpop.f32.mrb[26].mxu0 }
 0xd6e   :  { %v3050_v63 = vpop.f32.mrb[25].mxu1  ;;  %v3121_v19 = vpop.f32.mrb[27].mxu0 }
 0xd6f   :  { %v3128_v27 = vcombine.low %v3048_v15, %v3050_v63  ;;  %v3129_v33 = vcombine.low %v3119_v10, %v3121_v19  ;;  %v3477_v15 = vld [vmem:[#allocation13 + $0x98] sm:$0xff]  ;;  %v6911_v63 = vpack.c.bf16 %v3479_v8, %v3475_v51  ;;  %v6951_v51 = vpack.c.bf16 %v3502_v13, %v3498_v7 }
 0xd70   :  { %v3481_v10 = vld [vmem:[#allocation13 + $0xb8] sm:$0xff]  ;;  %v6955_v8 = vpack.c.bf16 %v3504_v3, %v3500_v11 }
 0xd71   :  { %v3136_v46 = vrot.slane %v3128_v27, %v6350_v45  ;;  %v3143_v25 = vrot.slane %v3129_v33, %v6350_v45  ;;  %v6913_v19 = vpack.c.bf16 %v3481_v10, %v3477_v15  ;;  %v3474_v27 = vld [vmem:[#allocation13 + $0x80] sm:$0xff]  ;;  %v6957_v15 = vpack.c.bf16 %v3511_v48, %v3507_v4 }
 0xd72   :  { %v3478_v33 = vld [vmem:[#allocation13 + $0xa0] sm:$0xff] }
 0xd73   :  { %v3144_v37 = vcombine.low %v3136_v46, %v3143_v25  ;;  %v3476_v46 = vld [vmem:[#allocation13 + $0x90] sm:$0xff]  ;;  %v6916_v25 = vpack.c.bf16 %v3478_v33, %v3474_v27  ;;  %v3506_v10 = vld [vmem:[#allocation13 + $0x180] sm:$0xff] }
 0xd74   :  { %v3510_v27 = vld [vmem:[#allocation13 + $0x1a0] sm:$0xff]  ;;  %v3508_v33 = vld [vmem:[#allocation13 + $0x190] sm:$0xff] }
 0xd75   :  { %v3151_v62 = vrot.slane %v3144_v37, %v6350_v45  ;;  %v3480_v37 = vld [vmem:[#allocation13 + $0xb0] sm:$0xff] }
 0xd76   :  { %v3187_v4 = vld [vmem:[#allocation3 + $0x3] ss:$8 sm:$0xf] }
 0xd77   :  { %v3153_v0 = vadd.f32 %v3151_v62, %v2917_v53  ;;  %v3483_v62 = vld [vmem:[#allocation13 + $0xc8] sm:$0xff] }
 0xd78   :  { %v3487_v53 = vld [vmem:[#allocation13 + $0xe8] sm:$0xff] }
 0xd79   :  { %v4202_v5 = vmul.f32 -1.442695, %v3153_v0  ;;  %v3161_v58 = vrot.slane %v3153_v0, 1  ;;  %v3172_v29 = vrot.slane %v3153_v0, 3  ;;  %v3169_v42 = vrot.slane %v3153_v0, 2 }
 0xd7a   :  { %v6920_v0 = vpack.c.bf16 %v3480_v37, %v3476_v46  ;;  %v3512_v37 = vld [vmem:[#allocation13 + $0x1b0] sm:$0xff] }
 0xd7b   :  { %5586 = vpow2.f32 %v4202_v5  ;;  %v4203_v6 = vmul.f32 -1.442695, %v3161_v58  ;;  %v4204_v44 = vmul.f32 -1.442695, %v3172_v29  ;;  %v6922_v5 = vpack.c.bf16 %v3487_v53, %v3483_v62  ;;  %v3485_v58 = vld [vmem:[#allocation13 + $0xd8] sm:$0xff]  ;;  %v3482_v29 = vld [vmem:[#allocation13 + $0xc0] sm:$0xff] }
 0xd7c   :  { %v3515_v62 = vld [vmem:[#allocation13 + $0x1c8] sm:$0xff] }
 0xd7d   :  { %5588 = vpow2.f32 %v4203_v6  ;;  %v3489_v6 = vld [vmem:[#allocation13 + $0xf8] sm:$0xff]  ;;  %v3519_v53 = vld [vmem:[#allocation13 + $0x1e8] sm:$0xff] }
 0xd7e   :  { %5590 = vpow2.f32 %v4204_v44  ;;  %v6924_v44 = vpack.c.bf16 %v3489_v6, %v3485_v58  ;;  %v3517_v58 = vld [vmem:[#allocation13 + $0x1d8] sm:$0xff] }
 0xd7f   :  { %v3521_v6 = vld [vmem:[#allocation13 + $0x1f8] sm:$0xff] }
 0xd85   :  { %v5587_v34 = vpop.eup %5586 }
 0xd86   :  { %v3157_v52 = vadd.f32 1.0, %v5587_v34  ;;  %v3486_v34 = vld [vmem:[#allocation13 + $0xe0] sm:$0xff] }
 0xd87   :  { %v5589_v60 = vpop.eup %5588 }
 0xd88   :  { %5592 = vrcp.f32 %v3157_v52  ;;  %v3166_v16 = vadd.f32 1.0, %v5589_v60  ;;  %v5591_v31 = vpop.eup %5590  ;;  %v3488_v52 = vld [vmem:[#allocation13 + $0xf0] sm:$0xff]  ;;  %v6927_v60 = vpack.c.bf16 %v3486_v34, %v3482_v29  ;;  %v6963_v29 = vpack.c.bf16 %v3510_v27, %v3506_v10 }
 0xd89   :  { %5594 = vtanh.f32 %v3169_v42  ;;  %v3177_v57 = vadd.f32 1.0, %v5591_v31  ;;  %v3484_v42 = vld [vmem:[#allocation13 + $0xd0] sm:$0xff]  ;;  %v3495_v31 = vld [vmem:[#allocation13 + $0x128] sm:$0xff]  ;;  %v6967_v34 = vpack.c.bf16 %v3512_v37, %v3508_v33 }
 0xd8a   :  { %5596 = vrcp.f32 %v3166_v16  ;;  %v3491_v16 = vld [vmem:[#allocation13 + $0x108] sm:$0xff] }
 0xd8b   :  { %5598 = vrcp.f32 %v3177_v57  ;;  %v3497_v57 = vld [vmem:[#allocation13 + $0x138] sm:$0xff] }
 0xd92   :  { %v5593_v38 = vpop.eup %5592 }
 0xd93   :  { %v5595_v47 = vpop.eup %5594 }
 0xd94   :  { %v5597_v55 = vpop.eup %5596  ;;  %v3181_v20 = vmul.f32 %v5595_v47, %v5593_v38  ;;  %v3493_v38 = vld [vmem:[#allocation13 + $0x118] sm:$0xff]  ;;  %v6931_v47 = vpack.c.bf16 %v3488_v52, %v3484_v42  ;;  %v6969_v42 = vpack.c.bf16 %v3519_v53, %v3515_v62  ;;  %v3514_v52 = vld [vmem:[#allocation13 + $0x1c0] sm:$0xff] }
 0xd95   :  { %v3180_v28 = vmul.f32 %v5597_v55, %v6844_v54  ;;  %v5599_v9 = vpop.eup %5598  ;;  %v3472_v54 = vld [vmem:[#allocation13 + $0x70] sm:$0xff]  ;;  %v6933_v55 = vpack.c.bf16 %v3495_v31, %v3491_v16  ;;  %v3518_v16 = vld [vmem:[#allocation13 + $0x1e0] sm:$0xff]  ;;  %v6972_v31 = vpack.c.bf16 %v3521_v6, %v3517_v58 }
 0xd96   :  { %v6907_v56 = vpack.c.bf16 %v3472_v54, %v3468_v50  ;;  %v3509_v50 = vld [vmem:[#allocation13 + $0x198] sm:$0xff] }
 0xd97   :  { %v6883_v43 = vadd.f32 %v3181_v20, %v3180_v28  ;;  %v3490_v28 = vld [vmem:[#allocation13 + $0x100] sm:$0xff]  ;;  %v3513_v54 = vld [vmem:[#allocation13 + $0x1b8] sm:$0xff] }
 0xd98   :  { %v3494_v20 = vld [vmem:[#allocation13 + $0x120] sm:$0xff]  ;;  %v6960_v46 = vpack.c.bf16 %v3513_v54, %v3509_v50 }
 0xd99   :  { %5600 = vtanh.f32 %v6883_v43  ;;  %v6939_v41 = vpack.c.bf16 %v3494_v20, %v3490_v28  ;;  %v6975_v28 = vpack.c.bf16 %v3518_v16, %v3514_v52 }
 0xda3   :  { %v5601_v18 = vpop.eup %5600 }
 0xda4   :  { %v3184_v23 = vmul.f32 %v5601_v18, %v5599_v9  ;;  %v6936_v9 = vpack.c.bf16 %v3497_v57, %v3493_v38  ;;  %v3492_v18 = vld [vmem:[#allocation13 + $0x110] sm:$0xff] }
 0xda5   :  { %v3516_v38 = vld [vmem:[#allocation13 + $0x1d0] sm:$0xff] }
 0xda6   :  { %3185 = vst [vmem:[#allocation4 + $0x2] sm:$0x1] %v3184_v23  ;;  %3317 = vmatmul.mubr.f32.vlgmr.msra.gmra.mrb[26].mxu1 %v3184_v23  ;;  %3388 = vmatmul.mubr.f32.vlgmr.msra.gmra.mrb[28].mxu0 %v3184_v23  ;;  %v3496_v23 = vld [vmem:[#allocation13 + $0x130] sm:$0xff] }
 0xda7   :  { %3586 = vmatprep.mubr.f32.mxu1 %v6707_v39  ;;  %3657 = vmatprep.mubr.f32.mxu0 %v6707_v39  ;;  %v6943_v49 = vpack.c.bf16 %v3496_v23, %v3492_v18  ;;  %v3520_v57 = vld [vmem:[#allocation13 + $0x1f0] sm:$0xff] }
 0xda8   :  { %5286 = vmatpush1.bf16.msra.mxu1 %v6892_v59  ;;  %5318 = vmatpush1.bf16.msra.mxu0 %v6895_v2  ;;  %v6979_v20 = vpack.c.bf16 %v3520_v57, %v3516_v38 }
 0xda9   :  { %5288 = vmatprep.subr.bf16.mxu1 %v6900_v30  ;;  %5320 = vmatprep.subr.bf16.mxu0 %v6902_v32 }
 0xdac   :  { %5290 = vmatpush1.bf16.msra.mxu1 %v6904_v35  ;;  %5322 = vmatpush1.bf16.msra.mxu0 %v6907_v56 }
 0xdad   :  { %5292 = vmatprep.subr.bf16.mxu1 %v6911_v63  ;;  %5324 = vmatprep.subr.bf16.mxu0 %v6913_v19 }
 0xdb0   :  { %5294 = vmatpush1.bf16.msra.mxu1 %v6916_v25  ;;  %5326 = vmatpush1.bf16.msra.mxu0 %v6920_v0 }
 0xdb1   :  { %5296 = vmatprep.subr.bf16.mxu1 %v6922_v5  ;;  %5328 = vmatprep.subr.bf16.mxu0 %v6924_v44 }
 0xdb4   :  { %5298 = vmatpush1.bf16.msra.mxu1 %v6927_v60  ;;  %5330 = vmatpush1.bf16.msra.mxu0 %v6931_v47 }
 0xdb5   :  { %5300 = vmatprep.subr.bf16.mxu1 %v6933_v55  ;;  %5332 = vmatprep.subr.bf16.mxu0 %v6936_v9 }
 0xdb8   :  { %5302 = vmatpush1.bf16.msra.mxu1 %v6939_v41  ;;  %5334 = vmatpush1.bf16.msra.mxu0 %v6943_v49 }
 0xdb9   :  { %5304 = vmatprep.subr.bf16.mxu1 %v6945_v61  ;;  %5336 = vmatprep.subr.bf16.mxu0 %v6948_v17 }
 0xdbc   :  { %5306 = vmatpush1.bf16.msra.mxu1 %v6951_v51  ;;  %5338 = vmatpush1.bf16.msra.mxu0 %v6955_v8 }
 0xdbd   :  { %5308 = vmatprep.subr.bf16.mxu1 %v6957_v15  ;;  %5340 = vmatprep.subr.bf16.mxu0 %v6960_v46 }
 0xdc0   :  { %5310 = vmatpush1.bf16.msra.mxu1 %v6963_v29  ;;  %5342 = vmatpush1.bf16.msra.mxu0 %v6967_v34 }
 0xdc1   :  { %5312 = vmatprep.subr.bf16.mxu1 %v6969_v42  ;;  %5344 = vmatprep.subr.bf16.mxu0 %v6972_v31 }
 0xdc4   :  { %5314 = vmatpush1.bf16.msra.mxu1 %v6975_v28  ;;  %5346 = vmatpush1.bf16.msra.mxu0 %v6979_v20 }
 0xdc5   :  { %5348 = vmatprep.subr.bf16.mxu1 %v6888_v36  ;;  %5380 = vmatprep.subr.bf16.mxu0 %v6890_v14 }
 0xe79   :  { %v3318_v18 = vpop.f32.mrb[26].mxu1  ;;  %v3389_v23 = vpop.f32.mrb[28].mxu0 }
 0xe7a   :  { %v3320_v24 = vpop.f32.mrb[27].mxu1  ;;  %v3391_v22 = vpop.f32.mrb[29].mxu0 }
 0xe7b   :  { %v3398_v26 = vcombine.low %v3318_v18, %v3320_v24  ;;  %v3399_v40 = vcombine.low %v3389_v23, %v3391_v22 }
 0xe7d   :  { %v3406_v7 = vrot.slane %v3398_v26, %v6350_v45  ;;  %v3413_v13 = vrot.slane %v3399_v40, %v6350_v45 }
 0xe7f   :  { %v3414_v11 = vcombine.low %v3406_v7, %v3413_v13  ;;  %v3997_v13 = vld [vmem:[#allocation14] sm:$0xff] }
 0xe81   :  { %v3421_v3 = vrot.slane %v3414_v11, %v6350_v45  ;;  %v3998_v11 = vld [vmem:[#allocation14 + $0x8] sm:$0xff] }
 0xe83   :  { %v3423_v48 = vadd.f32 %v3421_v3, %v3187_v4  ;;  %v5412_v3 = vpack.c.bf16 %v3998_v11, %v3997_v13  ;;  %v3999_v4 = vld [vmem:[#allocation14 + $0x10] sm:$0xff] }
 0xe85   :  { %v4205_v50 = vmul.f32 -1.442695, %v3423_v48  ;;  %v3431_v54 = vrot.slane %v3423_v48, 1  ;;  %v3442_v14 = vrot.slane %v3423_v48, 3  ;;  %v3439_v33 = vrot.slane %v3423_v48, 2  ;;  %v4000_v48 = vld [vmem:[#allocation14 + $0x18] sm:$0xff] }
 0xe87   :  { %5602 = vpow2.f32 %v4205_v50  ;;  %v4206_v36 = vmul.f32 -1.442695, %v3431_v54  ;;  %v4207_v10 = vmul.f32 -1.442695, %v3442_v14  ;;  %v5415_v50 = vpack.c.bf16 %v4000_v48, %v3999_v4  ;;  %v4001_v54 = vld [vmem:[#allocation14 + $0x20] sm:$0xff] }
 0xe89   :  { %5604 = vpow2.f32 %v4206_v36  ;;  %v4002_v36 = vld [vmem:[#allocation14 + $0x28] sm:$0xff] }
 0xe8a   :  { %5606 = vpow2.f32 %v4207_v10  ;;  %v5418_v14 = vpack.c.bf16 %v4002_v36, %v4001_v54  ;;  %v4003_v10 = vld [vmem:[#allocation14 + $0x30] sm:$0xff] }
 0xe91   :  { %v5603_v27 = vpop.eup %5602 }
 0xe92   :  { %v3427_v37 = vadd.f32 1.0, %v5603_v27 }
 0xe93   :  { %v5605_v62 = vpop.eup %5604 }
 0xe94   :  { %5608 = vrcp.f32 %v3427_v37  ;;  %v3436_v53 = vadd.f32 1.0, %v5605_v62  ;;  %v5607_v58 = vpop.eup %5606  ;;  %v4006_v37 = vld [vmem:[#allocation14 + $0x48] sm:$0xff] }
 0xe95   :  { %5610 = vtanh.f32 %v3439_v33  ;;  %v3447_v38 = vadd.f32 1.0, %v5607_v58  ;;  %v4005_v33 = vld [vmem:[#allocation14 + $0x40] sm:$0xff]  ;;  %v4008_v58 = vld [vmem:[#allocation14 + $0x58] sm:$0xff] }
 0xe96   :  { %5612 = vrcp.f32 %v3436_v53  ;;  %v5424_v62 = vpack.c.bf16 %v4006_v37, %v4005_v33  ;;  %v4007_v53 = vld [vmem:[#allocation14 + $0x50] sm:$0xff] }
 0xe97   :  { %5614 = vrcp.f32 %v3447_v38 }
 0xe9e   :  { %v5609_v6 = vpop.eup %5608 }
 0xe9f   :  { %v5611_v52 = vpop.eup %5610 }
 0xea0   :  { %v5613_v16 = vpop.eup %5612  ;;  %v3451_v18 = vmul.f32 %v5611_v52, %v5609_v6  ;;  %v5427_v6 = vpack.c.bf16 %v4008_v58, %v4007_v53  ;;  %v4009_v52 = vld [vmem:[#allocation14 + $0x60] sm:$0xff] }
 0xea1   :  { %v3450_v57 = vmul.f32 %v5613_v16, %v6883_v43  ;;  %v5615_v24 = vpop.eup %5614  ;;  %v4010_v16 = vld [vmem:[#allocation14 + $0x68] sm:$0xff] }
 0xea2   :  { %v5430_v38 = vpack.c.bf16 %v4010_v16, %v4009_v52 }
 0xea3   :  { %v6990_v23 = vadd.f32 %v3451_v18, %v3450_v57  ;;  %v4011_v57 = vld [vmem:[#allocation14 + $0x70] sm:$0xff]  ;;  %v4012_v18 = vld [vmem:[#allocation14 + $0x78] sm:$0xff] }
 0xea5   :  { %5616 = vtanh.f32 %v6990_v23 }
 0xeaf   :  { %v5617_v22 = vpop.eup %5616 }
 0xeb0   :  { %v3454_v26 = vmul.f32 %v5617_v22, %v5615_v24 }
 0xeb2   :  { %3455 = vst [vmem:[#allocation4 + $0x3] sm:$0x1] %v3454_v26  ;;  %3587 = vmatmul.mubr.f32.vlgmr.msra.gmra.mrb[28].mxu1 %v3454_v26  ;;  %3658 = vmatmul.mubr.f32.vlgmr.msra.gmra.mrb[30].mxu0 %v3454_v26 }
 0xeb3   :  { %5350 = vmatpush1.bf16.msra.mxu1 %v6892_v59  ;;  %5382 = vmatpush1.bf16.msra.mxu0 %v6895_v2 }
 0xeb4   :  { %5352 = vmatprep.subr.bf16.mxu1 %v6900_v30  ;;  %5384 = vmatprep.subr.bf16.mxu0 %v6902_v32 }
 0xeb5   :  { %3856 = vmatprep.mubr.f32.mxu1 %v6707_v39  ;;  %3927 = vmatprep.mubr.f32.mxu0 %v6707_v39 }
 0xeb7   :  { %5354 = vmatpush1.bf16.msra.mxu1 %v6904_v35  ;;  %5386 = vmatpush1.bf16.msra.mxu0 %v6907_v56 }
 0xeb8   :  { %5356 = vmatprep.subr.bf16.mxu1 %v6911_v63  ;;  %5388 = vmatprep.subr.bf16.mxu0 %v6913_v19 }
 0xebb   :  { %5358 = vmatpush1.bf16.msra.mxu1 %v6916_v25  ;;  %5390 = vmatpush1.bf16.msra.mxu0 %v6920_v0  ;;  %v3457_v0 = vld [vmem:[#allocation3 + $0x4] ss:$8 sm:$0xf] }
 0xebc   :  { %5360 = vmatprep.subr.bf16.mxu1 %v6922_v5  ;;  %5392 = vmatprep.subr.bf16.mxu0 %v6924_v44 }
 0xebf   :  { %5362 = vmatpush1.bf16.msra.mxu1 %v6927_v60  ;;  %5394 = vmatpush1.bf16.msra.mxu0 %v6931_v47 }
 0xec0   :  { %5364 = vmatprep.subr.bf16.mxu1 %v6933_v55  ;;  %5396 = vmatprep.subr.bf16.mxu0 %v6936_v9 }
 0xec3   :  { %5366 = vmatpush1.bf16.msra.mxu1 %v6939_v41  ;;  %5398 = vmatpush1.bf16.msra.mxu0 %v6943_v49 }
 0xec4   :  { %5368 = vmatprep.subr.bf16.mxu1 %v6945_v61  ;;  %5400 = vmatprep.subr.bf16.mxu0 %v6948_v17 }
 0xec7   :  { %5370 = vmatpush1.bf16.msra.mxu1 %v6951_v51  ;;  %5402 = vmatpush1.bf16.msra.mxu0 %v6955_v8 }
 0xec8   :  { %5372 = vmatprep.subr.bf16.mxu1 %v6957_v15  ;;  %5404 = vmatprep.subr.bf16.mxu0 %v6960_v46 }
 0xecb   :  { %5374 = vmatpush1.bf16.msra.mxu1 %v6963_v29  ;;  %5406 = vmatpush1.bf16.msra.mxu0 %v6967_v34 }
 0xecc   :  { %5376 = vmatprep.subr.bf16.mxu1 %v6969_v42  ;;  %5408 = vmatprep.subr.bf16.mxu0 %v6972_v31 }
 0xecf   :  { %5378 = vmatpush1.bf16.msra.mxu1 %v6975_v28  ;;  %5410 = vmatpush1.bf16.msra.mxu0 %v6979_v20 }
 0xed0   :  { %5411 = vmatprep.subr.bf16.mxu1 %v5877_v1 }
 0xf85   :  { %v3588_v43 = vpop.f32.mrb[28].mxu1  ;;  %v3659_v59 = vpop.f32.mrb[30].mxu0 }
 0xf86   :  { %v3590_v2 = vpop.f32.mrb[29].mxu1  ;;  %v3661_v30 = vpop.f32.mrb[31].mxu0 }
 0xf87   :  { %v3668_v32 = vcombine.low %v3588_v43, %v3590_v2  ;;  %v3669_v35 = vcombine.low %v3659_v59, %v3661_v30 }
 0xf89   :  { %v3676_v56 = vrot.slane %v3668_v32, %v6350_v45  ;;  %v3683_v63 = vrot.slane %v3669_v35, %v6350_v45 }
 0xf8b   :  { %v3684_v19 = vcombine.low %v3676_v56, %v3683_v63  ;;  %v3727_v63 = vld [vmem:[#allocation3 + $0x5] ss:$8 sm:$0xf] }
 0xf8d   :  { %v3691_v25 = vrot.slane %v3684_v19, %v6350_v45 }
 0xf8f   :  { %v3693_v5 = vadd.f32 %v3691_v25, %v3457_v0 }
 0xf91   :  { %v4208_v44 = vmul.f32 -1.442695, %v3693_v5  ;;  %v3701_v60 = vrot.slane %v3693_v5, 1  ;;  %v3712_v55 = vrot.slane %v3693_v5, 3  ;;  %v3709_v49 = vrot.slane %v3693_v5, 2 }
 0xf93   :  { %5618 = vpow2.f32 %v4208_v44  ;;  %v4209_v47 = vmul.f32 -1.442695, %v3701_v60  ;;  %v4210_v9 = vmul.f32 -1.442695, %v3712_v55 }
 0xf95   :  { %5620 = vpow2.f32 %v4209_v47 }
 0xf96   :  { %5622 = vpow2.f32 %v4210_v9 }
 0xf9d   :  { %v5619_v41 = vpop.eup %5618 }
 0xf9e   :  { %v3697_v61 = vadd.f32 1.0, %v5619_v41 }
 0xf9f   :  { %v5621_v17 = vpop.eup %5620 }
 0xfa0   :  { %5624 = vrcp.f32 %v3697_v61  ;;  %v3706_v51 = vadd.f32 1.0, %v5621_v17  ;;  %v5623_v8 = vpop.eup %5622 }
 0xfa1   :  { %5626 = vtanh.f32 %v3709_v49  ;;  %v3717_v34 = vadd.f32 1.0, %v5623_v8 }
 0xfa2   :  { %5628 = vrcp.f32 %v3706_v51 }
 0xfa3   :  { %5630 = vrcp.f32 %v3717_v34 }
 0xfaa   :  { %v5625_v15 = vpop.eup %5624 }
 0xfab   :  { %v5627_v46 = vpop.eup %5626 }
 0xfac   :  { %v5629_v29 = vpop.eup %5628  ;;  %v3721_v31 = vmul.f32 %v5627_v46, %v5625_v15 }
 0xfad   :  { %v3720_v42 = vmul.f32 %v5629_v29, %v6990_v23  ;;  %v5631_v20 = vpop.eup %5630  ;;  %v5433_v23 = vpack.c.bf16 %v4012_v18, %v4011_v57 }
 0xfaf   :  { %v7030_v28 = vadd.f32 %v3721_v31, %v3720_v42 }
 0xfb1   :  { %5632 = vtanh.f32 %v7030_v28 }
 0xfbb   :  { %v5633_v40 = vpop.eup %5632 }
 0xfbc   :  { %v3724_v7 = vmul.f32 %v5633_v40, %v5631_v20  ;;  %v4214_v20 = vld [vmem:[%s7119_s20] ss:$0 sm:$0xff]  ;;  %s5883_s20 = smov [#allocation17]  }
 0xfbd   :  { %s4141_s30 = sshll.u32 %s5883_s20, 4  ;;  %s4142_s30 = int_to_ptr.vmem [resolvable:$true] %s4141_s30 }
 0xfbe   :  { %3725 = vst [vmem:[#allocation4 + $0x4] sm:$0x1] %v3724_v7  ;;  %3857 = vmatmul.mubr.f32.vlgmr.msra.gmra.mrb[30].mxu1 %v3724_v7  ;;  %3928 = vmatmul.mubr.f32.vlgmr.msra.gmra.mrb[32].mxu0 %v3724_v7  ;;  %s5788_s13 = scalar_lea.vmem %s4142_s30, 16  ;;  %s5792_s25 = scalar_lea.vmem %s4142_s30, 32 }
 0xfbf   :  { %4437 = vmatprep.mubr.msk.f32.mxu1 %vm5878_vm0, %v6707_v39  ;;  %5413 = vmatpush3.bf16.msra.mxu1 %v5412_v3  ;;  %v4004_v39 = vld [vmem:[#allocation14 + $0x38] sm:$0xff]  ;;  %p5789_p6 = scmp.ne.s32.totalorder %s4142_s30, %s5788_s13  ;;  %p5793_p7 = scmp.lt.s32.totalorder %s4142_s30, %s4142_s30 }
 0xfc0   :  { %5414 = vmatprep.subr.bf16.mxu1 %v5877_v1  ;;  %v5421_v27 = vpack.c.bf16 %v4004_v39, %v4003_v10  ;;  %p5794_p8 = scmp.lt.s32.totalorder %s5792_s25, %s5788_s13 }
 0xfc2   :  { %p5795_p9 = por %p5794_p8, %p5793_p7 }
 0xfc3   :  { %5416 = vmatpush3.bf16.msra.mxu1 %v5415_v50 }
 0xfc4   :  { %5417 = vmatprep.subr.bf16.mxu1 %v5877_v1  ;;  %p5796_p10 = pnand %p5795_p9, %p5789_p6 }
 0xfc7   :  { %5419 = vmatpush3.bf16.msra.mxu1 %v5418_v14 }
 0xfc8   :  { %5420 = vmatprep.subr.bf16.mxu1 %v5877_v1 }
 0xfcb   :  { %5422 = vmatpush3.bf16.msra.mxu1 %v5421_v27 }
 0xfcc   :  { %5423 = vmatprep.subr.bf16.mxu1 %v5877_v1 }
 0xfcf   :  { %5425 = vmatpush3.bf16.msra.mxu1 %v5424_v62 }
 0xfd0   :  { %5426 = vmatprep.subr.bf16.mxu1 %v5877_v1 }
 0xfd3   :  { %5428 = vmatpush3.bf16.msra.mxu1 %v5427_v6 }
 0xfd4   :  { %5429 = vmatprep.subr.bf16.mxu1 %v5877_v1 }
 0xfd7   :  { %5431 = vmatpush3.bf16.msra.mxu1 %v5430_v38 }
 0xfd8   :  { %5432 = vmatprep.subr.bf16.mxu1 %v5877_v1 }
 0xfdb   :  { %5434 = vmatpush3.bf16.msra.mxu1 %v5433_v23 }
0x1091   :  { %v3858_v24 = vpop.f32.mrb[30].mxu1  ;;  %v3929_v22 = vpop.f32.mrb[32].mxu0 }
0x1092   :  { %v3860_v26 = vpop.f32.mrb[31].mxu1  ;;  %v3931_v43 = vpop.f32.mrb[33].mxu0 }
0x1093   :  { %v3938_v59 = vcombine.low %v3858_v24, %v3860_v26  ;;  %v3939_v2 = vcombine.low %v3929_v22, %v3931_v43 }
0x1095   :  { %v3946_v30 = vrot.slane %v3938_v59, %v6350_v45  ;;  %v3953_v32 = vrot.slane %v3939_v2, %v6350_v45 }
0x1097   :  { %v3954_v35 = vcombine.low %v3946_v30, %v3953_v32 }
0x1099   :  { %v3961_v56 = vrot.slane %v3954_v35, %v6350_v45 }
0x109b   :  { %v3963_v19 = vadd.f32 %v3961_v56, %v3727_v63 }
0x109d   :  { %v4211_v25 = vmul.f32 -1.442695, %v3963_v19  ;;  %v3971_v0 = vrot.slane %v3963_v19, 1  ;;  %v3982_v5 = vrot.slane %v3963_v19, 3  ;;  %v3979_v47 = vrot.slane %v3963_v19, 2 }
0x109f   :  { %5634 = vpow2.f32 %v4211_v25  ;;  %v4212_v1 = vmul.f32 -1.442695, %v3971_v0  ;;  %v4213_v44 = vmul.f32 -1.442695, %v3982_v5 }
0x10a1   :  { %5636 = vpow2.f32 %v4212_v1 }
0x10a2   :  { %5638 = vpow2.f32 %v4213_v44 }
0x10a9   :  { %v5635_v60 = vpop.eup %5634 }
0x10aa   :  { %v3967_v55 = vadd.f32 1.0, %v5635_v60 }
0x10ab   :  { %v5637_v9 = vpop.eup %5636 }
0x10ac   :  { %5640 = vrcp.f32 %v3967_v55  ;;  %v3976_v41 = vadd.f32 1.0, %v5637_v9  ;;  %v5639_v49 = vpop.eup %5638 }
0x10ad   :  { %5642 = vtanh.f32 %v3979_v47  ;;  %v3987_v51 = vadd.f32 1.0, %v5639_v49 }
0x10ae   :  { %5644 = vrcp.f32 %v3976_v41 }
0x10af   :  { %5646 = vrcp.f32 %v3987_v51 }
0x10b6   :  { %v5641_v45 = vpop.eup %5640 }
0x10b7   :  { %v5643_v61 = vpop.eup %5642 }
0x10b8   :  { %v5645_v17 = vpop.eup %5644  ;;  %v3991_v15 = vmul.f32 %v5643_v61, %v5641_v45 }
0x10b9   :  { %v3990_v8 = vmul.f32 %v5645_v17, %v7030_v28  ;;  %v5647_v29 = vpop.eup %5646 }
0x10bb   :  { %v3992_v46 = vadd.f32 %v3991_v15, %v3990_v8 }
0x10bd   :  { %5648 = vtanh.f32 %v3992_v46 }
0x10c7   :  { %v5649_v34 = vpop.eup %5648 }
0x10c8   :  { %v3994_v42 = vmul.f32 %v5649_v34, %v5647_v29 }
0x10ca   :  { %3995 = vst [vmem:[#allocation4 + $0x5] sm:$0x1] %v3994_v42 }
0x10d1   :  { %v3996_v31 = vld [vmem:[#allocation4] sm:$0xff] }
0x10d2   :  { %4438 = vmatmul.mubr.f32.vlgmr.msra.gmra.mrb[32].mxu1 %v3996_v31 }
0x11a5   :  { %v4086_v40 = vpop.f32.mrb[32].mxu1 }
0x11a6   :  { %v4087_v7 = vadd.f32 %v4214_v20, %v4086_v40  ;;  %v4439_v13 = vpop.f32.mrb[33].mxu1 }
0x11a8   :  { %v4091_v28 = vsel %vm4090_vm6, %v4087_v7, -inf }
0x11a9   :  { %4092 = vmax.xlane.f32.xlu1 %v4091_v28 }
0x1236   :  { %v4093_v11 = vpop.xlane.xlu1 %4092 }
0x1237   :  { %v4094_v3 = vsub.f32 %v4087_v7, %v4093_v11  ;;  %vm4104_vm7 = vcmp.eq.f32.partialorder %v4087_v7, %v4093_v11 }
0x1238   :  { %v4105_v4 = vsel %vm4104_vm7, %v6189_v21, 128 }
0x1239   :  { %v4095_v48 = vmul.f32 1.442695, %v4094_v3  ;;  %v4106_v50 = vsel %vm4090_vm6, %v4105_v4, 2147483647 }
0x123a   :  { %v4108_v54 = vshra.s32 %v4106_v50, 16  ;;  %v4107_v39 = vand.u32 65535, %v4106_v50 }
0x123b   :  { %5650 = vpow2.f32 %v4095_v48 }
0x123c   :  { %v4110_v36 = vcvt.s32.f32 %v4108_v54  ;;  %v4109_v33 = vcvt.s32.f32 %v4107_v39 }
0x123e   :  { %4111 = vmin.xlane.f32.xlu0 %v4110_v36 }
0x1245   :  { %v5651_v14 = vpop.eup %5650 }
0x1246   :  { %v4097_v10 = vsel %vm4090_vm6, %v5651_v14, 0.0 }
0x1247   :  { %4098 = vadd.xlane.f32.xlu0 %v4097_v10 }
0x125d   :  { %1868 = vrot.lane.b32.xlu0 %v6634_v12, %s5882_s11 }
0x12cb   :  { %v7055_v27 = vpop.xlane.xlu0 %4111 }
0x12cc   :  { %vm4113_vm8 = vcmp.eq.f32.partialorder %v4110_v36, %v7055_v27 }
0x12cd   :  { %v4114_v21 = vsel %vm4113_vm8, %v4109_v33, inf }
0x12ce   :  { %4115 = vmin.xlane.f32.xlu1 %v4114_v21 }
0x12d4   :  { %v4099_v37 = vpop.xlane.xlu0 %4098 }
0x12d5   :  { %5652 = vlog2.f32 %v4099_v37 }
0x12d8   :  { %v1869_v62 = vpop.permute.xlu0 %1868 }
0x12d9   :  { %1871 = vst.msk [vmem:[#allocation19] sm:$0x1] %vm1865_vm4, %v1869_v62 }
0x12df   :  { %v5653_v53 = vpop.eup %5652 }
0x12e0   :  { %v4101_v58 = vmul.f32 0.6931472, %v5653_v53 }
0x12e1   :  { %5799 = shalt.err (!%p5796_p10)
}
0x12e2   :  { %s5800_s26 = scalar_lea.hbm %s7122_s23, 16 }
0x12e3   :  { %p5801_p11 = scmp.ne.s32.totalorder %s7122_s23, %s5800_s26  ;;  %p5804_p12 = scmp.lt.u32.totalorder %s5800_s26, %s7122_s23 }
0x12e5   :  { %p5806_p13 = pnand %p5804_p12, %p5801_p11 }
0x12e7   :  { %5809 = shalt.err (!%p5806_p13)
}
0x12e8   :  { %4144 = dma.vmem_to_hbm [thread:$0]  %s4142_s30, 16, %s7122_s23, [#allocation18]   ;;  %v4102_v12 = vsub.f32 %v4094_v3, %v4101_v58 }
0x12e9   :  { %s5885_s19 = smov [#allocation19]   ;;  %s5810_s18 = scalar_lea.vmem %s4132_s2, 128 }
0x12ea   :  { %4103 = vst [vmem:[#allocation16] sm:$0x3f] %v4102_v12  ;;  %s4151_s17 = sshll.u32 %s5885_s19, 4  ;;  %p5811_p0 = scmp.ne.s32.totalorder %s4132_s2, %s5810_s18  ;;  %s4152_s17 = int_to_ptr.vmem [resolvable:$true] %s4151_s17 }
0x12eb   :  { %p5815_p1 = scmp.lt.s32.totalorder %s4132_s2, %s4132_s2  ;;  %p5816_p2 = scmp.lt.s32.totalorder %s5810_s18, %s5810_s18 }
0x12ed   :  { %p5817_p3 = por %p5816_p2, %p5815_p1 }
0x12ef   :  { %p5818_p4 = pnand %p5817_p3, %p5811_p0 }
0x12f1   :  { %5821 = shalt.err (!%p5818_p4)
}
0x12f2   :  { %s5822_s28 = scalar_lea.hbm %s7121_s22, 128 }
0x12f3   :  { %p5823_p5 = scmp.ne.s32.totalorder %s7121_s22, %s5822_s28  ;;  %p5826_p6 = scmp.lt.u32.totalorder %s5822_s28, %s7121_s22 }
0x12f5   :  { %p5828_p7 = pnand %p5826_p6, %p5823_p5 }
0x12f7   :  { %5831 = shalt.err (!%p5828_p7)
}
0x12f8   :  { %4134 = dma.vmem_to_hbm [thread:$0]  %s4132_s2, 128, %s7121_s22, [#allocation7]  }
0x12f9   :  { %s5832_s15 = scalar_lea.vmem %s4152_s17, 16  ;;  %s5836_s14 = scalar_lea.vmem %s4152_s17, 32 }
0x12fa   :  { %p5833_p8 = scmp.ne.s32.totalorder %s4152_s17, %s5832_s15  ;;  %p5837_p9 = scmp.lt.s32.totalorder %s4152_s17, %s4152_s17 }
0x12fb   :  { %p5838_p10 = scmp.lt.s32.totalorder %s5836_s14, %s5832_s15 }
0x12fd   :  { %p5839_p11 = por %p5838_p10, %p5837_p9 }
0x12ff   :  { %p5840_p12 = pnand %p5839_p11, %p5833_p8 }
0x1301   :  { %5843 = shalt.err (!%p5840_p12)
}
0x1302   :  { %s7148_s30 = sld [smem:[#allocation36_spill]] }
0x1308   :  { %s5844_s29 = scalar_lea.hbm %s7148_s30, 16 }
0x1309   :  { %p5845_p13 = scmp.ne.s32.totalorder %s7148_s30, %s5844_s29  ;;  %p5848_p0 = scmp.lt.u32.totalorder %s5844_s29, %s7148_s30 }
0x130b   :  { %p5850_p1 = pnand %p5848_p0, %p5845_p13 }
0x130d   :  { %5853 = shalt.err (!%p5850_p1)
}
0x130e   :  { %4154 = dma.vmem_to_hbm [thread:$0]  %s4152_s17, 16, %s7148_s30, [#allocation18]   ;;  %v4118_v6 = vcvt.f32.s32 %v7055_v27  ;;  %vm4121_vm9 = vcmask 5120  }
0x130f   :  { %s7149_s21 = sld [smem:[#allocation35_spill]] }
0x1310   :  { %v4119_v16 = vshll.u32 %v4118_v6, 16 }
0x135b   :  { %v4116_v52 = vpop.xlane.xlu1 %4115 }
0x135c   :  { %v4117_v38 = vcvt.f32.s32 %v4116_v52 }
0x135e   :  { %v4120_v57 = vadd.s32 %v4119_v16, %v4117_v38 }
0x1360   :  { %4122 = vst.msk [vmem:[%s7149_s21] sm:$0x3f] %vm4121_vm9, %v4120_v57 }
0x1361   :  { %5862 = dma.done.wait [#allocation7], 128  }
0x1362   :  { %5863 = vsyncadd [#allocation7], 4294967168 }
0x1363   :  { %5864 = dma.done.wait [#allocation18], 32  }
0x1364   :  { %5865 = vsyncadd [#allocation18], 4294967264 }
0x1365   :  { %4166 = vsyncpa [#allocation6], 1 }
0x1366   :  { %4167 = vsyncpa [#allocation9], 1 }
0x1367   :  { %4168 = vsyncpa [#allocation12], 1 }
0x1368   :  { %4169 = vsyncpa [#allocation15], 1 }
0x1369   :  { %4170 = vsyncpa [#allocation7], 1 }
0x136a   :  { %4171 = vsyncpa [#allocation18], 1 }

</bundles_post_ra>
